<compile_context>
chip_gen: v7x
topology: tpu7x:2x2x1
jax: 0.10.0
libtpu: 0.0.40
codegen_flags: <defaults>
</compile_context>

<pallas_src>
import functools
import math

import jax
import jax.numpy as jnp
from jax import lax
from jax.experimental import pallas as pl
from jax.experimental.pallas import tpu as pltpu

LEAKY_SLOPE = 0.1
BN_EPS = 1e-5


# ---------------------------------------------------------------------------
# Pallas kernel: one (batch, row-tile, cout-tile) block of
#     leaky_relu( conv(x, w_bn_folded) + bias_folded )
# ---------------------------------------------------------------------------
def _conv_bn_leaky_kernel(x_ref, w_ref, b_ref, o_ref, acc_ref, *,
                          kh, kw, stride, th, wo):
    """
    x_ref   : (1, Hp, Wp, Cin)  bf16, spatially pre-padded full image
    w_ref   : (kh, kw, Cin, TN) bf16, BN scale already folded in
    b_ref   : (1, TN)           f32 folded bias
    o_ref   : (1, th, Wo, TN)   output tile (bf16)
    acc_ref : (th*Wo, TN)       f32 VMEM accumulator (scratch)
    """
    r = pl.program_id(1)
    tn = o_ref.shape[-1]
    row0 = pl.multiple_of(r * (th * stride), th * stride)

    first = True
    for i in range(kh):
        for j in range(kw):
            if stride == 1:
                patch = x_ref[0, pl.ds(row0 + i, th), pl.ds(j, wo), :]
            else:  # strided window read (not exercised by the demo below)
                patch = x_ref[0, pl.ds(row0 + i, th, stride=stride),
                              pl.ds(j, wo, stride=stride), :]
            lhs = patch.reshape(th * wo, patch.shape[-1])        # (M, Cin) bf16
            contrib = jnp.dot(lhs, w_ref[i, j],                  # (Cin, TN) bf16
                              preferred_element_type=jnp.float32)
            if first:
                acc_ref[...] = contrib
                first = False
            else:
                acc_ref[...] += contrib

    y = acc_ref[...] + b_ref[...]            # (1, TN) bias broadcasts over rows
    y = jnp.maximum(y, LEAKY_SLOPE * y)      # LeakyReLU (slope < 1)
    o_ref[0] = y.reshape(th, wo, tn).astype(o_ref.dtype)


# ---------------------------------------------------------------------------
# Tiling helpers
# ---------------------------------------------------------------------------
def _pick_row_tile(ho, wo, target_rows=256):
    """Largest divisor th of Ho with th*Wo <= target (M-tile for the MXU)."""
    best = 1
    for t in range(1, ho + 1):
        if ho % t == 0 and t * wo <= max(target_rows, wo):
            best = t
    return best


def _pick_cout_tile(cout, cap=256):
    if cout <= cap:
        return cout
    for t in range(cap, 0, -128):
        if t % 128 == 0 and cout % t == 0:
            return t
    return cout


# ---------------------------------------------------------------------------
# Wrapper: CNNBlock forward (PyTorch NCHW convention at the boundary)
# ---------------------------------------------------------------------------
def conv_bn_leaky(x_nchw, params, *, block_cout=None, out_dtype=jnp.bfloat16):
    """CNNBlock forward. x_nchw: (B, Cin, H, W) -> (B, Cout, Ho, Wo).

    params holds PyTorch-layout tensors:
      w (Cout, Cin, kh, kw), b (Cout,), gamma/beta/mean/var (Cout,),
      stride, padding (python ints).
    """
    w = params["w"]
    cout, cin, kh, kw = w.shape
    s = int(params["stride"])
    p = int(params["padding"])
    B, cin2, H, W = x_nchw.shape
    assert cin2 == cin

    Ho = (H + 2 * p - kh) // s + 1
    Wo = (W + 2 * p - kw) // s + 1

    # Fold eval-mode BatchNorm: scale into the weights, shift into one bias.
    bn_scale = params["gamma"] / jnp.sqrt(params["var"] + BN_EPS)        # (Cout,)
    w_eff = (jnp.transpose(w, (2, 3, 1, 0)) * bn_scale).astype(jnp.bfloat16)
    bias_eff = (bn_scale * (params["b"] - params["mean"])
                + params["beta"]).reshape(1, cout).astype(jnp.float32)

    # bf16 activations; the only XLA-side data movement is the spatial pad.
    x = jnp.transpose(x_nchw, (0, 2, 3, 1)).astype(jnp.bfloat16)         # NHWC
    if p > 0:
        x = jnp.pad(x, ((0, 0), (p, p), (p, p), (0, 0)))
    Hp, Wp = x.shape[1], x.shape[2]

    th = _pick_row_tile(Ho, Wo)
    tn = block_cout if block_cout is not None else _pick_cout_tile(cout)
    assert Ho % th == 0
    assert cout % tn == 0 and (tn == cout or tn % 128 == 0)
    grid = (B, Ho // th, cout // tn)

    kernel = functools.partial(_conv_bn_leaky_kernel,
                               kh=kh, kw=kw, stride=s, th=th, wo=Wo)

    out_nhwc = pl.pallas_call(
        kernel,
        out_shape=jax.ShapeDtypeStruct((B, Ho, Wo, cout), out_dtype),
        grid=grid,
        in_specs=[
            # Full padded image per batch element; block index only depends on
            # b, so it is DMA'd once and reused across the (r, c) steps.
            pl.BlockSpec((1, Hp, Wp, cin), lambda b, r, c: (b, 0, 0, 0)),
            pl.BlockSpec((kh, kw, cin, tn), lambda b, r, c: (0, 0, 0, c)),
            pl.BlockSpec((1, tn), lambda b, r, c: (0, c)),
        ],
        out_specs=pl.BlockSpec((1, th, Wo, tn), lambda b, r, c: (b, r, 0, c)),
        scratch_shapes=[pltpu.VMEM((th * Wo, tn), jnp.float32)],
        compiler_params=pltpu.CompilerParams(
            dimension_semantics=("parallel", "parallel", "parallel")),
    )(x, w_eff, bias_eff)

    return jnp.transpose(out_nhwc, (0, 3, 1, 2))   # back to NCHW


# ---------------------------------------------------------------------------
# Demo / self-check
# ---------------------------------------------------------------------------
if __name__ == "__main__":
    key = jax.random.PRNGKey(0)
    k_x, k_w, k_b, k_g, k_be, k_m, k_v = jax.random.split(key, 7)

    # Small CNNBlock config: Conv2d(16 -> 256, kernel=3, stride=1, padding=1)
    B, Cin, H, W = 2, 16, 32, 32
    Cout, K, S, P = 256, 3, 1, 1

    x = jax.random.normal(k_x, (B, Cin, H, W), jnp.float32)
    fan_in = Cin * K * K
    params = dict(
        w=jax.random.normal(k_w, (Cout, Cin, K, K), jnp.float32)
          * math.sqrt(2.0 / fan_in),
        b=0.01 * jax.random.normal(k_b, (Cout,), jnp.float32),
        gamma=1.0 + 0.1 * jax.random.normal(k_g, (Cout,), jnp.float32),
        beta=0.1 * jax.random.normal(k_be, (Cout,), jnp.float32),
        mean=0.1 * jax.random.normal(k_m, (Cout,), jnp.float32),
        var=1.0 + 0.1 * jnp.abs(jax.random.normal(k_v, (Cout,), jnp.float32)),
        stride=S, padding=P)

    # block_cout=128 exercises the cout-tiling grid axis (2 tiles) while
    # keeping every output store lane-dense.
    out = conv_bn_leaky(x, params, block_cout=128)
    out = jax.block_until_ready(out)
    assert out.shape == (B, Cout, H, W), out.shape

    # Reference with the same bf16-rounded inputs, f32 math.
    bn_scale = params["gamma"] / jnp.sqrt(params["var"] + BN_EPS)
    w_ref = (jnp.transpose(params["w"], (2, 3, 1, 0)) * bn_scale).astype(
        jnp.bfloat16).astype(jnp.float32)
    bias_ref = bn_scale * (params["b"] - params["mean"]) + params["beta"]
    x_nhwc = jnp.transpose(x, (0, 2, 3, 1)).astype(jnp.bfloat16).astype(
        jnp.float32)
    ref = lax.conv_general_dilated(
        x_nhwc, w_ref, window_strides=(S, S), padding=[(P, P), (P, P)],
        dimension_numbers=("NHWC", "HWIO", "NHWC"))
    ref = ref + bias_ref
    ref = jnp.maximum(ref, LEAKY_SLOPE * ref)
    ref = jnp.transpose(ref, (0, 3, 1, 2))

    got = out.astype(jnp.float32)
    assert bool(jnp.all(jnp.isfinite(got)))
    assert bool(jnp.allclose(got, ref, rtol=2e-2, atol=2e-2)), float(
        jnp.max(jnp.abs(got - ref)))
    print("KERNEL_OK")
</pallas_src>

<mosaic_0001>
module attributes {stable_mosaic.version = 11 : i64} {
  func.func @_conv_bn_leaky_kernel(%arg0: i32, %arg1: i32, %arg2: i32, %arg3: memref<1x34x34x16xbf16, #tpu.memory_space<vmem>>, %arg4: memref<3x3x16x128xbf16, #tpu.memory_space<vmem>>, %arg5: memref<1x128xf32, #tpu.memory_space<vmem>>, %arg6: memref<1x8x32x128xbf16, #tpu.memory_space<vmem>>, %arg7: memref<256x128xf32, #tpu.memory_space<vmem>>) attributes {dimension_semantics = [#tpu.dimension_semantics<parallel>, #tpu.dimension_semantics<parallel>, #tpu.dimension_semantics<parallel>], iteration_bounds = array<i64: 2, 4, 2>, scalar_prefetch = 0 : i64, scratch_operands = 1 : i64, tpu.core_type = #tpu.core_type<tc>, window_params = [{transform_indices = @transform_0, window_bounds = array<i64: 1, 34, 34, 16>}, {transform_indices = @transform_1, window_bounds = array<i64: 3, 3, 16, 128>}, {transform_indices = @transform_2, window_bounds = array<i64: 1, 128>}, {transform_indices = @transform_3, window_bounds = array<i64: 1, 8, 32, 128>}]} {
    %c8_i32 = arith.constant 8 : i32
    %0 = arith.muli %arg1, %c8_i32 : i32
    %1 = tpu.assume_multiple %0, 8 : i32
    %c0_i32 = arith.constant 0 : i32
    %2 = arith.addi %1, %c0_i32 : i32
    %c0 = arith.constant 0 : index
    %3 = arith.index_cast %2 : i32 to index
    %c0_0 = arith.constant 0 : index
    %c0_1 = arith.constant 0 : index
    %4 = vector.load %arg3[%c0, %3, %c0_0, %c0_1] : memref<1x34x34x16xbf16, #tpu.memory_space<vmem>>, vector<1x8x32x16xbf16>
    %5 = vector.shape_cast %4 : vector<1x8x32x16xbf16> to vector<8x32x16xbf16>
    %6 = vector.shape_cast %5 : vector<8x32x16xbf16> to vector<256x16xbf16>
    %c0_2 = arith.constant 0 : index
    %c0_3 = arith.constant 0 : index
    %c0_4 = arith.constant 0 : index
    %c0_5 = arith.constant 0 : index
    %7 = vector.load %arg4[%c0_2, %c0_3, %c0_4, %c0_5] : memref<3x3x16x128xbf16, #tpu.memory_space<vmem>>, vector<1x1x16x128xbf16>
    %8 = vector.shape_cast %7 : vector<1x1x16x128xbf16> to vector<16x128xbf16>
    %cst = arith.constant dense<0.000000e+00> : vector<256x128xf32>
    %9 = tpu.matmul %6, %8, %cst {dimension_numbers = #tpu.dot_dimension_numbers<[1], [0], [0], [1], [0, 0, 1, 1], [], []>} : vector<256x16xbf16>, vector<16x128xbf16>, vector<256x128xf32> -> vector<256x128xf32>
    %c0_6 = arith.constant 0 : index
    %c0_7 = arith.constant 0 : index
    %10 = vector.load %arg7[%c0_6, %c0_7] : memref<256x128xf32, #tpu.memory_space<vmem>>, vector<256x128xf32>
    tpu.vector_store %arg7[%c0_6, %c0_7], %9 {strides = array<i32>} : memref<256x128xf32, #tpu.memory_space<vmem>>, vector<256x128xf32>,
    %c0_i32_8 = arith.constant 0 : i32
    %11 = arith.addi %1, %c0_i32_8 : i32
    %c0_9 = arith.constant 0 : index
    %12 = arith.index_cast %11 : i32 to index
    %c1 = arith.constant 1 : index
    %c0_10 = arith.constant 0 : index
    %13 = vector.load %arg3[%c0_9, %12, %c1, %c0_10] : memref<1x34x34x16xbf16, #tpu.memory_space<vmem>>, vector<1x8x32x16xbf16>
    %14 = vector.shape_cast %13 : vector<1x8x32x16xbf16> to vector<8x32x16xbf16>
    %15 = vector.shape_cast %14 : vector<8x32x16xbf16> to vector<256x16xbf16>
    %c0_11 = arith.constant 0 : index
    %c1_12 = arith.constant 1 : index
    %c0_13 = arith.constant 0 : index
    %c0_14 = arith.constant 0 : index
    %16 = vector.load %arg4[%c0_11, %c1_12, %c0_13, %c0_14] : memref<3x3x16x128xbf16, #tpu.memory_space<vmem>>, vector<1x1x16x128xbf16>
    %17 = vector.shape_cast %16 : vector<1x1x16x128xbf16> to vector<16x128xbf16>
    %cst_15 = arith.constant dense<0.000000e+00> : vector<256x128xf32>
    %18 = tpu.matmul %15, %17, %cst_15 {dimension_numbers = #tpu.dot_dimension_numbers<[1], [0], [0], [1], [0, 0, 1, 1], [], []>} : vector<256x16xbf16>, vector<16x128xbf16>, vector<256x128xf32> -> vector<256x128xf32>
    %c0_16 = arith.constant 0 : index
    %c0_17 = arith.constant 0 : index
    %19 = vector.load %arg7[%c0_16, %c0_17] : memref<256x128xf32, #tpu.memory_space<vmem>>, vector<256x128xf32>
    %20 = arith.addf %19, %18 : vector<256x128xf32>
    %c0_18 = arith.constant 0 : index
    %c0_19 = arith.constant 0 : index
    %21 = vector.load %arg7[%c0_18, %c0_19] : memref<256x128xf32, #tpu.memory_space<vmem>>, vector<256x128xf32>
    tpu.vector_store %arg7[%c0_18, %c0_19], %20 {strides = array<i32>} : memref<256x128xf32, #tpu.memory_space<vmem>>, vector<256x128xf32>,
    %c0_i32_20 = arith.constant 0 : i32
    %22 = arith.addi %1, %c0_i32_20 : i32
    %c0_21 = arith.constant 0 : index
    %23 = arith.index_cast %22 : i32 to index
    %c2 = arith.constant 2 : index
    %c0_22 = arith.constant 0 : index
    %24 = vector.load %arg3[%c0_21, %23, %c2, %c0_22] : memref<1x34x34x16xbf16, #tpu.memory_space<vmem>>, vector<1x8x32x16xbf16>
    %25 = vector.shape_cast %24 : vector<1x8x32x16xbf16> to vector<8x32x16xbf16>
    %26 = vector.shape_cast %25 : vector<8x32x16xbf16> to vector<256x16xbf16>
    %c0_23 = arith.constant 0 : index
    %c2_24 = arith.constant 2 : index
    %c0_25 = arith.constant 0 : index
    %c0_26 = arith.constant 0 : index
    %27 = vector.load %arg4[%c0_23, %c2_24, %c0_25, %c0_26] : memref<3x3x16x128xbf16, #tpu.memory_space<vmem>>, vector<1x1x16x128xbf16>
    %28 = vector.shape_cast %27 : vector<1x1x16x128xbf16> to vector<16x128xbf16>
    %cst_27 = arith.constant dense<0.000000e+00> : vector<256x128xf32>
    %29 = tpu.matmul %26, %28, %cst_27 {dimension_numbers = #tpu.dot_dimension_numbers<[1], [0], [0], [1], [0, 0, 1, 1], [], []>} : vector<256x16xbf16>, vector<16x128xbf16>, vector<256x128xf32> -> vector<256x128xf32>
    %c0_28 = arith.constant 0 : index
    %c0_29 = arith.constant 0 : index
    %30 = vector.load %arg7[%c0_28, %c0_29] : memref<256x128xf32, #tpu.memory_space<vmem>>, vector<256x128xf32>
    %31 = arith.addf %30, %29 : vector<256x128xf32>
    %c0_30 = arith.constant 0 : index
    %c0_31 = arith.constant 0 : index
    %32 = vector.load %arg7[%c0_30, %c0_31] : memref<256x128xf32, #tpu.memory_space<vmem>>, vector<256x128xf32>
    tpu.vector_store %arg7[%c0_30, %c0_31], %31 {strides = array<i32>} : memref<256x128xf32, #tpu.memory_space<vmem>>, vector<256x128xf32>,
    %c1_i32 = arith.constant 1 : i32
    %33 = arith.addi %1, %c1_i32 : i32
    %c0_32 = arith.constant 0 : index
    %34 = arith.index_cast %33 : i32 to index
    %c0_33 = arith.constant 0 : index
    %c0_34 = arith.constant 0 : index
    %35 = vector.load %arg3[%c0_32, %34, %c0_33, %c0_34] : memref<1x34x34x16xbf16, #tpu.memory_space<vmem>>, vector<1x8x32x16xbf16>
    %36 = vector.shape_cast %35 : vector<1x8x32x16xbf16> to vector<8x32x16xbf16>
    %37 = vector.shape_cast %36 : vector<8x32x16xbf16> to vector<256x16xbf16>
    %c1_35 = arith.constant 1 : index
    %c0_36 = arith.constant 0 : index
    %c0_37 = arith.constant 0 : index
    %c0_38 = arith.constant 0 : index
    %38 = vector.load %arg4[%c1_35, %c0_36, %c0_37, %c0_38] : memref<3x3x16x128xbf16, #tpu.memory_space<vmem>>, vector<1x1x16x128xbf16>
    %39 = vector.shape_cast %38 : vector<1x1x16x128xbf16> to vector<16x128xbf16>
    %cst_39 = arith.constant dense<0.000000e+00> : vector<256x128xf32>
    %40 = tpu.matmul %37, %39, %cst_39 {dimension_numbers = #tpu.dot_dimension_numbers<[1], [0], [0], [1], [0, 0, 1, 1], [], []>} : vector<256x16xbf16>, vector<16x128xbf16>, vector<256x128xf32> -> vector<256x128xf32>
    %c0_40 = arith.constant 0 : index
    %c0_41 = arith.constant 0 : index
    %41 = vector.load %arg7[%c0_40, %c0_41] : memref<256x128xf32, #tpu.memory_space<vmem>>, vector<256x128xf32>
    %42 = arith.addf %41, %40 : vector<256x128xf32>
    %c0_42 = arith.constant 0 : index
    %c0_43 = arith.constant 0 : index
    %43 = vector.load %arg7[%c0_42, %c0_43] : memref<256x128xf32, #tpu.memory_space<vmem>>, vector<256x128xf32>
    tpu.vector_store %arg7[%c0_42, %c0_43], %42 {strides = array<i32>} : memref<256x128xf32, #tpu.memory_space<vmem>>, vector<256x128xf32>,
    %c1_i32_44 = arith.constant 1 : i32
    %44 = arith.addi %1, %c1_i32_44 : i32
    %c0_45 = arith.constant 0 : index
    %45 = arith.index_cast %44 : i32 to index
    %c1_46 = arith.constant 1 : index
    %c0_47 = arith.constant 0 : index
    %46 = vector.load %arg3[%c0_45, %45, %c1_46, %c0_47] : memref<1x34x34x16xbf16, #tpu.memory_space<vmem>>, vector<1x8x32x16xbf16>
    %47 = vector.shape_cast %46 : vector<1x8x32x16xbf16> to vector<8x32x16xbf16>
    %48 = vector.shape_cast %47 : vector<8x32x16xbf16> to vector<256x16xbf16>
    %c1_48 = arith.constant 1 : index
    %c1_49 = arith.constant 1 : index
    %c0_50 = arith.constant 0 : index
    %c0_51 = arith.constant 0 : index
    %49 = vector.load %arg4[%c1_48, %c1_49, %c0_50, %c0_51] : memref<3x3x16x128xbf16, #tpu.memory_space<vmem>>, vector<1x1x16x128xbf16>
    %50 = vector.shape_cast %49 : vector<1x1x16x128xbf16> to vector<16x128xbf16>
    %cst_52 = arith.constant dense<0.000000e+00> : vector<256x128xf32>
    %51 = tpu.matmul %48, %50, %cst_52 {dimension_numbers = #tpu.dot_dimension_numbers<[1], [0], [0], [1], [0, 0, 1, 1], [], []>} : vector<256x16xbf16>, vector<16x128xbf16>, vector<256x128xf32> -> vector<256x128xf32>
    %c0_53 = arith.constant 0 : index
    %c0_54 = arith.constant 0 : index
    %52 = vector.load %arg7[%c0_53, %c0_54] : memref<256x128xf32, #tpu.memory_space<vmem>>, vector<256x128xf32>
    %53 = arith.addf %52, %51 : vector<256x128xf32>
    %c0_55 = arith.constant 0 : index
    %c0_56 = arith.constant 0 : index
    %54 = vector.load %arg7[%c0_55, %c0_56] : memref<256x128xf32, #tpu.memory_space<vmem>>, vector<256x128xf32>
    tpu.vector_store %arg7[%c0_55, %c0_56], %53 {strides = array<i32>} : memref<256x128xf32, #tpu.memory_space<vmem>>, vector<256x128xf32>,
    %c1_i32_57 = arith.constant 1 : i32
    %55 = arith.addi %1, %c1_i32_57 : i32
    %c0_58 = arith.constant 0 : index
    %56 = arith.index_cast %55 : i32 to index
    %c2_59 = arith.constant 2 : index
    %c0_60 = arith.constant 0 : index
    %57 = vector.load %arg3[%c0_58, %56, %c2_59, %c0_60] : memref<1x34x34x16xbf16, #tpu.memory_space<vmem>>, vector<1x8x32x16xbf16>
    %58 = vector.shape_cast %57 : vector<1x8x32x16xbf16> to vector<8x32x16xbf16>
    %59 = vector.shape_cast %58 : vector<8x32x16xbf16> to vector<256x16xbf16>
    %c1_61 = arith.constant 1 : index
    %c2_62 = arith.constant 2 : index
    %c0_63 = arith.constant 0 : index
    %c0_64 = arith.constant 0 : index
    %60 = vector.load %arg4[%c1_61, %c2_62, %c0_63, %c0_64] : memref<3x3x16x128xbf16, #tpu.memory_space<vmem>>, vector<1x1x16x128xbf16>
    %61 = vector.shape_cast %60 : vector<1x1x16x128xbf16> to vector<16x128xbf16>
    %cst_65 = arith.constant dense<0.000000e+00> : vector<256x128xf32>
    %62 = tpu.matmul %59, %61, %cst_65 {dimension_numbers = #tpu.dot_dimension_numbers<[1], [0], [0], [1], [0, 0, 1, 1], [], []>} : vector<256x16xbf16>, vector<16x128xbf16>, vector<256x128xf32> -> vector<256x128xf32>
    %c0_66 = arith.constant 0 : index
    %c0_67 = arith.constant 0 : index
    %63 = vector.load %arg7[%c0_66, %c0_67] : memref<256x128xf32, #tpu.memory_space<vmem>>, vector<256x128xf32>
    %64 = arith.addf %63, %62 : vector<256x128xf32>
    %c0_68 = arith.constant 0 : index
    %c0_69 = arith.constant 0 : index
    %65 = vector.load %arg7[%c0_68, %c0_69] : memref<256x128xf32, #tpu.memory_space<vmem>>, vector<256x128xf32>
    tpu.vector_store %arg7[%c0_68, %c0_69], %64 {strides = array<i32>} : memref<256x128xf32, #tpu.memory_space<vmem>>, vector<256x128xf32>,
    %c2_i32 = arith.constant 2 : i32
    %66 = arith.addi %1, %c2_i32 : i32
    %c0_70 = arith.constant 0 : index
    %67 = arith.index_cast %66 : i32 to index
    %c0_71 = arith.constant 0 : index
    %c0_72 = arith.constant 0 : index
    %68 = vector.load %arg3[%c0_70, %67, %c0_71, %c0_72] : memref<1x34x34x16xbf16, #tpu.memory_space<vmem>>, vector<1x8x32x16xbf16>
    %69 = vector.shape_cast %68 : vector<1x8x32x16xbf16> to vector<8x32x16xbf16>
    %70 = vector.shape_cast %69 : vector<8x32x16xbf16> to vector<256x16xbf16>
    %c2_73 = arith.constant 2 : index
    %c0_74 = arith.constant 0 : index
    %c0_75 = arith.constant 0 : index
    %c0_76 = arith.constant 0 : index
    %71 = vector.load %arg4[%c2_73, %c0_74, %c0_75, %c0_76] : memref<3x3x16x128xbf16, #tpu.memory_space<vmem>>, vector<1x1x16x128xbf16>
    %72 = vector.shape_cast %71 : vector<1x1x16x128xbf16> to vector<16x128xbf16>
    %cst_77 = arith.constant dense<0.000000e+00> : vector<256x128xf32>
    %73 = tpu.matmul %70, %72, %cst_77 {dimension_numbers = #tpu.dot_dimension_numbers<[1], [0], [0], [1], [0, 0, 1, 1], [], []>} : vector<256x16xbf16>, vector<16x128xbf16>, vector<256x128xf32> -> vector<256x128xf32>
    %c0_78 = arith.constant 0 : index
    %c0_79 = arith.constant 0 : index
    %74 = vector.load %arg7[%c0_78, %c0_79] : memref<256x128xf32, #tpu.memory_space<vmem>>, vector<256x128xf32>
    %75 = arith.addf %74, %73 : vector<256x128xf32>
    %c0_80 = arith.constant 0 : index
    %c0_81 = arith.constant 0 : index
    %76 = vector.load %arg7[%c0_80, %c0_81] : memref<256x128xf32, #tpu.memory_space<vmem>>, vector<256x128xf32>
    tpu.vector_store %arg7[%c0_80, %c0_81], %75 {strides = array<i32>} : memref<256x128xf32, #tpu.memory_space<vmem>>, vector<256x128xf32>,
    %c2_i32_82 = arith.constant 2 : i32
    %77 = arith.addi %1, %c2_i32_82 : i32
    %c0_83 = arith.constant 0 : index
    %78 = arith.index_cast %77 : i32 to index
    %c1_84 = arith.constant 1 : index
    %c0_85 = arith.constant 0 : index
    %79 = vector.load %arg3[%c0_83, %78, %c1_84, %c0_85] : memref<1x34x34x16xbf16, #tpu.memory_space<vmem>>, vector<1x8x32x16xbf16>
    %80 = vector.shape_cast %79 : vector<1x8x32x16xbf16> to vector<8x32x16xbf16>
    %81 = vector.shape_cast %80 : vector<8x32x16xbf16> to vector<256x16xbf16>
    %c2_86 = arith.constant 2 : index
    %c1_87 = arith.constant 1 : index
    %c0_88 = arith.constant 0 : index
    %c0_89 = arith.constant 0 : index
    %82 = vector.load %arg4[%c2_86, %c1_87, %c0_88, %c0_89] : memref<3x3x16x128xbf16, #tpu.memory_space<vmem>>, vector<1x1x16x128xbf16>
    %83 = vector.shape_cast %82 : vector<1x1x16x128xbf16> to vector<16x128xbf16>
    %cst_90 = arith.constant dense<0.000000e+00> : vector<256x128xf32>
    %84 = tpu.matmul %81, %83, %cst_90 {dimension_numbers = #tpu.dot_dimension_numbers<[1], [0], [0], [1], [0, 0, 1, 1], [], []>} : vector<256x16xbf16>, vector<16x128xbf16>, vector<256x128xf32> -> vector<256x128xf32>
    %c0_91 = arith.constant 0 : index
    %c0_92 = arith.constant 0 : index
    %85 = vector.load %arg7[%c0_91, %c0_92] : memref<256x128xf32, #tpu.memory_space<vmem>>, vector<256x128xf32>
    %86 = arith.addf %85, %84 : vector<256x128xf32>
    %c0_93 = arith.constant 0 : index
    %c0_94 = arith.constant 0 : index
    %87 = vector.load %arg7[%c0_93, %c0_94] : memref<256x128xf32, #tpu.memory_space<vmem>>, vector<256x128xf32>
    tpu.vector_store %arg7[%c0_93, %c0_94], %86 {strides = array<i32>} : memref<256x128xf32, #tpu.memory_space<vmem>>, vector<256x128xf32>,
    %c2_i32_95 = arith.constant 2 : i32
    %88 = arith.addi %1, %c2_i32_95 : i32
    %c0_96 = arith.constant 0 : index
    %89 = arith.index_cast %88 : i32 to index
    %c2_97 = arith.constant 2 : index
    %c0_98 = arith.constant 0 : index
    %90 = vector.load %arg3[%c0_96, %89, %c2_97, %c0_98] : memref<1x34x34x16xbf16, #tpu.memory_space<vmem>>, vector<1x8x32x16xbf16>
    %91 = vector.shape_cast %90 : vector<1x8x32x16xbf16> to vector<8x32x16xbf16>
    %92 = vector.shape_cast %91 : vector<8x32x16xbf16> to vector<256x16xbf16>
    %c2_99 = arith.constant 2 : index
    %c2_100 = arith.constant 2 : index
    %c0_101 = arith.constant 0 : index
    %c0_102 = arith.constant 0 : index
    %93 = vector.load %arg4[%c2_99, %c2_100, %c0_101, %c0_102] : memref<3x3x16x128xbf16, #tpu.memory_space<vmem>>, vector<1x1x16x128xbf16>
    %94 = vector.shape_cast %93 : vector<1x1x16x128xbf16> to vector<16x128xbf16>
    %cst_103 = arith.constant dense<0.000000e+00> : vector<256x128xf32>
    %95 = tpu.matmul %92, %94, %cst_103 {dimension_numbers = #tpu.dot_dimension_numbers<[1], [0], [0], [1], [0, 0, 1, 1], [], []>} : vector<256x16xbf16>, vector<16x128xbf16>, vector<256x128xf32> -> vector<256x128xf32>
    %c0_104 = arith.constant 0 : index
    %c0_105 = arith.constant 0 : index
    %96 = vector.load %arg7[%c0_104, %c0_105] : memref<256x128xf32, #tpu.memory_space<vmem>>, vector<256x128xf32>
    %97 = arith.addf %96, %95 : vector<256x128xf32>
    %c0_106 = arith.constant 0 : index
    %c0_107 = arith.constant 0 : index
    %98 = vector.load %arg7[%c0_106, %c0_107] : memref<256x128xf32, #tpu.memory_space<vmem>>, vector<256x128xf32>
    tpu.vector_store %arg7[%c0_106, %c0_107], %97 {strides = array<i32>} : memref<256x128xf32, #tpu.memory_space<vmem>>, vector<256x128xf32>,
    %c0_108 = arith.constant 0 : index
    %c0_109 = arith.constant 0 : index
    %99 = vector.load %arg7[%c0_108, %c0_109] : memref<256x128xf32, #tpu.memory_space<vmem>>, vector<256x128xf32>
    %c0_110 = arith.constant 0 : index
    %c0_111 = arith.constant 0 : index
    %100 = vector.load %arg5[%c0_110, %c0_111] : memref<1x128xf32, #tpu.memory_space<vmem>>, vector<1x128xf32>
    %101 = vector.broadcast %100 : vector<1x128xf32> to vector<256x128xf32>
    %102 = arith.addf %99, %101 : vector<256x128xf32>
    %cst_112 = arith.constant 1.000000e-01 : f32
    %103 = vector.broadcast %cst_112 : f32 to vector<256x128xf32>
    %104 = arith.mulf %103, %102 : vector<256x128xf32>
    %105 = arith.maximumf %102, %104 : vector<256x128xf32>
    %106 = vector.shape_cast %105 : vector<256x128xf32> to vector<8x32x128xf32>
    %107 = arith.truncf %106 : vector<8x32x128xf32> to vector<8x32x128xbf16>
    %c0_113 = arith.constant 0 : index
    %c0_114 = arith.constant 0 : index
    %c0_115 = arith.constant 0 : index
    %c0_116 = arith.constant 0 : index
    %108 = vector.load %arg6[%c0_113, %c0_114, %c0_115, %c0_116] : memref<1x8x32x128xbf16, #tpu.memory_space<vmem>>, vector<1x8x32x128xbf16>
    %109 = vector.shape_cast %108 : vector<1x8x32x128xbf16> to vector<8x32x128xbf16>
    %110 = vector.shape_cast %107 : vector<8x32x128xbf16> to vector<1x8x32x128xbf16>
    tpu.vector_store %arg6[%c0_113, %c0_114, %c0_115, %c0_116], %110 {strides = array<i32>} : memref<1x8x32x128xbf16, #tpu.memory_space<vmem>>, vector<1x8x32x128xbf16>,
    return
  }
  func.func @transform_0(%arg0: i32, %arg1: i32, %arg2: i32) -> (i32, i32, i32, i32) {
    %c0_i32 = arith.constant 0 : i32
    %c0_i32_0 = arith.constant 0 : i32
    %c0_i32_1 = arith.constant 0 : i32
    %c0_i32_2 = arith.constant 0 : i32
    return %arg0, %c0_i32, %c0_i32_0, %c0_i32_1 : i32, i32, i32, i32
  }
  func.func @transform_1(%arg0: i32, %arg1: i32, %arg2: i32) -> (i32, i32, i32, i32) {
    %c0_i32 = arith.constant 0 : i32
    %c0_i32_0 = arith.constant 0 : i32
    %c0_i32_1 = arith.constant 0 : i32
    %c0_i32_2 = arith.constant 0 : i32
    return %c0_i32, %c0_i32_0, %c0_i32_1, %arg2 : i32, i32, i32, i32
  }
  func.func @transform_2(%arg0: i32, %arg1: i32, %arg2: i32) -> (i32, i32) {
    %c0_i32 = arith.constant 0 : i32
    %c0_i32_0 = arith.constant 0 : i32
    return %c0_i32, %arg2 : i32, i32
  }
  func.func @transform_3(%arg0: i32, %arg1: i32, %arg2: i32) -> (i32, i32, i32, i32) {
    %c0_i32 = arith.constant 0 : i32
    %c0_i32_0 = arith.constant 0 : i32
    return %arg0, %arg1, %c0_i32, %arg2 : i32, i32, i32, i32
  }
}

</mosaic_0001>

<bundles_post_ra>
// kernel: tpu_custom_call.1
= control target key start
LH: loop header
LB: loop body
LE: loop exit
PB: predicated region body
PF: predicated region fallthrough
CT: control target
= control target key end

     0   :  { %8 = vsyncpa [#allocation5], 0  ;;  %s9178_s0 = inlined_call_operand.vmem [shape: bf16[2,34,34,16], index: 0, kind: input, shape index: {}]   ;;  %s9179_s1 = inlined_call_operand.vmem [shape: bf16[3,3,16,256], index: 1, kind: input, shape index: {}]   ;;  %s9180_s2 = inlined_call_operand.vmem [shape: f32[1,256], index: 2, kind: input, shape index: {}]   ;;  %s9181_s3 = inlined_call_operand.hbm [shape: bf16[2,32,32,256], index: 3, kind: output, shape index: {}]  }
   0x1   :  { %10 = vsyncpa [#allocation5 + $0x1], 0  ;;  %s7683_s12 = smov 0   ;;  %s7685_s13 = smov 0  }
   0x2   :  { %s7687_s14 = smov 0   ;;  %s7689_s15 = smov 0  }
   0x3   :  { %s7691_s16 = smov 0   ;;  %s7693_s17 = smov 0  }
   0x4   :  { %s7695_s18 = smov 0   ;;  %s7697_s19 = smov 0  }
   0x5   :  { %s7699_s20 = smov 0   ;;  %s7701_s21 = smov 0  }
   0x6   :  { %s7703_s22 = smov 0   ;;  %s7705_s23 = smov 0  }
   0x7 LB: > { %s5902_s24 = sadd.s32 4294967295, %s7657_s23   ;;  %s5903_s25 = sadd.s32 4294967294, %s7657_s23   ;;  %s7657_s23 = sphi %s7705_s23, %s16_s23   ;;  %s7653_s22 = sphi %s7703_s22, %s9202_s22   ;;  %s7649_s21 = sphi %s7701_s21, %s9201_s21   ;;  %s7645_s20 = sphi %s7699_s20, %s9200_s20   ;;  %s7641_s19 = sphi %s7697_s19, %s9199_s19   ;;  %s7637_s18 = sphi %s7695_s18, %s9198_s18   ;;  %s7633_s17 = sphi %s7693_s17, %s9197_s17   ;;  %s7629_s16 = sphi %s7691_s16, %s9196_s16   ;;  %s7625_s15 = sphi %s7689_s15, %s9195_s15   ;;  %s7621_s14 = sphi %s7687_s14, %s9194_s14   ;;  %s7617_s13 = sphi %s7685_s13, %s9193_s13   ;;  %s7613_s12 = sphi %s7683_s12, %s9192_s12  }
   0x8   : > { %s28_s26 = sadd.s32 1, %s7645_s20  ;;  %s31_s27 = sadd.s32 1, %s7649_s21 }
   0x9   : > { %p29_p0 = scmp.ge.s32.totalorder %s28_s26, 2  ;;  %s35_s28 = sadd.s32 1, %s7653_s22 }
   0xa   : > { %p75_p1 = scmp.ne.s32.totalorder %s7629_s16, %s7625_s15  ;;  %p76_p2 = scmp.eq.s32.totalorder %s7657_s23, 0 }
   0xb   : > { %s9204_s26 = smov (%p29_p0, %s28_s26), 0  ;;  %s9206_s27 = smov (!%p29_p0, %s31_s27), %s7649_s21 }
   0xc   : > { %s65_s29 = ssub.s32 %s7645_s20, %s9204_s26  ;;  %p33_p3 = scmp.ge.s32.totalorder %s9206_s27, 4 }
   0xd   : > { %p66_p4 = scmp.eq.s32.totalorder %s65_s29, 0  ;;  %s68_s30 = sadd.s32 1, %s7629_s16 }
   0xe   : > { %p7757_p5 = por %p76_p2, %p75_p1  ;;  %s9208_s27 = smov (%p33_p3, %s9206_s27), 0 }
   0xf   : > { %9184 = sst [smem:[#allocation7_spill]] %s9208_s27  ;;  %s9210_s28 = smov (!%p33_p3, %s35_s28), %s7653_s22 }
  0x10   : > { %s7765_s5 = scalar_select %p66_p4, %s7629_s16, %s68_s30  }
  0x11   : > { %p37_p6 = scmp.ge.s32.totalorder %s9210_s28, 2  ;;  %s118_s6 = ssub.s32 %s7649_s21, %s9208_s27 }
  0x12   : > { %p134_p7 = scmp.ne.s32.totalorder %s7621_s14, %s7617_s13  ;;  %p135_p8 = scmp.eq.s32.totalorder %s5902_s24, 15 }
  0x13   : > { %s9212_s28 = smov (%p37_p6, %s9210_s28), 0  ;;  %p140_p10 = scmp.ne.s32.totalorder %s7617_s13, %s7613_s12 }
  0x14   : > { %p7773_p9 = por %p135_p8, %p134_p7  ;;  %s117_s8 = ssub.s32 %s7653_s22, %s9212_s28 }
  0x15   : > { %p141_p11 = scmp.eq.s32.totalorder %s5903_s25, 15  ;;  %s119_s9 = sor.u32 %s118_s6, %s117_s8 }
  0x16   : > { %s124_s10 = sadd.s32 1, %s7621_s14  ;;  %s121_s11 = sor.u32 %s119_s9, %s65_s29 }
  0x17   : > { %p7782_p12 = por %p141_p11, %p140_p10  ;;  %p122_p13 = scmp.eq.s32.totalorder %s121_s11, 0 }
  0x18   : > { %p5905_p0 = scmp.ge.s32.totalorder %s7657_s23, 16 }
  0x19   : > { %s7787_s27 = scalar_select %p122_p13, %s7621_s14, %s124_s10  }
  0x1a   : > { %157 = sbr.rel (%p5905_p0) target bundleno = 49 (0x31), region = 16 }
  0x21   : > { %168 = sbr.rel (!%p7757_p5) target bundleno = 49 (0x31), region = 24  ;;  %s170_s24 = sand.u32 (%p7757_p5), 1, %s7629_s16  }
  0x22   : > { %s5906_s25 = sshll.u32 (%p7757_p5), %s7645_s20, 2  ;;  %s7364_s6 = smul.u32 (%p7757_p5), 72, %s170_s24 }
  0x23   : > { %s7797_s9 = scalar_lea.vmem (%p7757_p5), %s9179_s1, %s5906_s25 }
  0x24   : > { %v190_v0 = vld [vmem:[%s7797_s9] sm:$0xf] (%p7757_p5)  ;;  %v192_v1 = vld [vmem:[%s7797_s9 + $0x8] sm:$0xf] (%p7757_p5)  ;;  %v194_v2 = vld [vmem:[%s7797_s9 + $0x10] sm:$0xf] (%p7757_p5) }
  0x25   : > { %v196_v3 = vld [vmem:[%s7797_s9 + $0x18] sm:$0xf] (%p7757_p5)  ;;  %v198_v4 = vld [vmem:[%s7797_s9 + $0x20] sm:$0xf] (%p7757_p5)  ;;  %s7804_s4 = scalar_lea.vmem (%p7757_p5), [#allocation3], %s7364_s6 }
  0x26   : > { %191 = vst [vmem:[%s7804_s4] sm:$0xf] (%p7757_p5), %v190_v0  ;;  %193 = vst [vmem:[%s7804_s4 + $0x4] sm:$0xf] (%p7757_p5), %v192_v1  ;;  %v200_v5 = vld [vmem:[%s7797_s9 + $0x28] sm:$0xf] (%p7757_p5) }
  0x27   : > { %195 = vst [vmem:[%s7804_s4 + $0x8] sm:$0xf] (%p7757_p5), %v194_v2  ;;  %197 = vst [vmem:[%s7804_s4 + $0xc] sm:$0xf] (%p7757_p5), %v196_v3  ;;  %v202_v6 = vld [vmem:[%s7797_s9 + $0x30] sm:$0xf] (%p7757_p5) }
  0x28   : > { %199 = vst [vmem:[%s7804_s4 + $0x10] sm:$0xf] %v198_v4  ;;  %v204_v7 = vld [vmem:[%s7797_s9 + $0x38] sm:$0xf]  ;;  %201 = vst [vmem:[%s7804_s4 + $0x14] sm:$0xf] %v200_v5 }
  0x29   : > { %203 = vst [vmem:[%s7804_s4 + $0x18] sm:$0xf] %v202_v6  ;;  %205 = vst [vmem:[%s7804_s4 + $0x1c] sm:$0xf] %v204_v7  ;;  %v206_v8 = vld [vmem:[%s7797_s9 + $0x40] sm:$0xf] }
  0x2a   : > { %v208_v9 = vld [vmem:[%s7797_s9 + $0x48] sm:$0xf]  ;;  %v210_v10 = vld [vmem:[%s7797_s9 + $0x50] sm:$0xf]  ;;  %207 = vst [vmem:[%s7804_s4 + $0x20] sm:$0xf] %v206_v8 }
  0x2b   : > { %209 = vst [vmem:[%s7804_s4 + $0x24] sm:$0xf] %v208_v9  ;;  %211 = vst [vmem:[%s7804_s4 + $0x28] sm:$0xf] %v210_v10  ;;  %v212_v11 = vld [vmem:[%s7797_s9 + $0x58] sm:$0xf] }
  0x2c   : > { %v214_v12 = vld [vmem:[%s7797_s9 + $0x60] sm:$0xf]  ;;  %v216_v13 = vld [vmem:[%s7797_s9 + $0x68] sm:$0xf]  ;;  %213 = vst [vmem:[%s7804_s4 + $0x2c] sm:$0xf] %v212_v11 }
  0x2d   : > { %215 = vst [vmem:[%s7804_s4 + $0x30] sm:$0xf] %v214_v12  ;;  %217 = vst [vmem:[%s7804_s4 + $0x34] sm:$0xf] %v216_v13  ;;  %v218_v14 = vld [vmem:[%s7797_s9 + $0x70] sm:$0xf] }
  0x2e   : > { %v220_v15 = vld [vmem:[%s7797_s9 + $0x78] sm:$0xf]  ;;  %v222_v16 = vld [vmem:[%s7797_s9 + $0x80] sm:$0xf]  ;;  %219 = vst [vmem:[%s7804_s4 + $0x38] sm:$0xf] %v218_v14 }
  0x2f   : > { %221 = vst [vmem:[%s7804_s4 + $0x3c] sm:$0xf] %v220_v15  ;;  %223 = vst [vmem:[%s7804_s4 + $0x40] sm:$0xf] %v222_v16  ;;  %v224_v17 = vld [vmem:[%s7797_s9 + $0x88] sm:$0xf] }
  0x30   : > { %225 = vst [vmem:[%s7804_s4 + $0x44] sm:$0xf] %v224_v17 }
  0x31 PF: > { %p5907_p1 = scmp.ge.s32.totalorder %s7657_s23, 1  ;;  %p289_p2 = scmp.lt.s32.totalorder %s7657_s23, 17 }
  0x33   : > { %p290_p3 = pnand %p5907_p1, %p289_p2 }
  0x34   : > { %s296_s10 = sand.u32 (!%p290_p3), 1, %s7625_s15   ;;  %p327_p4 = scmp.lt.s32.totalorder (!%p290_p3), %s7641_s19, 1  ;;  %vm461_vm0 = vcmask (!%p290_p3), 130048   ;;  %vm743_vm1 = vsmask.f32 (!%p290_p3), 3328  ;;  %vm1540_vm4 = vcmask (!%p290_p3), 1042432  }
  0x35   : > { %293 = sbr.rel (%p290_p3) target bundleno = 605 (0x25d), region = 69  ;;  %vm744_vm2 = vsmask.f32 (!%p290_p3), 7440  ;;  %vm1541_vm5 = vcmask (!%p290_p3), 1046532   ;;  %p332_p5 = scmp.lt.s32.totalorder (!%p290_p3), %s7633_s17, 1 }
  0x36   : > { %s7365_s11 = smul.u32 (!%p290_p3), 72, %s296_s10  ;;  %vm7872_vm3 = vmor (!%p290_p3), %vm743_vm1, %vm744_vm2  ;;  %s6551_s9 = sshll.u32 (!%p290_p3), %s7637_s18, 6 }
  0x37   : > { %s6518_s25 = smul.u32 (!%p290_p3), 160, %s7637_s18  ;;  %vm7943_vm6 = vmor (!%p290_p3), %vm1540_vm4, %vm1541_vm5 }
  0x38   : > { %s7843_s6 = scalar_lea.vmem (!%p290_p3), [#allocation3], %s7365_s11 }
  0x39   : > { %v7473_v18 = vld [vmem:[%s7843_s6] sm:$0xff] (!%p290_p3)   ;;  %v7479_v20 = vld [vmem:[%s7843_s6 + $0x8] sm:$0xff] (!%p290_p3)  }
  0x3a   : > { %v7476_v19 = vld [vmem:[%s7843_s6 + $0x20] sm:$0xff] (!%p290_p3)   ;;  %6800 = vmatprep.subr.bf16.mxu1 (!%p290_p3), %v7473_v18  ;;  %v7854_v21 = vld [vmem:[%s7843_s6 + $0x28] sm:$0xff] (!%p290_p3)  }
  0x3b   : > { %6801 = vmatpush3.bf16.msra.mxu1 (!%p290_p3), %v7473_v18  ;;  %6936 = vmatprep.subr.bf16.mxu0 (!%p290_p3), %v7476_v19 }
  0x3c   : > { %s328_s24 = scalar_select %p327_p4, %s7641_s19, 1  ;;  %6937 = vmatpush3.bf16.msra.mxu0 %v7476_v19  ;;  %6834 = vmatprep.subr.bf16.mxu1 %v7479_v20 }
  0x3d   : > { %6970 = vmatprep.subr.bf16.mxu0 %v7854_v21  ;;  %s333_s10 = scalar_select %p332_p5, %s7633_s17, 1 }
  0x3e   : > { %s7366_s8 = smul.u32 680, %s328_s24 }
  0x40   : > { %s331_s4 = scalar_lea.vmem %s9178_s0, %s7366_s8 }
  0x41   : > { %s7851_s15 = scalar_lea.vmem %s331_s4, %s6518_s25  ;;  %s334_s25 = scalar_lea.vmem %s9180_s2, %s333_s10 }
  0x42   : > { %v7474_v22 = vld [vmem:[%s7851_s15] sm:$0xff]   ;;  %v7475_v23 = vld [vmem:[%s7851_s15 + $0x8] sm:$0xff]   ;;  %v7477_v24 = vld [vmem:[%s7851_s15 + $0x14] sm:$0xff]   ;;  %s5777_s4 = sadd.s32 %s7633_s17, %s6551_s9  ;;  %s7659_s9 = smov [#allocation4]  }
  0x43   : > { %6802 = vmatprep.mubr.msk.bf16.mxu1 %vm461_vm0, %v7474_v22  ;;  %v6093_v25 = vld [vmem:[%s7851_s15 + $0x14] sm:$0xf]  ;;  %v6094_v26 = vld [vmem:[%s7851_s15 + $0x18] sm:$0xf]  ;;  %v6095_v27 = vld [vmem:[%s7851_s15 + $0x1c] sm:$0xf] }
  0x44   : > { %6803 = vmatmul.mubr.msk.bf16.vlgmr.msra.gmra.mrb[0].mxu1 %vm461_vm0, %v7475_v23  ;;  %v7478_v28 = vld [vmem:[%s7851_s15 + $0x1c] sm:$0xff]   ;;  %v2480_v29 = vshrl.u32 %v6093_v25, 16  ;;  %v2483_v30 = vshll.u32 %v6093_v25, 16  ;;  %v2489_v31 = vshll.u32 %v6094_v26, 16  ;;  %v2493_v32 = vshrl.u32 %v6094_v26, 16  ;;  %v7481_v50 = vld [vmem:[%s7851_s15 + $0x28] sm:$0xff]  }
  0x45   : > { %6806 = vmatprep.mubr.msk.bf16.mxu1 %vm461_vm0, %v7477_v24  ;;  %6835 = vmatpush3.bf16.msra.mxu1 %v7479_v20  ;;  %v6096_v33 = vld [vmem:[%s7851_s15 + $0x20] sm:$0xf]  ;;  %v2499_v34 = vshll.u32 %v6095_v27, 16  ;;  %v2503_v35 = vshrl.u32 %v6095_v27, 16  ;;  %v6097_v36 = vld [vmem:[%s7851_s15 + $0x24] sm:$0x1] }
  0x46   : > { %v2509_v37 = vshll.u32 %v6096_v33, 16  ;;  %v2513_v38 = vshrl.u32 %v6096_v33, 16  ;;  %v2482_v39 = vrot.slane %v2480_v29, 4  ;;  %v2485_v40 = vrot.slane %v2483_v30, 5  ;;  %v6098_v54 = vld [vmem:[%s7851_s15 + $0x28] sm:$0xf] }
  0x47   : > { %v2491_v41 = vrot.slane %v2489_v31, 5  ;;  %v2495_v42 = vrot.slane %v2493_v32, 4  ;;  %v2501_v43 = vrot.slane %v2499_v34, 5  ;;  %v2505_v44 = vrot.slane %v2503_v35, 4  ;;  %v6099_v55 = vld [vmem:[%s7851_s15 + $0x2c] sm:$0xf] }
  0x48   : > { %v2511_v45 = vrot.slane %v2509_v37, 5  ;;  %v2515_v46 = vrot.slane %v2513_v38, 4  ;;  %v2486_v47 = vor.u32 %v2485_v40, %v2482_v39  ;;  %v2519_v49 = vshll.u32 %v6097_v36, 16  ;;  %v6100_v59 = vld [vmem:[%s7851_s15 + $0x30] sm:$0xf]  ;;  %v7483_v20 = vld [vmem:[%s7851_s15 + $0x3c] sm:$0xff]  }
  0x49   : > { %v2496_v48 = vor.u32 %v2495_v42, %v2491_v41  ;;  %v2506_v52 = vor.u32 %v2505_v44, %v2501_v43  ;;  %v2524_v60 = vshrl.u32 %v6098_v54, 16  ;;  %v2527_v63 = vshll.u32 %v6098_v54, 16  ;;  %v6101_v1 = vld [vmem:[%s7851_s15 + $0x34] sm:$0xf]  ;;  %v6102_v6 = vld [vmem:[%s7851_s15 + $0x38] sm:$0x1] }
  0x4a   : > { %v2516_v53 = vor.u32 %v2515_v46, %v2511_v45  ;;  %v2487_v56 = vrot.slane %v2486_v47, 4  ;;  %v2521_v58 = vrot.slane %v2519_v49, 5  ;;  %v2533_v0 = vshll.u32 %v6099_v55, 16  ;;  %v7482_v12 = vld [vmem:[%s7851_s15 + $0x30] sm:$0xff]   ;;  %v6103_v22 = vld [vmem:[%s7851_s15 + $0x3c] sm:$0xf] }
  0x4b   : > { %v2497_v57 = vrot.slane %v2496_v48, 4  ;;  %v2507_v61 = vrot.slane %v2506_v52, 4  ;;  %v2526_v4 = vrot.slane %v2524_v60, 4  ;;  %v2537_v5 = vshrl.u32 %v6099_v55, 16  ;;  %v6104_v26 = vld [vmem:[%s7851_s15 + $0x40] sm:$0xf] }
  0x4c   : > { %6807 = vmatmul.mubr.msk.bf16.gmra.mrb[4].mxu1 %vm461_vm0, %v7478_v28  ;;  %v2517_v62 = vrot.slane %v2516_v53, 4  ;;  %v2492_v2 = vsel %vm7872_vm3, %v2487_v56, %v2491_v41  ;;  %v2529_v10 = vrot.slane %v2527_v63, 5  ;;  %v2535_v13 = vrot.slane %v2533_v0, 5  ;;  %v6105_v31 = vld [vmem:[%s7851_s15 + $0x44] sm:$0xf]  ;;  %v7485_v60 = vld [vmem:[%s7851_s15 + $0x50] sm:$0xff]  }
  0x4d   : > { %6810 = vmatprep.mubr.msk.bf16.mxu1 %vm461_vm0, %v7481_v50  ;;  %v2502_v3 = vsel %vm7872_vm3, %v2497_v57, %v2501_v43  ;;  %v2512_v8 = vsel %vm7872_vm3, %v2507_v61, %v2511_v45  ;;  %v2539_v14 = vrot.slane %v2537_v5, 4  ;;  %v2543_v15 = vshll.u32 %v6100_v59, 16  ;;  %v6106_v36 = vld [vmem:[%s7851_s15 + $0x48] sm:$0xf]  ;;  %v6107_v54 = vld [vmem:[%s7851_s15 + $0x4c] sm:$0x1] }
  0x4e   : > { %v6135_v7 = vcombine.low %v2492_v2, %v2502_v3  ;;  %v2522_v9 = vsel %vm7872_vm3, %v2517_v62, %v2521_v58  ;;  %v2530_v16 = vor.u32 %v2529_v10, %v2526_v4  ;;  %v2547_v17 = vshrl.u32 %v6100_v59, 16  ;;  %v7484_v47 = vld [vmem:[%s7851_s15 + $0x44] sm:$0xff]   ;;  %v6108_v61 = vld [vmem:[%s7851_s15 + $0x50] sm:$0xf]  ;;  %v6109_v2 = vld [vmem:[%s7851_s15 + $0x54] sm:$0xf] }
  0x4f   : > { %v6136_v11 = vcombine.low %v2512_v8, %v2522_v9  ;;  %v2553_v18 = vshll.u32 %v6101_v1, 16  ;;  %v2557_v19 = vshrl.u32 %v6101_v1, 16  ;;  %v2540_v23 = vor.u32 %v2539_v14, %v2535_v13  ;;  %v7909_v55 = vld [vmem:[%s7843_s6 + $0x30] sm:$0xff]  }
  0x50   : > { %6938 = vmatprep.mubr.msk.bf16.mxu0 %vm461_vm0, %v6135_v7  ;;  %v2545_v24 = vrot.slane %v2543_v15, 5  ;;  %v2563_v25 = vshll.u32 %v6102_v6, 16  ;;  %v2531_v27 = vrot.slane %v2530_v16, 4  ;;  %v2549_v28 = vrot.slane %v2547_v17, 4  ;;  %v6110_v7 = vld [vmem:[%s7851_s15 + $0x58] sm:$0xf] }
  0x51   : > { %6939 = vmatmul.mubr.msk.bf16.vlgmr.msra.gmra.mrb[0].mxu0 %vm461_vm0, %v6136_v11  ;;  %v2555_v29 = vrot.slane %v2553_v18, 5  ;;  %v2559_v30 = vrot.slane %v2557_v19, 4  ;;  %v2541_v32 = vrot.slane %v2540_v23, 4  ;;  %v2568_v34 = vshrl.u32 %v6103_v22, 16 }
  0x52   : > { %6971 = vmatpush3.bf16.msra.mxu0 %v7854_v21  ;;  %v2565_v33 = vrot.slane %v2563_v25, 5  ;;  %v2571_v35 = vshll.u32 %v6103_v22, 16  ;;  %v2536_v37 = vsel %vm7872_vm3, %v2531_v27, %v2535_v13  ;;  %v2550_v38 = vor.u32 %v2549_v28, %v2545_v24  ;;  %v6112_v22 = vld [vmem:[%s7851_s15 + $0x60] sm:$0x1]  ;;  %v6168_v28 = vld [vmem:[%s7851_s15 + $0x14] sm:$0xe] }
  0x53   : > { %v2560_v39 = vor.u32 %v2559_v30, %v2555_v29  ;;  %v2577_v21 = vshll.u32 %v6104_v26, 16  ;;  %v2546_v40 = vsel %vm7872_vm3, %v2541_v32, %v2545_v24  ;;  %v2570_v41 = vrot.slane %v2568_v34, 4  ;;  %7004 = vmatprep.subr.bf16.mxu0 %v7909_v55  ;;  %v6169_v34 = vld [vmem:[%s7851_s15 + $0x18] sm:$0xf] }
  0x54   : > { %6811 = vmatmul.mubr.msk.bf16.gmra.mrb[8].mxu1 %vm461_vm0, %v7482_v12  ;;  %v2573_v42 = vrot.slane %v2571_v35, 5  ;;  %v2581_v43 = vshrl.u32 %v6104_v26, 16  ;;  %v6137_v44 = vcombine.low %v2536_v37, %v2546_v40  ;;  %v2551_v45 = vrot.slane %v2550_v38, 4  ;;  %v6111_v12 = vld [vmem:[%s7851_s15 + $0x5c] sm:$0xf] }
  0x55   : > { %6814 = vmatprep.mubr.msk.bf16.mxu1 %vm461_vm0, %v7483_v20  ;;  %v2561_v46 = vrot.slane %v2560_v39, 4  ;;  %v2579_v48 = vrot.slane %v2577_v21, 5  ;;  %v2587_v52 = vshll.u32 %v6105_v31, 16  ;;  %v2591_v53 = vshrl.u32 %v6105_v31, 16  ;;  %v7486_v26 = vld [vmem:[%s7851_s15 + $0x58] sm:$0xff]  }
  0x56   : > { %v2574_v49 = vor.u32 %v2573_v42, %v2570_v41  ;;  %v2583_v50 = vrot.slane %v2581_v43, 4  ;;  %6942 = vmatprep.mubr.msk.bf16.mxu0 %vm461_vm0, %v6137_v44  ;;  %v2556_v56 = vsel %vm7872_vm3, %v2551_v45, %v2555_v29  ;;  %v2597_v58 = vshll.u32 %v6106_v36, 16  ;;  %v6170_v42 = vld [vmem:[%s7851_s15 + $0x1c] sm:$0xf]  ;;  %v6171_v43 = vld [vmem:[%s7851_s15 + $0x20] sm:$0xf] }
  0x57   : > { %v2566_v57 = vsel %vm7872_vm3, %v2561_v46, %v2565_v33  ;;  %v2601_v59 = vshrl.u32 %v6106_v36, 16  ;;  %v2589_v1 = vrot.slane %v2587_v52, 5  ;;  %v2593_v3 = vrot.slane %v2591_v53, 4  ;;  %v7487_v33 = vld [vmem:[%s7851_s15 + $0x64] sm:$0xff]  }
  0x58   : > { %v6138_v62 = vcombine.low %v2556_v56, %v2566_v57  ;;  %v2575_v63 = vrot.slane %v2574_v49, 4  ;;  %v2584_v0 = vor.u32 %v2583_v50, %v2579_v48  ;;  %v2599_v4 = vrot.slane %v2597_v58, 5  ;;  %v6172_v49 = vld [vmem:[%s7851_s15 + $0x24] sm:$0x1] }
  0x59   : > { %v2603_v5 = vrot.slane %v2601_v59, 4  ;;  %v2607_v6 = vshll.u32 %v6107_v54, 16  ;;  %v2612_v10 = vshrl.u32 %v6108_v61, 16  ;;  %v2615_v11 = vshll.u32 %v6108_v61, 16  ;;  %v7953_v56 = vld [vmem:[%s7843_s6 + $0x10] sm:$0xff]  }
  0x5a   : > { %6943 = vmatmul.mubr.msk.bf16.gmra.mrb[4].mxu0 %vm461_vm0, %v6138_v62  ;;  %v2580_v8 = vsel %vm7872_vm3, %v2575_v63, %v2579_v48  ;;  %v2585_v9 = vrot.slane %v2584_v0, 4  ;;  %v2594_v13 = vor.u32 %v2593_v3, %v2589_v1  ;;  %v2621_v16 = vshll.u32 %v6109_v2, 16  ;;  %6868 = vmatprep.subr.bf16.mxu1 %v7953_v56 }
  0x5b   : > { %v2604_v14 = vor.u32 %v2603_v5, %v2599_v4  ;;  %v2609_v15 = vrot.slane %v2607_v6, 5  ;;  %v2614_v18 = vrot.slane %v2612_v10, 4  ;;  %v2617_v19 = vrot.slane %v2615_v11, 5  ;;  %v7488_v6 = vld [vmem:[%s7851_s15 + $0x6c] sm:$0xff]  }
  0x5c   : > { %6815 = vmatmul.mubr.msk.bf16.gmra.mrb[12].mxu1 %vm461_vm0, %v7484_v47  ;;  %v2590_v17 = vsel %vm7872_vm3, %v2585_v9, %v2589_v1  ;;  %v2625_v20 = vshrl.u32 %v6109_v2, 16  ;;  %v2595_v24 = vrot.slane %v2594_v13, 4  ;;  %v2623_v27 = vrot.slane %v2621_v16, 5  ;;  %v6173_v1 = vld [vmem:[%s7851_s15 + $0x28] sm:$0xe] }
  0x5d   : > { %6818 = vmatprep.mubr.msk.bf16.mxu1 %vm461_vm0, %v7485_v60  ;;  %v6139_v23 = vcombine.low %v2580_v8, %v2590_v17  ;;  %v2605_v25 = vrot.slane %v2604_v14, 4  ;;  %v2618_v29 = vor.u32 %v2617_v19, %v2614_v18  ;;  %v2631_v31 = vshll.u32 %v6110_v7, 16  ;;  %v6174_v2 = vld [vmem:[%s7851_s15 + $0x2c] sm:$0xf]  ;;  %v6175_v8 = vld [vmem:[%s7851_s15 + $0x30] sm:$0xf] }
  0x5e   : > { %v2627_v30 = vrot.slane %v2625_v20, 4  ;;  %v2635_v32 = vshrl.u32 %v6110_v7, 16  ;;  %v2600_v35 = vsel %vm7872_vm3, %v2595_v24, %v2599_v4  ;;  %v2641_v37 = vshll.u32 %v6111_v12, 16  ;;  %v6176_v14 = vld [vmem:[%s7851_s15 + $0x34] sm:$0xf] }
  0x5f   : > { %6946 = vmatprep.mubr.msk.bf16.mxu0 %vm461_vm0, %v6139_v23  ;;  %v2610_v36 = vsel %vm7872_vm3, %v2605_v25, %v2609_v15  ;;  %v2645_v38 = vshrl.u32 %v6111_v12, 16  ;;  %v2619_v21 = vrot.slane %v2618_v29, 4  ;;  %v2633_v41 = vrot.slane %v2631_v31, 5  ;;  %v7490_v12 = vld [vmem:[%s7851_s15 + $0x78] sm:$0xff]  }
  0x60   : > { %v6140_v39 = vcombine.low %v2600_v35, %v2610_v36  ;;  %v2628_v40 = vor.u32 %v2627_v30, %v2623_v27  ;;  %v2637_v44 = vrot.slane %v2635_v32, 4  ;;  %v2643_v45 = vrot.slane %v2641_v37, 5  ;;  %v6177_v18 = vld [vmem:[%s7851_s15 + $0x38] sm:$0x1]  ;;  %v6180_v32 = vld [vmem:[%s7851_s15 + $0x44] sm:$0xf] }
  0x61   : > { %v2647_v46 = vrot.slane %v2645_v38, 4  ;;  %v2651_v47 = vshll.u32 %v6112_v22, 16  ;;  %v2624_v50 = vsel %vm7872_vm3, %v2619_v21, %v2623_v27  ;;  %v6208_v53 = vrot.slane %v6168_v28, 9  ;;  %v6178_v27 = vld [vmem:[%s7851_s15 + $0x3c] sm:$0xe] }
  0x62   : > { %6947 = vmatmul.mubr.msk.bf16.gmra.mrb[8].mxu0 %vm461_vm0, %v6140_v39  ;;  %v2629_v52 = vrot.slane %v2628_v40, 4  ;;  %v3275_v54 = vrot.slane %v6169_v34, 5  ;;  %v2638_v57 = vor.u32 %v2637_v44, %v2633_v41  ;;  %v3278_v60 = vrot.slane %v6170_v42, 5  ;;  %v6179_v28 = vld [vmem:[%s7851_s15 + $0x40] sm:$0xf] }
  0x63   : > { %v2648_v58 = vor.u32 %v2647_v46, %v2643_v45  ;;  %v2653_v59 = vrot.slane %v2651_v47, 5  ;;  %v3281_v0 = vrot.slane %v6171_v43, 5  ;;  %v3284_v11 = vrot.slane %v6172_v49, 5  ;;  %v6181_v37 = vld [vmem:[%s7851_s15 + $0x48] sm:$0xf]  ;;  %v7491_v49 = vld [vmem:[%s7851_s15 + $0x80] sm:$0xff]  }
  0x64   : > { %6819 = vmatmul.mubr.msk.bf16.gmra.mrb[16].mxu1 %vm461_vm0, %v7486_v26  ;;  %v2634_v61 = vsel %vm7872_vm3, %v2629_v52, %v2633_v41  ;;  %v3276_v62 = vsel %vm7943_vm6, %v6208_v53, %v3275_v54  ;;  %v3277_v63 = vrot.slane %v3275_v54, 4  ;;  %v2639_v4 = vrot.slane %v2638_v57, 4  ;;  %v6182_v40 = vld [vmem:[%s7851_s15 + $0x4c] sm:$0x1]  ;;  %v703_v42 = vld [vmem:[%s7851_s15] sm:$0xf] }
  0x65   : > { %6822 = vmatprep.mubr.msk.bf16.mxu1 %vm461_vm0, %v7487_v33  ;;  %v6141_v3 = vcombine.low %v2624_v50, %v2634_v61  ;;  %v2649_v5 = vrot.slane %v2648_v58, 4  ;;  %v3280_v7 = vrot.slane %v3278_v60, 4  ;;  %v3283_v10 = vrot.slane %v3281_v0, 4  ;;  %v704_v47 = vld [vmem:[%s7851_s15 + $0x4] sm:$0xf]  ;;  %v7492_v58 = vld [vmem:[%s7851_s15 + $0x8c] sm:$0xff]  }
  0x66   : > { %v3279_v9 = vsel %vm7943_vm6, %v3277_v63, %v3278_v60  ;;  %v6209_v13 = vrot.slane %v6173_v1, 9  ;;  %v2644_v15 = vsel %vm7872_vm3, %v2639_v4, %v2643_v45  ;;  %v3288_v20 = vrot.slane %v6174_v2, 5  ;;  %v705_v57 = vld [vmem:[%s7851_s15 + $0x8] sm:$0xf]  ;;  %v706_v63 = vld [vmem:[%s7851_s15 + $0xc] sm:$0xf] }
  0x67   : > { %6950 = vmatprep.mubr.msk.bf16.mxu0 %vm461_vm0, %v6141_v3  ;;  %v2654_v16 = vsel %vm7872_vm3, %v2649_v5, %v2653_v59  ;;  %v6218_v17 = vcombine.low %v3276_v62, %v3279_v9  ;;  %v3291_v22 = vrot.slane %v6175_v8, 5  ;;  %v3282_v23 = vsel %vm7943_vm6, %v3280_v7, %v3281_v0  ;;  %v707_v4 = vld [vmem:[%s7851_s15 + $0x10] sm:$0x1]  ;;  %v6183_v5 = vld [vmem:[%s7851_s15 + $0x50] sm:$0xe] }
  0x68   : > { %v6142_v19 = vcombine.low %v2644_v15, %v2654_v16  ;;  %v3285_v24 = vsel %vm7943_vm6, %v3283_v10, %v3284_v11  ;;  %v3294_v25 = vrot.slane %v6176_v14, 5  ;;  %v3297_v26 = vrot.slane %v6177_v18, 5  ;;  %v6184_v11 = vld [vmem:[%s7851_s15 + $0x54] sm:$0xf]  ;;  %v6185_v16 = vld [vmem:[%s7851_s15 + $0x58] sm:$0xf] }
  0x69   : > { %v3289_v29 = vsel %vm7943_vm6, %v6209_v13, %v3288_v20  ;;  %v3290_v30 = vrot.slane %v3288_v20, 4  ;;  %v3293_v31 = vrot.slane %v3291_v22, 4  ;;  %v6210_v33 = vrot.slane %v6178_v27, 9 }
  0x6a   : > { %6951 = vmatmul.mubr.msk.bf16.gmra.mrb[12].mxu0 %vm461_vm0, %v6142_v19  ;;  %v3296_v34 = vrot.slane %v3294_v25, 4  ;;  %v3301_v35 = vrot.slane %v6179_v28, 5  ;;  %v3304_v36 = vrot.slane %v6180_v32, 5  ;;  %v6219_v38 = vcombine.low %v3282_v23, %v3285_v24 }
  0x6b   : > { %6972 = vmatprep.mubr.msk.bf16.mxu0 %vm461_vm0, %v6218_v17  ;;  %v3292_v39 = vsel %vm7943_vm6, %v3290_v30, %v3291_v22  ;;  %v7993_v21 = vsel %vm7943_vm6, %v3293_v31, %v3294_v25  ;;  %v3307_v41 = vrot.slane %v6181_v37, 5  ;;  %v3310_v54 = vrot.slane %v6182_v40, 5  ;;  %v6186_v22 = vld [vmem:[%s7851_s15 + $0x5c] sm:$0xf]  ;;  %v7493_v30 = vld [vmem:[%s7851_s15 + $0x94] sm:$0xff]  }
  0x6c   : > { %6823 = vmatmul.mubr.msk.bf16.gmra.mrb[20].mxu1 %vm461_vm0, %v7488_v6  ;;  %v6220_v43 = vcombine.low %v3289_v29, %v3292_v39  ;;  %v7999_v44 = vsel %vm7943_vm6, %v3296_v34, %v3297_v26  ;;  %v8003_v45 = vsel %vm7943_vm6, %v6210_v33, %v3301_v35  ;;  %v3303_v46 = vrot.slane %v3301_v35, 4  ;;  %v8029_v6 = vld [vmem:[%s7843_s6 + $0x38] sm:$0xff]   ;;  %v6187_v34 = vld [vmem:[%s7851_s15 + $0x60] sm:$0x1] }
  0x6d   : > { %6826 = vmatprep.mubr.msk.bf16.mxu1 %vm461_vm0, %v7490_v12  ;;  %v6221_v50 = vcombine.low %v7993_v21, %v7999_v44  ;;  %v3306_v52 = vrot.slane %v3304_v36, 4  ;;  %v3309_v53 = vrot.slane %v3307_v41, 4  ;;  %v747_v60 = vshrl.u32 %v703_v42, 16  ;;  %v708_v40 = vld [vmem:[%s7851_s15 + $0x14] sm:$0xf] }
  0x6e   : > { %v8013_v59 = vsel %vm7943_vm6, %v3303_v46, %v3304_v36  ;;  %v750_v61 = vshll.u32 %v703_v42, 16  ;;  %v756_v62 = vshll.u32 %v704_v47, 16  ;;  %v760_v3 = vshrl.u32 %v704_v47, 16 }
  0x6f   : > { %v6222_v0 = vcombine.low %v8003_v45, %v8013_v59  ;;  %v8020_v1 = vsel %vm7943_vm6, %v3306_v52, %v3307_v41  ;;  %v8024_v2 = vsel %vm7943_vm6, %v3309_v53, %v3310_v54  ;;  %v749_v8 = vrot.slane %v747_v60, 4  ;;  %v709_v41 = vld [vmem:[%s7851_s15 + $0x18] sm:$0xf] }
  0x70   : > { %v6223_v7 = vcombine.low %v8020_v1, %v8024_v2  ;;  %v752_v9 = vrot.slane %v750_v61, 5  ;;  %v758_v10 = vrot.slane %v756_v62, 5  ;;  %v762_v12 = vrot.slane %v760_v3, 4  ;;  %v710_v61 = vld [vmem:[%s7851_s15 + $0x1c] sm:$0xf] }
  0x71   : > { %v766_v13 = vshll.u32 %v705_v57, 16  ;;  %v770_v14 = vshrl.u32 %v705_v57, 16  ;;  %v776_v15 = vshll.u32 %v706_v63, 16  ;;  %v780_v18 = vshrl.u32 %v706_v63, 16  ;;  %v711_v3 = vld [vmem:[%s7851_s15 + $0x20] sm:$0xf] }
  0x72   : > { %6973 = vmatmul.mubr.msk.bf16.vlgmr.msra.gmra.mrb[0].mxu0 %vm461_vm0, %v6219_v38  ;;  %v753_v17 = vor.u32 %v752_v9, %v749_v8  ;;  %v786_v19 = vshll.u32 %v707_v4, 16  ;;  %v6211_v20 = vrot.slane %v6183_v5, 9  ;;  %v763_v23 = vor.u32 %v762_v12, %v758_v10  ;;  %v712_v4 = vld [vmem:[%s7851_s15 + $0x24] sm:$0x1]  ;;  %v6188_v8 = vld [vmem:[%s7851_s15 + $0x64] sm:$0xe] }
  0x73   : > { %7005 = vmatpush3.bf16.msra.mxu0 %v7909_v55  ;;  %6976 = vmatprep.mubr.msk.bf16.mxu0 %vm461_vm0, %v6220_v43  ;;  %v768_v24 = vrot.slane %v766_v13, 5  ;;  %v772_v25 = vrot.slane %v770_v14, 4  ;;  %v778_v26 = vrot.slane %v776_v15, 5  ;;  %v782_v27 = vrot.slane %v780_v18, 4  ;;  %v6189_v9 = vld [vmem:[%s7851_s15 + $0x68] sm:$0xf] }
  0x74   : > { %6827 = vmatmul.mubr.msk.bf16.gmra.mrb[24].mxu1 %vm461_vm0, %v7491_v49  ;;  %7038 = vmatprep.subr.bf16.mxu0 %v8029_v6  ;;  %v754_v55 = vrot.slane %v753_v17, 4  ;;  %v788_v28 = vrot.slane %v786_v19, 5  ;;  %v3314_v29 = vrot.slane %v6184_v11, 5  ;;  %v764_v31 = vrot.slane %v763_v23, 4  ;;  %v6190_v14 = vld [vmem:[%s7851_s15 + $0x6c] sm:$0xf] }
  0x75   : > { %6830 = vmatprep.mubr.msk.bf16.mxu1 %vm461_vm0, %v7492_v58  ;;  %v773_v32 = vor.u32 %v772_v25, %v768_v24  ;;  %v3317_v33 = vrot.slane %v6185_v16, 5  ;;  %v3320_v35 = vrot.slane %v6186_v22, 5  ;;  %v783_v37 = vor.u32 %v782_v27, %v778_v26  ;;  %v6191_v19 = vld [vmem:[%s7851_s15 + $0x70] sm:$0xf]  ;;  %v6192_v25 = vld [vmem:[%s7851_s15 + $0x74] sm:$0x1] }
  0x76   : > { %v759_v36 = vsel %vm7872_vm3, %v754_v55, %v758_v10  ;;  %v8048_v38 = vsel %vm7943_vm6, %v6211_v20, %v3314_v29  ;;  %v3316_v39 = vrot.slane %v3314_v29, 4  ;;  %v769_v42 = vsel %vm7872_vm3, %v764_v31, %v768_v24  ;;  %v8090_v29 = vld [vmem:[%s7843_s6 + $0x18] sm:$0xff]  }
  0x77   : > { %v774_v43 = vrot.slane %v773_v32, 4  ;;  %v3319_v46 = vrot.slane %v3317_v33, 4  ;;  %v3322_v47 = vrot.slane %v3320_v35, 4  ;;  %v5948_v49 = vcombine.low %v759_v36, %v769_v42 }
  0x78   : > { %v784_v52 = vrot.slane %v783_v37, 4  ;;  %v3318_v53 = vsel %vm7943_vm6, %v3316_v39, %v3317_v33  ;;  %v3323_v54 = vrot.slane %v6187_v34, 5  ;;  %v791_v62 = vshrl.u32 %v708_v40, 16 }
  0x79   : > { %v779_v57 = vsel %vm7872_vm3, %v774_v43, %v778_v26  ;;  %v6224_v58 = vcombine.low %v8048_v38, %v3318_v53  ;;  %v8066_v60 = vsel %vm7943_vm6, %v3319_v46, %v3320_v35  ;;  %v800_v63 = vshll.u32 %v709_v41, 16  ;;  %v713_v38 = vld [vmem:[%s7851_s15 + $0x28] sm:$0xf] }
  0x7a   : > { %6977 = vmatmul.mubr.msk.bf16.gmra.mrb[4].mxu0 %vm461_vm0, %v6221_v50  ;;  %v789_v21 = vsel %vm7872_vm3, %v784_v52, %v788_v28  ;;  %v8078_v44 = vsel %vm7943_vm6, %v3322_v47, %v3323_v54  ;;  %v794_v50 = vshll.u32 %v708_v40, 16  ;;  %v793_v59 = vrot.slane %v791_v62, 4  ;;  %v714_v52 = vld [vmem:[%s7851_s15 + $0x2c] sm:$0xf]  ;;  %v716_v62 = vld [vmem:[%s7851_s15 + $0x34] sm:$0xf] }
  0x7b   : > { %6980 = vmatprep.mubr.msk.bf16.mxu0 %vm461_vm0, %v6222_v0  ;;  %v5949_v5 = vcombine.low %v779_v57, %v789_v21  ;;  %v6225_v45 = vcombine.low %v8066_v60, %v8078_v44  ;;  %v804_v0 = vshrl.u32 %v709_v41, 16  ;;  %v802_v11 = vrot.slane %v800_v63, 5  ;;  %v717_v21 = vld [vmem:[%s7851_s15 + $0x38] sm:$0x1] }
  0x7c   : > { %6831 = vmatmul.mubr.msk.bf16.gmra.mrb[28].mxu1 %vm461_vm0, %v7493_v30  ;;  %v796_v10 = vrot.slane %v794_v50, 5  ;;  %v810_v12 = vshll.u32 %v710_v61, 16  ;;  %v814_v13 = vshrl.u32 %v710_v61, 16  ;;  %v820_v16 = vshll.u32 %v711_v3, 16 }
  0x7d   : > { %6836 = vmatprep.mubr.msk.bf16.mxu1 %vm461_vm0, %v5948_v49  ;;  %v806_v15 = vrot.slane %v804_v0, 4  ;;  %v824_v17 = vshrl.u32 %v711_v3, 16  ;;  %v830_v18 = vshll.u32 %v712_v4, 16  ;;  %v6212_v24 = vrot.slane %v6188_v8, 9 }
  0x7e   : > { %v797_v20 = vor.u32 %v796_v10, %v793_v59  ;;  %v812_v22 = vrot.slane %v810_v12, 5  ;;  %v816_v23 = vrot.slane %v814_v13, 4  ;;  %v822_v55 = vrot.slane %v820_v16, 5  ;;  %v6194_v10 = vld [vmem:[%s7851_s15 + $0x7c] sm:$0xf] }
  0x7f   : > { %v807_v26 = vor.u32 %v806_v15, %v802_v11  ;;  %v826_v27 = vrot.slane %v824_v17, 4  ;;  %v832_v28 = vrot.slane %v830_v18, 5  ;;  %v3327_v32 = vrot.slane %v6189_v9, 5  ;;  %v6195_v15 = vld [vmem:[%s7851_s15 + $0x80] sm:$0xf] }
  0x80   : > { %v798_v30 = vrot.slane %v797_v20, 4  ;;  %v817_v31 = vor.u32 %v816_v23, %v812_v22  ;;  %v3330_v33 = vrot.slane %v6190_v14, 5  ;;  %v3333_v36 = vrot.slane %v6191_v19, 5  ;;  %v6196_v20 = vld [vmem:[%s7851_s15 + $0x84] sm:$0xf] }
  0x81   : > { %v808_v34 = vrot.slane %v807_v26, 4  ;;  %v827_v35 = vor.u32 %v826_v27, %v822_v55  ;;  %v3336_v37 = vrot.slane %v6192_v25, 5  ;;  %v3328_v1 = vsel %vm7943_vm6, %v6212_v24, %v3327_v32 }
  0x82   : > { %6981 = vmatmul.mubr.msk.bf16.gmra.mrb[8].mxu0 %vm461_vm0, %v6223_v7  ;;  %v803_v39 = vsel %vm7872_vm3, %v798_v30, %v802_v11  ;;  %v818_v40 = vrot.slane %v817_v31, 4  ;;  %v3329_v2 = vrot.slane %v3327_v32, 4  ;;  %v3332_v42 = vrot.slane %v3330_v33, 4  ;;  %v6197_v30 = vld [vmem:[%s7851_s15 + $0x88] sm:$0x1] }
  0x83   : > { %6984 = vmatprep.mubr.msk.bf16.mxu0 %vm461_vm0, %v6224_v58  ;;  %v813_v7 = vsel %vm7872_vm3, %v808_v34, %v812_v22  ;;  %v828_v41 = vrot.slane %v827_v35, 4  ;;  %v3335_v43 = vrot.slane %v3333_v36, 4  ;;  %v835_v53 = vshrl.u32 %v713_v38, 16 }
  0x84   : > { %6837 = vmatmul.mubr.msk.bf16.vlgmr.msra.gmra.mrb[0].mxu1 %vm461_vm0, %v5949_v5  ;;  %v5950_v46 = vcombine.low %v803_v39, %v813_v7  ;;  %v823_v47 = vsel %vm7872_vm3, %v818_v40, %v822_v55  ;;  %v3331_v49 = vsel %vm7943_vm6, %v3329_v2, %v3330_v33  ;;  %v8117_v58 = vsel %vm7943_vm6, %v3332_v42, %v3333_v36  ;;  %v6193_v5 = vld [vmem:[%s7851_s15 + $0x78] sm:$0xe]  ;;  %v718_v40 = vld [vmem:[%s7851_s15 + $0x3c] sm:$0xf]  ;;  %v719_v42 = vld [vmem:[%s7851_s15 + $0x40] sm:$0xf] }
  0x85   : > { %6869 = vmatpush3.bf16.msra.mxu1 %v7953_v56  ;;  %v715_v56 = vld [vmem:[%s7851_s15 + $0x30] sm:$0xf]  ;;  %v833_v54 = vsel %vm7872_vm3, %v828_v41, %v832_v28  ;;  %v6226_v57 = vcombine.low %v3328_v1, %v3331_v49  ;;  %v3337_v61 = vsel %vm7943_vm6, %v3335_v43, %v3336_v37  ;;  %v837_v3 = vrot.slane %v835_v53, 4  ;;  %v720_v43 = vld [vmem:[%s7851_s15 + $0x44] sm:$0xf] }
  0x86   : > { %6902 = vmatprep.subr.bf16.mxu1 %v8090_v29  ;;  %6840 = vmatprep.mubr.msk.bf16.mxu1 %vm461_vm0, %v5950_v46  ;;  %v5951_v50 = vcombine.low %v823_v47, %v833_v54  ;;  %v6227_v63 = vcombine.low %v8117_v58, %v3337_v61  ;;  %v838_v4 = vshll.u32 %v713_v38, 16  ;;  %v844_v59 = vshll.u32 %v714_v52, 16  ;;  %v722_v53 = vld [vmem:[%s7851_s15 + $0x4c] sm:$0x1] }
  0x87   : > { %v848_v0 = vshrl.u32 %v714_v52, 16  ;;  %v854_v8 = vshll.u32 %v715_v56, 16  ;;  %v858_v9 = vshrl.u32 %v715_v56, 16  ;;  %v864_v12 = vshll.u32 %v716_v62, 16  ;;  %v721_v56 = vld [vmem:[%s7851_s15 + $0x48] sm:$0xf] }
  0x88   : > { %v840_v11 = vrot.slane %v838_v4, 5  ;;  %v868_v13 = vshrl.u32 %v716_v62, 16  ;;  %v874_v14 = vshll.u32 %v717_v21, 16  ;;  %v846_v16 = vrot.slane %v844_v59, 5  ;;  %v6198_v62 = vld [vmem:[%s7851_s15 + $0x8c] sm:$0xe] }
  0x89   : > { %v850_v17 = vrot.slane %v848_v0, 4  ;;  %v856_v18 = vrot.slane %v854_v8, 5  ;;  %v860_v19 = vrot.slane %v858_v9, 4  ;;  %v866_v23 = vrot.slane %v864_v12, 5  ;;  %v6199_v21 = vld [vmem:[%s7851_s15 + $0x90] sm:$0xf] }
  0x8a   : > { %6985 = vmatmul.mubr.msk.bf16.gmra.mrb[12].mxu0 %vm461_vm0, %v6225_v45  ;;  %v841_v22 = vor.u32 %v840_v11, %v837_v3  ;;  %v870_v24 = vrot.slane %v868_v13, 4  ;;  %v876_v25 = vrot.slane %v874_v14, 5  ;;  %v6213_v60 = vrot.slane %v6193_v5, 9  ;;  %v6200_v59 = vld [vmem:[%s7851_s15 + $0x94] sm:$0xf] }
  0x8b   : > { %6988 = vmatprep.mubr.msk.bf16.mxu0 %vm461_vm0, %v6226_v57  ;;  %v851_v26 = vor.u32 %v850_v17, %v846_v16  ;;  %v861_v55 = vor.u32 %v860_v19, %v856_v18  ;;  %v3340_v44 = vrot.slane %v6194_v10, 5  ;;  %v3343_v28 = vrot.slane %v6195_v15, 5  ;;  %v6201_v14 = vld [vmem:[%s7851_s15 + $0x98] sm:$0xf]  ;;  %v6202_v19 = vld [vmem:[%s7851_s15 + $0x9c] sm:$0x1] }
  0x8c   : > { %6841 = vmatmul.mubr.msk.bf16.gmra.mrb[4].mxu1 %vm461_vm0, %v5951_v50  ;;  %v842_v45 = vrot.slane %v841_v22, 4  ;;  %v871_v27 = vor.u32 %v870_v24, %v866_v23  ;;  %v3346_v31 = vrot.slane %v6196_v20, 5  ;;  %v3349_v41 = vrot.slane %v6197_v30, 5 }
  0x8d   : > { %v852_v32 = vrot.slane %v851_v26, 4  ;;  %v862_v33 = vrot.slane %v861_v55, 4  ;;  %v3341_v34 = vsel %vm7943_vm6, %v6213_v60, %v3340_v44  ;;  %v3342_v35 = vrot.slane %v3340_v44, 4 }
  0x8e   : > { %v847_v36 = vsel %vm7872_vm3, %v842_v45, %v846_v16  ;;  %v872_v37 = vrot.slane %v871_v27, 4  ;;  %v3345_v38 = vrot.slane %v3343_v28, 4  ;;  %v3348_v39 = vrot.slane %v3346_v31, 4 }
  0x8f   : > { %v857_v1 = vsel %vm7872_vm3, %v852_v32, %v856_v18  ;;  %v867_v2 = vsel %vm7872_vm3, %v862_v33, %v866_v23  ;;  %v3344_v7 = vsel %vm7943_vm6, %v3342_v35, %v3343_v28  ;;  %v879_v58 = vshrl.u32 %v718_v40, 16 }
  0x90   : > { %v5952_v46 = vcombine.low %v847_v36, %v857_v1  ;;  %v877_v47 = vsel %vm7872_vm3, %v872_v37, %v876_v25  ;;  %v6228_v49 = vcombine.low %v3341_v34, %v3344_v7  ;;  %v3347_v52 = vsel %vm7943_vm6, %v3345_v38, %v3346_v31  ;;  %v723_v34 = vld [vmem:[%s7851_s15 + $0x50] sm:$0xf] }
  0x91   : > { %v5953_v54 = vcombine.low %v867_v2, %v877_v47  ;;  %v3350_v57 = vsel %vm7943_vm6, %v3348_v39, %v3349_v41  ;;  %v882_v61 = vshll.u32 %v718_v40, 16  ;;  %v888_v3 = vshll.u32 %v719_v42, 16  ;;  %v724_v39 = vld [vmem:[%s7851_s15 + $0x54] sm:$0xf]  ;;  %v725_v40 = vld [vmem:[%s7851_s15 + $0x58] sm:$0xf] }
  0x92   : > { %6989 = vmatmul.mubr.msk.bf16.gmra.mrb[16].mxu0 %vm461_vm0, %v6227_v63  ;;  %6844 = vmatprep.mubr.msk.bf16.mxu1 %vm461_vm0, %v5952_v46  ;;  %v6229_v50 = vcombine.low %v3347_v52, %v3350_v57  ;;  %v892_v4 = vshrl.u32 %v719_v42, 16  ;;  %v898_v5 = vshll.u32 %v720_v43, 16  ;;  %v881_v63 = vrot.slane %v879_v58, 4  ;;  %v726_v42 = vld [vmem:[%s7851_s15 + $0x5c] sm:$0xf] }
  0x93   : > { %6992 = vmatprep.mubr.msk.bf16.mxu0 %vm461_vm0, %v6228_v49  ;;  %v884_v0 = vrot.slane %v882_v61, 5  ;;  %v902_v8 = vshrl.u32 %v720_v43, 16  ;;  %v908_v9 = vshll.u32 %v721_v56, 16  ;;  %v890_v10 = vrot.slane %v888_v3, 5  ;;  %v727_v52 = vld [vmem:[%s7851_s15 + $0x60] sm:$0x1] }
  0x94   : > { %6845 = vmatmul.mubr.msk.bf16.gmra.mrb[8].mxu1 %vm461_vm0, %v5953_v54  ;;  %v894_v11 = vrot.slane %v892_v4, 4  ;;  %v900_v12 = vrot.slane %v898_v5, 5  ;;  %v912_v13 = vshrl.u32 %v721_v56, 16  ;;  %v918_v18 = vshll.u32 %v722_v53, 16  ;;  %v6203_v56 = vld [vmem:[%s7851_s15 + $0xa0] sm:$0xe] }
  0x95   : > { %v885_v15 = vor.u32 %v884_v0, %v881_v63  ;;  %v904_v16 = vrot.slane %v902_v8, 4  ;;  %v910_v17 = vrot.slane %v908_v9, 5  ;;  %v6214_v23 = vrot.slane %v6198_v62, 9  ;;  %v6204_v3 = vld [vmem:[%s7851_s15 + $0xa4] sm:$0xf] }
  0x96   : > { %v895_v20 = vor.u32 %v894_v11, %v890_v10  ;;  %v914_v22 = vrot.slane %v912_v13, 4  ;;  %v3353_v24 = vrot.slane %v6199_v21, 5  ;;  %v920_v55 = vrot.slane %v918_v18, 5  ;;  %v6205_v0 = vld [vmem:[%s7851_s15 + $0xa8] sm:$0xf] }
  0x97   : > { %v886_v25 = vrot.slane %v885_v15, 4  ;;  %v905_v26 = vor.u32 %v904_v16, %v900_v12  ;;  %v3356_v60 = vrot.slane %v6200_v59, 5  ;;  %v3359_v33 = vrot.slane %v6201_v14, 5 }
  0x98   : > { %v896_v44 = vrot.slane %v895_v20, 4  ;;  %v915_v45 = vor.u32 %v914_v22, %v910_v17  ;;  %v3354_v27 = vsel %vm7943_vm6, %v6214_v23, %v3353_v24  ;;  %v3355_v28 = vrot.slane %v3353_v24, 4  ;;  %v728_v23 = vld [vmem:[%s7851_s15 + $0x64] sm:$0xf] }
  0x99   : > { %v891_v30 = vsel %vm7872_vm3, %v886_v25, %v890_v10  ;;  %v906_v31 = vrot.slane %v905_v26, 4  ;;  %v3358_v32 = vrot.slane %v3356_v60, 4  ;;  %v3362_v38 = vrot.slane %v6202_v19, 5 }
  0x9a   : > { %6993 = vmatmul.mubr.msk.bf16.gmra.mrb[20].mxu0 %vm461_vm0, %v6229_v50  ;;  %v901_v35 = vsel %vm7872_vm3, %v896_v44, %v900_v12  ;;  %v916_v36 = vrot.slane %v915_v45, 4  ;;  %v3357_v37 = vsel %vm7943_vm6, %v3355_v28, %v3356_v60  ;;  %v3361_v46 = vrot.slane %v3359_v33, 4  ;;  %v6206_v12 = vld [vmem:[%s7851_s15 + $0xac] sm:$0xf]  ;;  %v729_v60 = vld [vmem:[%s7851_s15 + $0x68] sm:$0xf] }
  0x9b   : > { %v5954_v1 = vcombine.low %v891_v30, %v901_v35  ;;  %v911_v2 = vsel %vm7872_vm3, %v906_v31, %v910_v17  ;;  %v6230_v7 = vcombine.low %v3354_v27, %v3357_v37  ;;  %v3360_v41 = vsel %vm7943_vm6, %v3358_v32, %v3359_v33  ;;  %v6207_v17 = vld [vmem:[%s7851_s15 + $0xb0] sm:$0x1] }
  0x9c   : > { %v921_v43 = vsel %vm7872_vm3, %v916_v36, %v920_v55  ;;  %v923_v47 = vshrl.u32 %v723_v34, 16  ;;  %v926_v49 = vshll.u32 %v723_v34, 16  ;;  %v932_v54 = vshll.u32 %v724_v39, 16 }
  0x9d   : > { %6848 = vmatprep.mubr.msk.bf16.mxu1 %vm461_vm0, %v5954_v1  ;;  %v5955_v53 = vcombine.low %v911_v2, %v921_v43  ;;  %6996 = vmatprep.mubr.msk.bf16.mxu0 %vm461_vm0, %v6230_v7  ;;  %v936_v57 = vshrl.u32 %v724_v39, 16  ;;  %v942_v58 = vshll.u32 %v725_v40, 16  ;;  %v3363_v61 = vsel %vm7943_vm6, %v3361_v46, %v3362_v38  ;;  %v730_v38 = vld [vmem:[%s7851_s15 + $0x6c] sm:$0xf]  ;;  %v731_v7 = vld [vmem:[%s7851_s15 + $0x70] sm:$0xf] }
  0x9e   : > { %v925_v62 = vrot.slane %v923_v47, 4  ;;  %v928_v21 = vrot.slane %v926_v49, 5  ;;  %v946_v50 = vshrl.u32 %v725_v40, 16  ;;  %v6231_v4 = vcombine.low %v3360_v41, %v3363_v61  ;;  %v732_v47 = vld [vmem:[%s7851_s15 + $0x74] sm:$0x1] }
  0x9f   : > { %6849 = vmatmul.mubr.msk.bf16.gmra.mrb[12].mxu1 %vm461_vm0, %v5955_v53  ;;  %v934_v5 = vrot.slane %v932_v54, 5  ;;  %v938_v59 = vrot.slane %v936_v57, 4  ;;  %v944_v63 = vrot.slane %v942_v58, 5  ;;  %v952_v10 = vshll.u32 %v726_v42, 16  ;;  %v7495_v54 = vld [vmem:[%s7851_s15 + $0x28] sm:$0xff]  }
  0xa0   : > { %v929_v8 = vor.u32 %v928_v21, %v925_v62  ;;  %v948_v9 = vrot.slane %v946_v50, 4  ;;  %v956_v11 = vshrl.u32 %v726_v42, 16  ;;  %v962_v14 = vshll.u32 %v727_v52, 16  ;;  %v733_v57 = vld [vmem:[%s7851_s15 + $0x78] sm:$0xf] }
  0xa1   : > { %v939_v13 = vor.u32 %v938_v59, %v934_v5  ;;  %v6215_v15 = vrot.slane %v6203_v56, 9  ;;  %v3366_v16 = vrot.slane %v6204_v3, 5  ;;  %v954_v20 = vrot.slane %v952_v10, 5 }
  0xa2   : > { %6997 = vmatmul.mubr.msk.bf16.gmra.mrb[24].mxu0 %vm461_vm0, %v6231_v4  ;;  %v930_v18 = vrot.slane %v929_v8, 4  ;;  %v949_v19 = vor.u32 %v948_v9, %v944_v63  ;;  %v958_v22 = vrot.slane %v956_v11, 4  ;;  %v964_v25 = vrot.slane %v962_v14, 5  ;;  %v734_v8 = vld [vmem:[%s7851_s15 + $0x7c] sm:$0xf] }
  0xa3   : > { %v940_v24 = vrot.slane %v939_v13, 4  ;;  %v3367_v26 = vsel %vm7943_vm6, %v6215_v15, %v3366_v16  ;;  %v3368_v55 = vrot.slane %v3366_v16, 4  ;;  %v3369_v28 = vrot.slane %v6205_v0, 5  ;;  %v735_v13 = vld [vmem:[%s7851_s15 + $0x80] sm:$0xf] }
  0xa4   : > { %v935_v44 = vsel %vm7872_vm3, %v930_v18, %v934_v5  ;;  %v950_v45 = vrot.slane %v949_v19, 4  ;;  %v959_v27 = vor.u32 %v958_v22, %v954_v20  ;;  %v3372_v31 = vrot.slane %v6206_v12, 5  ;;  %v7497_v22 = vld [vmem:[%s7851_s15 + $0x30] sm:$0xff]  }
  0xa5   : > { %v945_v30 = vsel %vm7872_vm3, %v940_v24, %v944_v63  ;;  %v3375_v32 = vrot.slane %v6207_v17, 5  ;;  %v967_v33 = vshrl.u32 %v728_v23, 16  ;;  %v3370_v37 = vsel %vm7943_vm6, %v3368_v55, %v3369_v28 }
  0xa6   : > { %v5956_v34 = vcombine.low %v935_v44, %v945_v30  ;;  %v955_v35 = vsel %vm7872_vm3, %v950_v45, %v954_v20  ;;  %v960_v36 = vrot.slane %v959_v27, 4  ;;  %v6232_v39 = vcombine.low %v3367_v26, %v3370_v37  ;;  %v7498_v26 = vld [vmem:[%s7851_s15 + $0x3c] sm:$0xff]   ;;  %v737_v27 = vld [vmem:[%s7851_s15 + $0x88] sm:$0x1] }
  0xa7   : > { %v3371_v40 = vrot.slane %v3369_v28, 4  ;;  %v3374_v1 = vrot.slane %v3372_v31, 4  ;;  %v969_v2 = vrot.slane %v967_v33, 4  ;;  %v970_v42 = vshll.u32 %v728_v23, 16  ;;  %v738_v28 = vld [vmem:[%s7851_s15 + $0x8c] sm:$0xf] }
  0xa8   : > { %6852 = vmatprep.mubr.msk.bf16.mxu1 %vm461_vm0, %v5956_v34  ;;  %v965_v41 = vsel %vm7872_vm3, %v960_v36, %v964_v25  ;;  %v976_v43 = vshll.u32 %v729_v60, 16  ;;  %v980_v46 = vshrl.u32 %v729_v60, 16  ;;  %7000 = vmatprep.mubr.msk.bf16.mxu0 %vm461_vm0, %v6232_v39  ;;  %v986_v53 = vshll.u32 %v730_v38, 16  ;;  %v736_v25 = vld [vmem:[%s7851_s15 + $0x84] sm:$0xf]  ;;  %v8237_v30 = vld [vmem:[%s7843_s6 + $0x40] sm:$0xff]  }
  0xa9   : > { %v5957_v49 = vcombine.low %v955_v35, %v965_v41  ;;  %v3373_v52 = vsel %vm7943_vm6, %v3371_v40, %v3372_v31  ;;  %v3376_v56 = vsel %vm7943_vm6, %v3374_v1, %v3375_v32  ;;  %v972_v61 = vrot.slane %v970_v42, 5 }
  0xaa   : > { %v6233_v58 = vcombine.low %v3373_v52, %v3376_v56  ;;  %v978_v62 = vrot.slane %v976_v43, 5  ;;  %v982_v21 = vrot.slane %v980_v46, 4  ;;  %v988_v50 = vrot.slane %v986_v53, 5  ;;  %v739_v46 = vld [vmem:[%s7851_s15 + $0x90] sm:$0xf] }
  0xab   : > { %6853 = vmatmul.mubr.msk.bf16.gmra.mrb[16].mxu1 %vm461_vm0, %v5957_v49  ;;  %v990_v3 = vshrl.u32 %v730_v38, 16  ;;  %v996_v4 = vshll.u32 %v731_v7, 16  ;;  %v1000_v5 = vshrl.u32 %v731_v7, 16  ;;  %v973_v59 = vor.u32 %v972_v61, %v969_v2  ;;  %v740_v56 = vld [vmem:[%s7851_s15 + $0x94] sm:$0xf]  ;;  %v7499_v61 = vld [vmem:[%s7851_s15 + $0x44] sm:$0xff]  }
  0xac   : > { %7001 = vmatmul.mubr.msk.bf16.gmra.mrb[28].mxu0 %vm461_vm0, %v6233_v58  ;;  %v983_v63 = vor.u32 %v982_v21, %v978_v62  ;;  %v1006_v0 = vshll.u32 %v732_v47, 16  ;;  %v1011_v9 = vshrl.u32 %v733_v57, 16  ;;  %v1014_v14 = vshll.u32 %v733_v57, 16  ;;  %v741_v21 = vld [vmem:[%s7851_s15 + $0x98] sm:$0xf] }
  0xad   : > { %v992_v10 = vrot.slane %v990_v3, 4  ;;  %v998_v11 = vrot.slane %v996_v4, 5  ;;  %v1002_v12 = vrot.slane %v1000_v5, 4  ;;  %7006 = vmatprep.mubr.msk.bf16.mxu0 %vm461_vm0, %v7495_v54  ;;  %v974_v15 = vrot.slane %v973_v59, 4  ;;  %v742_v5 = vld [vmem:[%s7851_s15 + $0x9c] sm:$0x1] }
  0xae   : > { %v984_v16 = vrot.slane %v983_v63, 4  ;;  %v1008_v17 = vrot.slane %v1006_v0, 5  ;;  %v1013_v18 = vrot.slane %v1011_v9, 4  ;;  %v1016_v23 = vrot.slane %v1014_v14, 5  ;;  %v1460_v14 = vld [vmem:[%s7851_s15] sm:$0xe] }
  0xaf   : > { %v993_v19 = vor.u32 %v992_v10, %v988_v50  ;;  %v1003_v20 = vor.u32 %v1002_v12, %v998_v11  ;;  %v1020_v24 = vshll.u32 %v734_v8, 16  ;;  %v979_v55 = vsel %vm7872_vm3, %v974_v15, %v978_v62 }
  0xb0   : > { %v989_v60 = vsel %vm7872_vm3, %v984_v16, %v988_v50  ;;  %v1024_v44 = vshrl.u32 %v734_v8, 16  ;;  %v1030_v45 = vshll.u32 %v735_v13, 16  ;;  %v1017_v34 = vor.u32 %v1016_v23, %v1013_v18 }
  0xb1   : > { %v5958_v31 = vcombine.low %v979_v55, %v989_v60  ;;  %v994_v32 = vrot.slane %v993_v19, 4  ;;  %v1004_v33 = vrot.slane %v1003_v20, 4  ;;  %v1022_v35 = vrot.slane %v1020_v24, 5  ;;  %v1461_v19 = vld [vmem:[%s7851_s15 + $0x4] sm:$0xf] }
  0xb2   : > { %v1026_v36 = vrot.slane %v1024_v44, 4  ;;  %v1032_v37 = vrot.slane %v1030_v45, 5  ;;  %v1034_v38 = vshrl.u32 %v735_v13, 16  ;;  %v1018_v1 = vrot.slane %v1017_v34, 4  ;;  %v7500_v13 = vld [vmem:[%s7851_s15 + $0x50] sm:$0xff]  }
  0xb3   : > { %6856 = vmatprep.mubr.msk.bf16.mxu1 %vm461_vm0, %v5958_v31  ;;  %v999_v39 = vsel %vm7872_vm3, %v994_v32, %v998_v11  ;;  %v1009_v40 = vsel %vm7872_vm3, %v1004_v33, %v1008_v17  ;;  %v1040_v2 = vshll.u32 %v736_v25, 16  ;;  %v1044_v43 = vshrl.u32 %v736_v25, 16  ;;  %v1462_v20 = vld [vmem:[%s7851_s15 + $0x8] sm:$0xf]  ;;  %v1465_v34 = vld [vmem:[%s7851_s15 + $0x14] sm:$0xe] }
  0xb4   : > { %v5959_v7 = vcombine.low %v999_v39, %v1009_v40  ;;  %7007 = vmatmul.mubr.msk.bf16.vlgmr.msra.gmra.mrb[0].mxu0 %vm461_vm0, %v7497_v22  ;;  %v1027_v41 = vor.u32 %v1026_v36, %v1022_v35  ;;  %v1036_v42 = vrot.slane %v1034_v38, 4  ;;  %v1023_v47 = vsel %vm7872_vm3, %v1018_v1, %v1022_v35  ;;  %v1466_v35 = vld [vmem:[%s7851_s15 + $0x18] sm:$0xf]  ;;  %v1467_v40 = vld [vmem:[%s7851_s15 + $0x1c] sm:$0xf] }
  0xb5   : > { %7039 = vmatpush3.bf16.msra.mxu0 %v8029_v6  ;;  %v1042_v49 = vrot.slane %v1040_v2, 5  ;;  %v1050_v52 = vshll.u32 %v737_v27, 16  ;;  %7010 = vmatprep.mubr.msk.bf16.mxu0 %vm461_vm0, %v7498_v26  ;;  %v1055_v53 = vshrl.u32 %v738_v28, 16  ;;  %v1046_v58 = vrot.slane %v1044_v43, 4  ;;  %v1463_v26 = vld [vmem:[%s7851_s15 + $0xc] sm:$0xf] }
  0xb6   : > { %6857 = vmatmul.mubr.msk.bf16.gmra.mrb[20].mxu1 %vm461_vm0, %v5959_v7  ;;  %v1028_v54 = vrot.slane %v1027_v41, 4  ;;  %v1037_v57 = vor.u32 %v1036_v42, %v1032_v37  ;;  %v1058_v62 = vshll.u32 %v738_v28, 16  ;;  %7072 = vmatprep.subr.bf16.mxu0 %v8237_v30  ;;  %v1064_v3 = vshll.u32 %v739_v46, 16  ;;  %v1464_v27 = vld [vmem:[%s7851_s15 + $0x10] sm:$0x1] }
  0xb7   : > { %v1052_v6 = vrot.slane %v1050_v52, 5  ;;  %v1057_v50 = vrot.slane %v1055_v53, 4  ;;  %v1068_v4 = vshrl.u32 %v739_v46, 16  ;;  %v1047_v0 = vor.u32 %v1046_v58, %v1042_v49  ;;  %v7501_v46 = vld [vmem:[%s7851_s15 + $0x58] sm:$0xff]   ;;  %v1468_v52 = vld [vmem:[%s7851_s15 + $0x20] sm:$0xf] }
  0xb8   : > { %v1033_v59 = vsel %vm7872_vm3, %v1028_v54, %v1032_v37  ;;  %v1038_v63 = vrot.slane %v1037_v57, 4  ;;  %v1060_v8 = vrot.slane %v1058_v62, 5  ;;  %v1066_v10 = vrot.slane %v1064_v3, 5  ;;  %v7502_v58 = vld [vmem:[%s7851_s15 + $0x64] sm:$0xff]  }
  0xb9   : > { %v5960_v9 = vcombine.low %v1023_v47, %v1033_v59  ;;  %v1070_v11 = vrot.slane %v1068_v4, 4  ;;  %v1074_v12 = vshll.u32 %v740_v56, 16  ;;  %v1048_v16 = vrot.slane %v1047_v0, 4  ;;  %v1470_v62 = vld [vmem:[%s7851_s15 + $0x28] sm:$0xe] }
  0xba   : > { %v1043_v15 = vsel %vm7872_vm3, %v1038_v63, %v1042_v49  ;;  %v1061_v17 = vor.u32 %v1060_v8, %v1057_v50  ;;  %v1078_v18 = vshrl.u32 %v740_v56, 16  ;;  %v1084_v24 = vshll.u32 %v741_v21, 16  ;;  %v1471_v4 = vld [vmem:[%s7851_s15 + $0x2c] sm:$0xf]  ;;  %v1472_v0 = vld [vmem:[%s7851_s15 + $0x30] sm:$0xf] }
  0xbb   : > { %6860 = vmatprep.mubr.msk.bf16.mxu1 %vm461_vm0, %v5960_v9  ;;  %v1071_v22 = vor.u32 %v1070_v11, %v1066_v10  ;;  %v1076_v23 = vrot.slane %v1074_v12, 5  ;;  %v1088_v25 = vshrl.u32 %v741_v21, 16  ;;  %v1053_v55 = vsel %vm7872_vm3, %v1048_v16, %v1052_v6  ;;  %v1473_v8 = vld [vmem:[%s7851_s15 + $0x34] sm:$0xf] }
  0xbc   : > { %7011 = vmatmul.mubr.msk.bf16.gmra.mrb[4].mxu0 %vm461_vm0, %v7499_v61  ;;  %v1062_v60 = vrot.slane %v1061_v17, 4  ;;  %v1080_v44 = vrot.slane %v1078_v18, 4  ;;  %v1094_v45 = vshll.u32 %v742_v5, 16  ;;  %v5961_v28 = vcombine.low %v1043_v15, %v1053_v55  ;;  %v1469_v61 = vld [vmem:[%s7851_s15 + $0x24] sm:$0x1] }
  0xbd   : > { %v1072_v31 = vrot.slane %v1071_v22, 4  ;;  %v1086_v32 = vrot.slane %v1084_v24, 5  ;;  %v1090_v33 = vrot.slane %v1088_v25, 4  ;;  %7014 = vmatprep.mubr.msk.bf16.mxu0 %vm461_vm0, %v7500_v13  ;;  %v5981_v39 = vrot.slane %v1460_v14, 9  ;;  %v1474_v13 = vld [vmem:[%s7851_s15 + $0x38] sm:$0x1] }
  0xbe   : > { %v1067_v36 = vsel %vm7872_vm3, %v1062_v60, %v1066_v10  ;;  %v1081_v37 = vor.u32 %v1080_v44, %v1076_v23  ;;  %v1096_v38 = vrot.slane %v1094_v45, 5  ;;  %6861 = vmatmul.mubr.msk.bf16.gmra.mrb[24].mxu1 %vm461_vm0, %v5961_v28  ;;  %v1545_v7 = vrot.slane %v1461_v19, 5  ;;  %v1475_v14 = vld [vmem:[%s7851_s15 + $0x3c] sm:$0xe]  ;;  %v1476_v19 = vld [vmem:[%s7851_s15 + $0x40] sm:$0xf] }
  0xbf   : > { %v1077_v1 = vsel %vm7872_vm3, %v1072_v31, %v1076_v23  ;;  %v1091_v2 = vor.u32 %v1090_v33, %v1086_v32  ;;  %v1548_v41 = vrot.slane %v1462_v20, 5  ;;  %v1551_v47 = vrot.slane %v1463_v26, 5  ;;  %v7503_v20 = vld [vmem:[%s7851_s15 + $0x6c] sm:$0xff]   ;;  %v1477_v26 = vld [vmem:[%s7851_s15 + $0x44] sm:$0xf] }
  0xc0   : > { %v5962_v42 = vcombine.low %v1067_v36, %v1077_v1  ;;  %v1082_v43 = vrot.slane %v1081_v37, 4  ;;  %v1554_v49 = vrot.slane %v1464_v27, 5  ;;  %v1546_v53 = vsel %vm7943_vm6, %v5981_v39, %v1545_v7  ;;  %v1478_v27 = vld [vmem:[%s7851_s15 + $0x48] sm:$0xf]  ;;  %v1479_v28 = vld [vmem:[%s7851_s15 + $0x4c] sm:$0x1] }
  0xc1   : > { %v1092_v56 = vrot.slane %v1091_v2, 4  ;;  %v1547_v54 = vrot.slane %v1545_v7, 4  ;;  %v1550_v57 = vrot.slane %v1548_v41, 4  ;;  %v1553_v6 = vrot.slane %v1551_v47, 4  ;;  %v1481_v36 = vld [vmem:[%s7851_s15 + $0x54] sm:$0xf] }
  0xc2   : > { %6864 = vmatprep.mubr.msk.bf16.mxu1 %vm461_vm0, %v5962_v42  ;;  %v1087_v21 = vsel %vm7872_vm3, %v1082_v43, %v1086_v32  ;;  %v5982_v50 = vrot.slane %v1465_v34, 9  ;;  %v1558_v3 = vrot.slane %v1466_v35, 5  ;;  %v1561_v63 = vrot.slane %v1467_v40, 5  ;;  %v1480_v35 = vld [vmem:[%s7851_s15 + $0x50] sm:$0xe] }
  0xc3   : > { %v1097_v5 = vsel %vm7872_vm3, %v1092_v56, %v1096_v38  ;;  %v1549_v59 = vsel %vm7943_vm6, %v1547_v54, %v1548_v41  ;;  %v8299_v11 = vsel %vm7943_vm6, %v1550_v57, %v1551_v47  ;;  %v8303_v12 = vsel %vm7943_vm6, %v1553_v6, %v1554_v49  ;;  %v7505_v38 = vld [vmem:[%s7851_s15 + $0x78] sm:$0xff]   ;;  %v1484_v47 = vld [vmem:[%s7851_s15 + $0x60] sm:$0x1] }
  0xc4   : > { %v5963_v9 = vcombine.low %v1087_v21, %v1097_v5  ;;  %7015 = vmatmul.mubr.msk.bf16.gmra.mrb[8].mxu0 %vm461_vm0, %v7501_v46  ;;  %v5991_v10 = vcombine.low %v1546_v53, %v1549_v59  ;;  %v8310_v15 = vsel %vm7943_vm6, %v5982_v50, %v1558_v3  ;;  %v1560_v16 = vrot.slane %v1558_v3, 4  ;;  %v1482_v2 = vld [vmem:[%s7851_s15 + $0x58] sm:$0xf]  ;;  %v1483_v46 = vld [vmem:[%s7851_s15 + $0x5c] sm:$0xf] }
  0xc5   : > { %7018 = vmatprep.mubr.msk.bf16.mxu0 %vm461_vm0, %v7502_v58  ;;  %v1563_v17 = vrot.slane %v1561_v63, 4  ;;  %v1564_v18 = vrot.slane %v1468_v52, 5  ;;  %v1567_v22 = vrot.slane %v1469_v61, 5  ;;  %v5983_v23 = vrot.slane %v1470_v62, 9  ;;  %v1485_v62 = vld [vmem:[%s7851_s15 + $0x64] sm:$0xe] }
  0xc6   : > { %v1571_v24 = vrot.slane %v1471_v4, 5  ;;  %v1574_v25 = vrot.slane %v1472_v0, 5  ;;  %6865 = vmatmul.mubr.msk.bf16.gmra.mrb[28].mxu1 %vm461_vm0, %v5963_v9  ;;  %v1562_v55 = vsel %vm7943_vm6, %v1560_v16, %v1561_v63  ;;  %v1577_v45 = vrot.slane %v1473_v8, 5  ;;  %v1486_v21 = vld [vmem:[%s7851_s15 + $0x68] sm:$0xf] }
  0xc7   : > { %v8320_v60 = vsel %vm7943_vm6, %v1563_v17, %v1564_v18  ;;  %v1566_v44 = vrot.slane %v1564_v18, 4  ;;  %6870 = vmatprep.mubr.msk.bf16.mxu1 %vm461_vm0, %v5991_v10  ;;  %v5992_v31 = vcombine.low %v8299_v11, %v8303_v12  ;;  %v1580_v40 = vrot.slane %v1474_v13, 5  ;;  %v1487_v5 = vld [vmem:[%s7851_s15 + $0x6c] sm:$0xf]  ;;  %v1488_v9 = vld [vmem:[%s7851_s15 + $0x70] sm:$0xf] }
  0xc8   : > { %v8329_v32 = vsel %vm7943_vm6, %v5983_v23, %v1571_v24  ;;  %v1573_v33 = vrot.slane %v1571_v24, 4  ;;  %v1576_v34 = vrot.slane %v1574_v25, 4  ;;  %v1579_v39 = vrot.slane %v1577_v45, 4  ;;  %v7506_v10 = vld [vmem:[%s7851_s15 + $0x80] sm:$0xff]  }
  0xc9   : > { %v8335_v37 = vsel %vm7943_vm6, %v1566_v44, %v1567_v22  ;;  %v5984_v1 = vrot.slane %v1475_v14, 9  ;;  %v5993_v7 = vcombine.low %v8310_v15, %v1562_v55  ;;  %v1584_v43 = vrot.slane %v1476_v19, 5  ;;  %v7507_v15 = vld [vmem:[%s7851_s15 + $0x8c] sm:$0xff]  }
  0xca   : > { %v5994_v41 = vcombine.low %v8320_v60, %v8335_v37  ;;  %v8344_v42 = vsel %vm7943_vm6, %v1573_v33, %v1574_v25  ;;  %v8352_v52 = vsel %vm7943_vm6, %v1576_v34, %v1577_v45  ;;  %v1587_v56 = vrot.slane %v1477_v26, 5  ;;  %v6320_v26 = vld [vmem:[%s7851_s15 + $0x28] sm:$0xf]  ;;  %v8396_v55 = vld [vmem:[%s7843_s6 + $0x20] sm:$0xff]   ;;  %s324_s6 = sand.u32 1, %s7617_s13  }
  0xcb   : > { %v5995_v49 = vcombine.low %v8329_v32, %v8344_v42  ;;  %v1590_v53 = vrot.slane %v1478_v27, 5  ;;  %v8357_v54 = vsel %vm7943_vm6, %v1579_v39, %v1580_v40  ;;  %v8361_v57 = vsel %vm7943_vm6, %v5984_v1, %v1584_v43  ;;  %v1494_v32 = vld [vmem:[%s7851_s15 + $0x88] sm:$0x1]  ;;  %s5908_s8 = sshll.u32 %s324_s6, 7 }
  0xcc   : > { %7019 = vmatmul.mubr.msk.bf16.gmra.mrb[12].mxu0 %vm461_vm0, %v7503_v20  ;;  %v1586_v58 = vrot.slane %v1584_v43, 4  ;;  %v1593_v61 = vrot.slane %v1479_v28, 5  ;;  %v1589_v6 = vrot.slane %v1587_v56, 4  ;;  %v5985_v3 = vrot.slane %v1480_v35, 9  ;;  %v1489_v20 = vld [vmem:[%s7851_s15 + $0x74] sm:$0x1] }
  0xcd   : > { %7022 = vmatprep.mubr.msk.bf16.mxu0 %vm461_vm0, %v7505_v38  ;;  %v1592_v50 = vrot.slane %v1590_v53, 4  ;;  %v1597_v4 = vrot.slane %v1481_v36, 5  ;;  %v1600_v63 = vrot.slane %v1482_v2, 5  ;;  %v1603_v0 = vrot.slane %v1483_v46, 5  ;;  %v6321_v28 = vld [vmem:[%s7851_s15 + $0x2c] sm:$0xf] }
  0xce   : > { %v8369_v59 = vsel %vm7943_vm6, %v1586_v58, %v1587_v56  ;;  %v1606_v8 = vrot.slane %v1484_v47, 5  ;;  %6871 = vmatmul.mubr.msk.bf16.vlgmr.msra.gmra.mrb[0].mxu1 %vm461_vm0, %v5992_v31  ;;  %v5996_v11 = vcombine.low %v8352_v52, %v8357_v54  ;;  %v8380_v13 = vsel %vm7943_vm6, %v1589_v6, %v1590_v53  ;;  %v6322_v31 = vld [vmem:[%s7851_s15 + $0x30] sm:$0xf]  ;;  %v6323_v47 = vld [vmem:[%s7851_s15 + $0x34] sm:$0xf]  ;;  %s9051_s29 = scalar_lea.vmem [#allocation4], %s5908_s8 }
  0xcf   : > { %v5997_v12 = vcombine.low %v8361_v57, %v8369_v59  ;;  %v8384_v14 = vsel %vm7943_vm6, %v1592_v50, %v1593_v61  ;;  %6874 = vmatprep.mubr.msk.bf16.mxu1 %vm461_vm0, %v5993_v7  ;;  %6903 = vmatpush3.bf16.msra.mxu1 %v8090_v29  ;;  %v8391_v16 = vsel %vm7943_vm6, %v5985_v3, %v1597_v4  ;;  %v1599_v17 = vrot.slane %v1597_v4, 4  ;;  %v7508_v6 = vld [vmem:[%s7851_s15 + $0x94] sm:$0xff]   ;;  %s5782_s17 = sshll.u32 %s9051_s29, 4  ;;  %s9103_s17 = int_to_ptr.vmem [resolvable:$true] %s5782_s17 }
  0xd0   : > { %v1602_v18 = vrot.slane %v1600_v63, 4  ;;  %v1605_v19 = vrot.slane %v1603_v0, 4  ;;  %v5986_v22 = vrot.slane %v1485_v62, 9  ;;  %v1610_v23 = vrot.slane %v1486_v21, 5  ;;  %7106 = vmatprep.subr.bf16.mxu1 %v8396_v55  ;;  %v6324_v62 = vld [vmem:[%s7851_s15 + $0x38] sm:$0x1] }
  0xd1   : > { %v1613_v24 = vrot.slane %v1487_v5, 5  ;;  %v1616_v25 = vrot.slane %v1488_v9, 5  ;;  %v5998_v29 = vcombine.low %v8380_v13, %v8384_v14  ;;  %v8403_v44 = vsel %vm7943_vm6, %v1599_v17, %v1600_v63  ;;  %v1490_v21 = vld [vmem:[%s7851_s15 + $0x78] sm:$0xe]  ;;  %v1491_v63 = vld [vmem:[%s7851_s15 + $0x7c] sm:$0xf] }
  0xd2   : > { %v8407_v45 = vsel %vm7943_vm6, %v1602_v18, %v1603_v0  ;;  %v8411_v27 = vsel %vm7943_vm6, %v1605_v19, %v1606_v8  ;;  %v5999_v33 = vcombine.low %v8391_v16, %v8403_v44  ;;  %v8419_v34 = vsel %vm7943_vm6, %v5986_v22, %v1610_v23  ;;  %v1492_v8 = vld [vmem:[%s7851_s15 + $0x80] sm:$0xf]  ;;  %v1493_v19 = vld [vmem:[%s7851_s15 + $0x84] sm:$0xf]  ;;  %s7531_s8 = scalar_lea.vmem %s9103_s17, 2048 }
  0xd3   : > { %v1612_v35 = vrot.slane %v1610_v23, 4  ;;  %v1619_v36 = vrot.slane %v1489_v20, 5  ;;  %v1615_v38 = vrot.slane %v1613_v24, 4  ;;  %v1618_v39 = vrot.slane %v1616_v25, 4  ;;  %v7509_v9 = vld [vmem:[%s7851_s15 + $0xa0] sm:$0xff]   ;;  %p7532_p6 = scmp.ne.s32.totalorder %s9103_s17, %s7531_s8 }
  0xd4   : > { %7023 = vmatmul.mubr.msk.bf16.gmra.mrb[16].mxu0 %vm461_vm0, %v7506_v10  ;;  %v4210_v40 = vshrl.u32 %v6320_v26, 16  ;;  %v4213_v1 = vshll.u32 %v6320_v26, 16  ;;  %v4219_v7 = vshll.u32 %v6321_v28, 16  ;;  %v4223_v43 = vshrl.u32 %v6321_v28, 16 }
  0xd5   : > { %7026 = vmatprep.mubr.msk.bf16.mxu0 %vm461_vm0, %v7507_v15  ;;  %v8425_v2 = vsel %vm7943_vm6, %v1612_v35, %v1613_v24  ;;  %v4229_v46 = vshll.u32 %v6322_v31, 16  ;;  %v6000_v56 = vcombine.low %v8407_v45, %v8411_v27  ;;  %v8434_v58 = vsel %vm7943_vm6, %v1615_v38, %v1616_v25  ;;  %p7533_p7 = pnand %p7532_p6, %p7773_p9 }
  0xd6   : > { %v6001_v53 = vcombine.low %v8419_v34, %v8425_v2  ;;  %v4212_v61 = vrot.slane %v4210_v40, 4  ;;  %6875 = vmatmul.mubr.msk.bf16.gmra.mrb[4].mxu1 %vm461_vm0, %v5994_v41  ;;  %v8445_v50 = vsel %vm7943_vm6, %v1618_v39, %v1619_v36  ;;  %v4215_v3 = vrot.slane %v4213_v1, 5  ;;  %v6338_v34 = vld [vmem:[%s7851_s15 + $0x70] sm:$0xf] }
  0xd7   : > { %v4221_v4 = vrot.slane %v4219_v7, 5  ;;  %v4225_v5 = vrot.slane %v4223_v43, 4  ;;  %6878 = vmatprep.mubr.msk.bf16.mxu1 %vm461_vm0, %v5995_v49  ;;  %v4231_v0 = vrot.slane %v4229_v46, 5  ;;  %v4233_v60 = vshrl.u32 %v6322_v31, 16  ;;  %v6325_v7 = vld [vmem:[%s7851_s15 + $0x3c] sm:$0xf]  ;;  %p7534_p8 = pneg %p7533_p7 }
  0xd8   : > { %v4239_v37 = vshll.u32 %v6323_v47, 16  ;;  %v4243_v41 = vshrl.u32 %v6323_v47, 16  ;;  %v4216_v10 = vor.u32 %v4215_v3, %v4212_v61  ;;  %v4249_v17 = vshll.u32 %v6324_v62, 16  ;;  %v7510_v43 = vld [vmem:[%s7851_s15 + $0xa8] sm:$0xff]   ;;  %v7511_v3 = vld [vmem:[%s7851_s15 + $0xb4] sm:$0xff]  }
  0xd9   : > { %v4226_v15 = vor.u32 %v4225_v5, %v4221_v4  ;;  %v5987_v18 = vrot.slane %v1490_v21, 9  ;;  %v4235_v20 = vrot.slane %v4233_v60, 4  ;;  %v1623_v24 = vrot.slane %v1491_v63, 5  ;;  %v6326_v21 = vld [vmem:[%s7851_s15 + $0x40] sm:$0xf] }
  0xda   : > { %v4241_v22 = vrot.slane %v4239_v37, 5  ;;  %v4245_v23 = vrot.slane %v4243_v41, 4  ;;  %v4217_v42 = vrot.slane %v4216_v10, 4  ;;  %v4251_v25 = vrot.slane %v4249_v17, 5  ;;  %v6328_v60 = vld [vmem:[%s7851_s15 + $0x48] sm:$0xf] }
  0xdb   : > { %v4227_v49 = vrot.slane %v4226_v15, 4  ;;  %v1626_v26 = vrot.slane %v1492_v8, 5  ;;  %v4236_v28 = vor.u32 %v4235_v20, %v4231_v0  ;;  %v8459_v35 = vsel %vm7943_vm6, %v5987_v18, %v1623_v24  ;;  %v6329_v37 = vld [vmem:[%s7851_s15 + $0x4c] sm:$0x1]  ;;  %v1495_v8 = vld [vmem:[%s7851_s15 + $0x8c] sm:$0xe] }
  0xdc   : > { %7027 = vmatmul.mubr.msk.bf16.gmra.mrb[20].mxu0 %vm461_vm0, %v7508_v6  ;;  %v4246_v31 = vor.u32 %v4245_v23, %v4241_v22  ;;  %v1625_v36 = vrot.slane %v1623_v24, 4  ;;  %v4222_v38 = vsel %vm7872_vm3, %v4217_v42, %v4221_v4  ;;  %v1629_v1 = vrot.slane %v1493_v19, 5  ;;  %v6327_v6 = vld [vmem:[%s7851_s15 + $0x44] sm:$0xf]  ;;  %v1496_v19 = vld [vmem:[%s7851_s15 + $0x90] sm:$0xf] }
  0xdd   : > { %7030 = vmatprep.mubr.msk.bf16.mxu0 %vm461_vm0, %v7509_v9  ;;  %v4232_v39 = vsel %vm7872_vm3, %v4227_v49, %v4231_v0  ;;  %v1628_v40 = vrot.slane %v1626_v26, 4  ;;  %v6002_v46 = vcombine.low %v8434_v58, %v8445_v50  ;;  %v4237_v47 = vrot.slane %v4236_v28, 4  ;;  %v1498_v28 = vld [vmem:[%s7851_s15 + $0x98] sm:$0xf] }
  0xde   : > { %v4247_v61 = vrot.slane %v4246_v31, 4  ;;  %v8472_v62 = vsel %vm7943_vm6, %v1625_v36, %v1626_v26  ;;  %6879 = vmatmul.mubr.msk.bf16.gmra.mrb[8].mxu1 %vm461_vm0, %v5996_v11  ;;  %v8481_v4 = vcombine.low %v4222_v38, %v4232_v39  ;;  %v1631_v63 = vrot.slane %v1629_v1, 4 }
  0xdf   : > { %v6003_v5 = vcombine.low %v8459_v35, %v8472_v62  ;;  %v1632_v0 = vrot.slane %v1494_v32, 5  ;;  %6882 = vmatprep.mubr.msk.bf16.mxu1 %vm461_vm0, %v5997_v12  ;;  %v4242_v52 = vsel %vm7872_vm3, %v4237_v47, %v4241_v22  ;;  %v4254_v11 = vshrl.u32 %v6325_v7, 16  ;;  %v1497_v32 = vld [vmem:[%s7851_s15 + $0x94] sm:$0xf]  ;;  %v6343_v35 = vld [vmem:[%s7851_s15 + $0x84] sm:$0xf] }
  0xe0   : > { %v4252_v54 = vsel %vm7872_vm3, %v4247_v61, %v4251_v25  ;;  %v4257_v41 = vshll.u32 %v6325_v7, 16  ;;  %v8500_v10 = vsel %vm7943_vm6, %v1628_v40, %v1629_v1  ;;  %v4263_v15 = vshll.u32 %v6326_v21, 16  ;;  %v1499_v40 = vld [vmem:[%s7851_s15 + $0x9c] sm:$0x1] }
  0xe1   : > { %v8496_v9 = vcombine.low %v4242_v52, %v4252_v54  ;;  %v4267_v57 = vshrl.u32 %v6326_v21, 16  ;;  %v8504_v59 = vsel %vm7943_vm6, %v1631_v63, %v1632_v0  ;;  %v4256_v12 = vrot.slane %v4254_v11, 4  ;;  %v6331_v0 = vld [vmem:[%s7851_s15 + $0x54] sm:$0xf] }
  0xe2   : > { %v4259_v17 = vrot.slane %v4257_v41, 5  ;;  %v4273_v18 = vshll.u32 %v6327_v6, 16  ;;  %v4265_v20 = vrot.slane %v4263_v15, 5  ;;  %v4277_v23 = vshrl.u32 %v6327_v6, 16  ;;  %v6332_v15 = vld [vmem:[%s7851_s15 + $0x58] sm:$0xf] }
  0xe3   : > { %v4269_v22 = vrot.slane %v4267_v57, 4  ;;  %v4283_v24 = vshll.u32 %v6328_v60, 16  ;;  %v4287_v25 = vshrl.u32 %v6328_v60, 16  ;;  %v4293_v26 = vshll.u32 %v6329_v37, 16  ;;  %v7512_v60 = vld [vmem:[%s7851_s15 + $0xbc] sm:$0xff]  }
  0xe4   : > { %7031 = vmatmul.mubr.msk.bf16.gmra.mrb[24].mxu0 %vm461_vm0, %v7510_v43  ;;  %v4260_v42 = vor.u32 %v4259_v17, %v4256_v12  ;;  %v4275_v49 = vrot.slane %v4273_v18, 5  ;;  %v4279_v36 = vrot.slane %v4277_v23, 4  ;;  %v5988_v39 = vrot.slane %v1495_v8, 9  ;;  %v6330_v43 = vld [vmem:[%s7851_s15 + $0x50] sm:$0xf] }
  0xe5   : > { %7034 = vmatprep.mubr.msk.bf16.mxu0 %vm461_vm0, %v7511_v3  ;;  %v4270_v31 = vor.u32 %v4269_v22, %v4265_v20  ;;  %v4285_v38 = vrot.slane %v4283_v24, 5  ;;  %v4289_v7 = vrot.slane %v4287_v25, 4  ;;  %v4295_v47 = vrot.slane %v4293_v26, 5 }
  0xe6   : > { %v4261_v1 = vrot.slane %v4260_v42, 4  ;;  %v1636_v61 = vrot.slane %v1496_v19, 5  ;;  %6883 = vmatmul.mubr.msk.bf16.gmra.mrb[12].mxu1 %vm461_vm0, %v5998_v29  ;;  %v4280_v6 = vor.u32 %v4279_v36, %v4275_v49  ;;  %v1639_v3 = vrot.slane %v1497_v32, 5  ;;  %v6333_v19 = vld [vmem:[%s7851_s15 + $0x5c] sm:$0xf] }
  0xe7   : > { %v4271_v21 = vrot.slane %v4270_v31, 4  ;;  %v1642_v63 = vrot.slane %v1498_v28, 5  ;;  %6886 = vmatprep.mubr.msk.bf16.mxu1 %vm461_vm0, %v5999_v33  ;;  %v4290_v52 = vor.u32 %v4289_v7, %v4285_v38  ;;  %v6004_v44 = vcombine.low %v8500_v10, %v8504_v59  ;;  %v6335_v42 = vld [vmem:[%s7851_s15 + $0x64] sm:$0xf]  ;;  %v6346_v59 = vld [vmem:[%s7851_s15 + $0x90] sm:$0xf] }
  0xe8   : > { %v4266_v37 = vsel %vm7872_vm3, %v4261_v1, %v4265_v20  ;;  %v8527_v13 = vsel %vm7943_vm6, %v5988_v39, %v1636_v61  ;;  %v1638_v14 = vrot.slane %v1636_v61, 4  ;;  %v4281_v54 = vrot.slane %v4280_v6, 4  ;;  %v6334_v20 = vld [vmem:[%s7851_s15 + $0x60] sm:$0x1] }
  0xe9   : > { %v4276_v29 = vsel %vm7872_vm3, %v4271_v21, %v4275_v49  ;;  %v1641_v11 = vrot.slane %v1639_v3, 4  ;;  %v1644_v16 = vrot.slane %v1642_v63, 4  ;;  %v4291_v33 = vrot.slane %v4290_v52, 4  ;;  %v6336_v21 = vld [vmem:[%s7851_s15 + $0x68] sm:$0xf] }
  0xea   : > { %v8535_v41 = vsel %vm7943_vm6, %v1638_v14, %v1639_v3  ;;  %v1645_v8 = vrot.slane %v1499_v40, 5  ;;  %v6364_v57 = vcombine.low %v4266_v37, %v4276_v29  ;;  %v4286_v12 = vsel %vm7872_vm3, %v4281_v54, %v4285_v38  ;;  %v6339_v54 = vld [vmem:[%s7851_s15 + $0x74] sm:$0x1] }
  0xeb   : > { %v6005_v17 = vcombine.low %v8527_v13, %v8535_v41  ;;  %v4298_v18 = vshrl.u32 %v6330_v43, 16  ;;  %v4296_v22 = vsel %vm7872_vm3, %v4291_v33, %v4295_v47  ;;  %v8549_v23 = vsel %vm7943_vm6, %v1641_v11, %v1642_v63  ;;  %v6337_v63 = vld [vmem:[%s7851_s15 + $0x6c] sm:$0xf]  ;;  %v6347_v13 = vld [vmem:[%s7851_s15 + $0x94] sm:$0xf] }
  0xec   : > { %7035 = vmatmul.mubr.msk.bf16.gmra.mrb[28].mxu0 %vm461_vm0, %v7512_v60  ;;  %v4301_v24 = vshll.u32 %v6330_v43, 16  ;;  %v4307_v32 = vshll.u32 %v6331_v0, 16  ;;  %v8554_v49 = vcombine.low %v4286_v12, %v4296_v22  ;;  %v8558_v25 = vsel %vm7943_vm6, %v1644_v16, %v1645_v8 }
  0xed   : > { %7040 = vmatprep.mubr.msk.bf16.mxu0 %vm461_vm0, %v8481_v4  ;;  %v4300_v26 = vrot.slane %v4298_v18, 4  ;;  %v4311_v28 = vshrl.u32 %v6331_v0, 16  ;;  %v4317_v38 = vshll.u32 %v6332_v15, 16  ;;  %v4321_v39 = vshrl.u32 %v6332_v15, 16  ;;  %v6340_v15 = vld [vmem:[%s7851_s15 + $0x78] sm:$0xf] }
  0xee   : > { %v4303_v31 = vrot.slane %v4301_v24, 5  ;;  %v4309_v36 = vrot.slane %v4307_v32, 5  ;;  %6887 = vmatmul.mubr.msk.bf16.gmra.mrb[16].mxu1 %vm461_vm0, %v6000_v56  ;;  %v4327_v40 = vshll.u32 %v6333_v19, 16  ;;  %v4331_v1 = vshrl.u32 %v6333_v19, 16 }
  0xef   : > { %v4313_v4 = vrot.slane %v4311_v28, 4  ;;  %v4337_v7 = vshll.u32 %v6334_v20, 16  ;;  %6890 = vmatprep.mubr.msk.bf16.mxu1 %vm461_vm0, %v6001_v53  ;;  %v4319_v61 = vrot.slane %v4317_v38, 5  ;;  %v4323_v43 = vrot.slane %v4321_v39, 4  ;;  %v6341_v39 = vld [vmem:[%s7851_s15 + $0x7c] sm:$0xf] }
  0xf0   : > { %v4304_v47 = vor.u32 %v4303_v31, %v4300_v26  ;;  %v4342_v6 = vshrl.u32 %v6335_v42, 16  ;;  %v4329_v27 = vrot.slane %v4327_v40, 5  ;;  %v4333_v3 = vrot.slane %v4331_v1, 4 }
  0xf1   : > { %v4314_v45 = vor.u32 %v4313_v4, %v4309_v36  ;;  %v4339_v56 = vrot.slane %v4337_v7, 5  ;;  %v4324_v60 = vor.u32 %v4323_v43, %v4319_v61  ;;  %v4345_v52 = vshll.u32 %v6335_v42, 16  ;;  %v6342_v4 = vld [vmem:[%s7851_s15 + $0x80] sm:$0xf] }
  0xf2   : > { %v4305_v0 = vrot.slane %v4304_v47, 4  ;;  %v4344_v37 = vrot.slane %v4342_v6, 4  ;;  %v4334_v14 = vor.u32 %v4333_v3, %v4329_v27  ;;  %v4351_v53 = vshll.u32 %v6336_v21, 16 }
  0xf3   : > { %v4315_v2 = vrot.slane %v4314_v45, 4  ;;  %v4355_v29 = vshrl.u32 %v6336_v21, 16  ;;  %v4325_v16 = vrot.slane %v4324_v60, 4  ;;  %v4347_v33 = vrot.slane %v4345_v52, 5 }
  0xf4   : > { %7041 = vmatmul.mubr.msk.bf16.vlgmr.msra.gmra.mrb[0].mxu0 %vm461_vm0, %v8496_v9  ;;  %v4310_v11 = vsel %vm7872_vm3, %v4305_v0, %v4309_v36  ;;  %v4361_v8 = vshll.u32 %v6337_v63, 16  ;;  %v4335_v18 = vrot.slane %v4334_v14, 4  ;;  %v4353_v19 = vrot.slane %v4351_v53, 5 }
  0xf5   : > { %7073 = vmatpush3.bf16.msra.mxu0 %v8237_v30  ;;  %7044 = vmatprep.mubr.msk.bf16.mxu0 %vm461_vm0, %v6364_v57  ;;  %v4320_v12 = vsel %vm7872_vm3, %v4315_v2, %v4319_v61  ;;  %v4357_v20 = vrot.slane %v4355_v29, 4  ;;  %v6006_v9 = vcombine.low %v8549_v23, %v8558_v25  ;;  %v4330_v22 = vsel %vm7872_vm3, %v4325_v16, %v4329_v27  ;;  %v6344_v2 = vld [vmem:[%s7851_s15 + $0x88] sm:$0x1] }
  0xf6   : > { %v4348_v24 = vor.u32 %v4347_v33, %v4344_v37  ;;  %v4363_v32 = vrot.slane %v4361_v8, 5  ;;  %6891 = vmatmul.mubr.msk.bf16.gmra.mrb[20].mxu1 %vm461_vm0, %v6002_v46  ;;  %v4340_v30 = vsel %vm7872_vm3, %v4335_v18, %v4339_v56  ;;  %v4365_v42 = vshrl.u32 %v6337_v63, 16 }
  0xf7   : > { %v4358_v57 = vor.u32 %v4357_v20, %v4353_v19  ;;  %v4371_v26 = vshll.u32 %v6338_v34, 16  ;;  %6894 = vmatprep.mubr.msk.bf16.mxu1 %vm461_vm0, %v6003_v5  ;;  %v6366_v28 = vcombine.low %v4310_v11, %v4320_v12  ;;  %v4375_v36 = vshrl.u32 %v6338_v34, 16  ;;  %v6345_v11 = vld [vmem:[%s7851_s15 + $0x8c] sm:$0xf] }
  0xf8   : > { %v4349_v31 = vrot.slane %v4348_v24, 4  ;;  %v4381_v38 = vshll.u32 %v6339_v54, 16  ;;  %v4367_v50 = vrot.slane %v4365_v42, 4  ;;  %v4386_v40 = vshrl.u32 %v6340_v15, 16 }
  0xf9   : > { %v4359_v58 = vrot.slane %v4358_v57, 4  ;;  %v8596_v46 = vrot.slane %v4371_v26, 5  ;;  %v6367_v1 = vcombine.low %v4330_v22, %v4340_v30  ;;  %v4377_v7 = vrot.slane %v4375_v36, 4  ;;  %v7514_v57 = vld [vmem:[%s7851_s15 + $0x14] sm:$0xff]  }
  0xfa   : > { %v8599_v47 = vrot.slane %v4381_v38, 5  ;;  %v4389_v61 = vshll.u32 %v6340_v15, 16  ;;  %v4354_v62 = vsel %vm7872_vm3, %v4349_v31, %v4353_v19  ;;  %v4368_v5 = vor.u32 %v4367_v50, %v4363_v32  ;;  %v6348_v36 = vld [vmem:[%s7851_s15 + $0x98] sm:$0xf] }
  0xfb   : > { %v4388_v43 = vrot.slane %v4386_v40, 4  ;;  %v4395_v21 = vshll.u32 %v6341_v39, 16  ;;  %v4364_v6 = vsel %vm7872_vm3, %v4359_v58, %v4363_v32  ;;  %v4378_v45 = vor.u32 %v4377_v7, %v8596_v46  ;;  %v6349_v58 = vld [vmem:[%s7851_s15 + $0x9c] sm:$0x1] }
  0xfc   : > { %7045 = vmatmul.mubr.msk.bf16.gmra.mrb[4].mxu0 %vm461_vm0, %v8554_v49  ;;  %v4391_v27 = vrot.slane %v4389_v61, 5  ;;  %v4399_v3 = vshrl.u32 %v6341_v39, 16  ;;  %v4369_v56 = vrot.slane %v4368_v5, 4  ;;  %v4405_v0 = vshll.u32 %v6342_v4, 16  ;;  %v6352_v5 = vld [vmem:[%s7851_s15 + $0xa8] sm:$0xf] }
  0xfd   : > { %7048 = vmatprep.mubr.msk.bf16.mxu0 %vm461_vm0, %v6366_v28  ;;  %v4397_v63 = vrot.slane %v4395_v21, 5  ;;  %v4409_v60 = vshrl.u32 %v6342_v4, 16  ;;  %v4379_v37 = vrot.slane %v4378_v45, 4  ;;  %v4415_v49 = vshll.u32 %v6343_v35, 16 }
  0xfe   : > { %v4392_v52 = vor.u32 %v4391_v27, %v4388_v43  ;;  %v4401_v34 = vrot.slane %v4399_v3, 4  ;;  %6895 = vmatmul.mubr.msk.bf16.gmra.mrb[24].mxu1 %vm461_vm0, %v6004_v44  ;;  %v6368_v14 = vcombine.low %v4354_v62, %v4364_v6  ;;  %v4407_v53 = vrot.slane %v4405_v0, 5  ;;  %v6351_v62 = vld [vmem:[%s7851_s15 + $0xa4] sm:$0xf] }
  0xff   : > { %v4411_v29 = vrot.slane %v4409_v60, 4  ;;  %v4419_v54 = vshrl.u32 %v6343_v35, 16  ;;  %6898 = vmatprep.mubr.msk.bf16.mxu1 %vm461_vm0, %v6005_v17  ;;  %v4374_v16 = vsel %vm7872_vm3, %v4369_v56, %v8596_v46  ;;  %v8623_v10 = vrot.slane %v4415_v49, 5  ;;  %v7515_v60 = vld [vmem:[%s7851_s15 + $0x1c] sm:$0xff]   ;;  %v7516_v49 = vld [vmem:[%s7851_s15 + $0x28] sm:$0xff]  }
 0x100   : > { %v4393_v33 = vrot.slane %v4392_v52, 4  ;;  %v4402_v8 = vor.u32 %v4401_v34, %v4397_v63  ;;  %v4384_v44 = vsel %vm7872_vm3, %v4379_v37, %v8599_v47  ;;  %v4425_v18 = vshll.u32 %v6344_v2, 16 }
 0x101   : > { %v4412_v15 = vor.u32 %v4411_v29, %v4407_v53  ;;  %v4421_v12 = vrot.slane %v4419_v54, 4  ;;  %v4430_v19 = vshrl.u32 %v6345_v11, 16  ;;  %v4433_v20 = vshll.u32 %v6345_v11, 16  ;;  %v6353_v54 = vld [vmem:[%s7851_s15 + $0xac] sm:$0xf] }
 0x102   : > { %v4398_v41 = vsel %vm7872_vm3, %v4393_v33, %v4397_v63  ;;  %v4403_v17 = vrot.slane %v4402_v8, 4  ;;  %v4427_v32 = vrot.slane %v4425_v18, 5  ;;  %v4439_v30 = vshll.u32 %v6346_v59, 16 }
 0x103   : > { %v4413_v22 = vrot.slane %v4412_v15, 4  ;;  %v4422_v24 = vor.u32 %v4421_v12, %v8623_v10  ;;  %v4432_v26 = vrot.slane %v4430_v19, 4  ;;  %v4435_v28 = vrot.slane %v4433_v20, 5  ;;  %v6355_v12 = vld [vmem:[%s7851_s15 + $0xb4] sm:$0xf] }
 0x104   : > { %7049 = vmatmul.mubr.msk.bf16.gmra.mrb[8].mxu0 %vm461_vm0, %v6367_v1  ;;  %v4408_v42 = vsel %vm7872_vm3, %v4403_v17, %v4407_v53  ;;  %v4443_v31 = vshrl.u32 %v6346_v59, 16  ;;  %v4441_v39 = vrot.slane %v4439_v30, 5  ;;  %v4449_v4 = vshll.u32 %v6347_v13, 16  ;;  %v6350_v1 = vld [vmem:[%s7851_s15 + $0xa0] sm:$0xf] }
 0x105   : > { %7052 = vmatprep.mubr.msk.bf16.mxu0 %vm461_vm0, %v6368_v14  ;;  %v4423_v38 = vrot.slane %v4422_v24, 4  ;;  %v4436_v50 = vor.u32 %v4435_v28, %v4432_v26  ;;  %v4453_v40 = vshrl.u32 %v6347_v13, 16  ;;  %v6369_v7 = vcombine.low %v4374_v16, %v4384_v44 }
 0x106   : > { %v4445_v46 = vrot.slane %v4443_v31, 4  ;;  %6899 = vmatmul.mubr.msk.bf16.gmra.mrb[28].mxu1 %vm461_vm0, %v6006_v9  ;;  %v6370_v47 = vcombine.low %v4398_v41, %v4408_v42  ;;  %v4459_v61 = vshll.u32 %v6348_v36, 16  ;;  %v4463_v35 = vshrl.u32 %v6348_v36, 16  ;;  %v6357_v36 = vld [vmem:[%s7851_s15 + $0xbc] sm:$0xf] }
 0x107   : > { %6904 = vmatprep.mubr.msk.bf16.mxu1 %vm461_vm0, %v7514_v57  ;;  %v4418_v43 = vsel %vm7872_vm3, %v4413_v22, %v8623_v10  ;;  %v4428_v21 = vsel %vm7872_vm3, %v4423_v38, %v4427_v32  ;;  %v4451_v23 = vrot.slane %v4449_v4, 5  ;;  %v4437_v25 = vrot.slane %v4436_v50, 4  ;;  %v6356_v32 = vld [vmem:[%s7851_s15 + $0xb8] sm:$0xf]  ;;  %v6354_v57 = vld [vmem:[%s7851_s15 + $0xb0] sm:$0x1] }
 0x108   : > { %v4446_v6 = vor.u32 %v4445_v46, %v4441_v39  ;;  %v4455_v9 = vrot.slane %v4453_v40, 4  ;;  %v8653_v45 = vrot.slane %v4459_v61, 5  ;;  %v4465_v27 = vrot.slane %v4463_v35, 4  ;;  %v7518_v4 = vld [vmem:[%s7851_s15 + $0x3c] sm:$0xff]  }
 0x109   : > { %v4469_v56 = vshll.u32 %v6349_v58, 16  ;;  %v4474_v63 = vshrl.u32 %v6350_v1, 16  ;;  %v4477_v0 = vshll.u32 %v6350_v1, 16  ;;  %v4483_v34 = vshll.u32 %v6351_v62, 16  ;;  %v6358_v61 = vld [vmem:[%s7851_s15 + $0xc0] sm:$0xf] }
 0x10a   : > { %v4447_v3 = vrot.slane %v4446_v6, 4  ;;  %v4456_v37 = vor.u32 %v4455_v9, %v4451_v23  ;;  %v4466_v52 = vor.u32 %v4465_v27, %v8653_v45  ;;  %v4487_v2 = vshrl.u32 %v6351_v62, 16 }
 0x10b   : > { %v4476_v14 = vrot.slane %v4474_v63, 4  ;;  %v4479_v53 = vrot.slane %v4477_v0, 5  ;;  %v4493_v29 = vshll.u32 %v6352_v5, 16  ;;  %v6371_v11 = vcombine.low %v4418_v43, %v4428_v21 }
 0x10c   : > { %7053 = vmatmul.mubr.msk.bf16.gmra.mrb[12].mxu0 %vm461_vm0, %v6369_v7  ;;  %v4442_v16 = vsel %vm7872_vm3, %v4437_v25, %v4441_v39  ;;  %v4452_v33 = vsel %vm7872_vm3, %v4447_v3, %v4451_v23  ;;  %v4485_v8 = vrot.slane %v4483_v34, 5  ;;  %v4471_v10 = vrot.slane %v4469_v56, 5  ;;  %v7517_v39 = vld [vmem:[%s7851_s15 + $0x30] sm:$0xff]  }
 0x10d   : > { %7056 = vmatprep.mubr.msk.bf16.mxu0 %vm461_vm0, %v6370_v47  ;;  %v4480_v59 = vor.u32 %v4479_v53, %v4476_v14  ;;  %v4489_v44 = vrot.slane %v4487_v2, 4  ;;  %v4497_v15 = vshrl.u32 %v6352_v5, 16  ;;  %v4457_v18 = vrot.slane %v4456_v37, 4  ;;  %v6396_v37 = vld [vmem:[%s7851_s15 + $0x2c] sm:$0xf] }
 0x10e   : > { %6905 = vmatmul.mubr.msk.bf16.vlgmr.msra.gmra.mrb[0].mxu1 %vm461_vm0, %v7515_v60  ;;  %v4467_v13 = vrot.slane %v4466_v52, 4  ;;  %v4503_v41 = vshll.u32 %v6353_v54, 16  ;;  %v4507_v17 = vshrl.u32 %v6353_v54, 16  ;;  %v6372_v19 = vcombine.low %v4442_v16, %v4452_v33  ;;  %v6359_v2 = vld [vmem:[%s7851_s15 + $0xc4] sm:$0x1]  ;;  %v7520_v33 = vld [vmem:[%s7851_s15 + $0x50] sm:$0xff]  }
 0x10f   : > { %6908 = vmatprep.mubr.msk.bf16.mxu1 %vm461_vm0, %v7516_v49  ;;  %7107 = vmatpush3.bf16.msra.mxu1 %v8396_v55  ;;  %v4490_v20 = vor.u32 %v4489_v44, %v4485_v8  ;;  %v4495_v22 = vrot.slane %v4493_v29, 5  ;;  %v4499_v24 = vrot.slane %v4497_v15, 4  ;;  %v4481_v30 = vrot.slane %v4480_v59, 4  ;;  %v7519_v54 = vld [vmem:[%s7851_s15 + $0x44] sm:$0xff]   ;;  %v6397_v44 = vld [vmem:[%s7851_s15 + $0x30] sm:$0xf] }
 0x110   : > { %v8671_v42 = vrot.slane %v4503_v41, 5  ;;  %v4509_v26 = vrot.slane %v4507_v17, 4  ;;  %v4518_v28 = vshrl.u32 %v6355_v12, 16  ;;  %v4521_v38 = vshll.u32 %v6355_v12, 16  ;;  %v6395_v59 = vld [vmem:[%s7851_s15 + $0x28] sm:$0xe] }
 0x111   : > { %v4491_v31 = vrot.slane %v4490_v20, 4  ;;  %v4462_v55 = vsel %vm7872_vm3, %v4457_v18, %v8653_v45  ;;  %v4472_v58 = vsel %vm7872_vm3, %v4467_v13, %v4471_v10  ;;  %v4527_v46 = vshll.u32 %v6356_v32, 16  ;;  %v8712_v41 = vld [vmem:[%s7851_s15 + $0x34] sm:$0xf] }
 0x112   : > { %v4520_v50 = vrot.slane %v4518_v28, 4  ;;  %v4500_v40 = vor.u32 %v4499_v24, %v4495_v22  ;;  %v4513_v1 = vshll.u32 %v6354_v57, 16  ;;  %v4523_v7 = vrot.slane %v4521_v38, 5  ;;  %v8717_v57 = vld [vmem:[%s7851_s15 + $0x38] sm:$0x1] }
 0x113   : > { %v4531_v47 = vshrl.u32 %v6356_v32, 16  ;;  %v4486_v35 = vsel %vm7872_vm3, %v4481_v30, %v4485_v8  ;;  %v4510_v62 = vor.u32 %v4509_v26, %v8671_v42  ;;  %v4529_v5 = vrot.slane %v4527_v46, 5  ;;  %v6400_v38 = vld [vmem:[%s7851_s15 + $0x3c] sm:$0xe] }
 0x114   : > { %7057 = vmatmul.mubr.msk.bf16.gmra.mrb[16].mxu0 %vm461_vm0, %v6371_v11  ;;  %v4537_v43 = vshll.u32 %v6357_v36, 16  ;;  %v4496_v21 = vsel %vm7872_vm3, %v4491_v31, %v4495_v22  ;;  %v4524_v6 = vor.u32 %v4523_v7, %v4520_v50  ;;  %v4541_v25 = vshrl.u32 %v6357_v36, 16  ;;  %v6402_v31 = vld [vmem:[%s7851_s15 + $0x44] sm:$0xf]  ;;  %v6403_v36 = vld [vmem:[%s7851_s15 + $0x48] sm:$0xf] }
 0x115   : > { %7060 = vmatprep.mubr.msk.bf16.mxu0 %vm461_vm0, %v6372_v19  ;;  %v4533_v23 = vrot.slane %v4531_v47, 4  ;;  %v6373_v9 = vcombine.low %v4462_v55, %v4472_v58  ;;  %v4547_v27 = vshll.u32 %v6358_v61, 16  ;;  %v4551_v3 = vshrl.u32 %v6358_v61, 16  ;;  %v8730_v55 = vld [vmem:[%s7851_s15 + $0x58] sm:$0xf]  ;;  %v7522_v47 = vld [vmem:[%s7851_s15 + $0x64] sm:$0xff]  }
 0x116   : > { %6909 = vmatmul.mubr.msk.bf16.gmra.mrb[4].mxu1 %vm461_vm0, %v7517_v39  ;;  %v4539_v45 = vrot.slane %v4537_v43, 5  ;;  %v4501_v56 = vrot.slane %v4500_v40, 4  ;;  %v4515_v63 = vrot.slane %v4513_v1, 5  ;;  %v4543_v60 = vrot.slane %v4541_v25, 4  ;;  %v8727_v39 = vld [vmem:[%s7851_s15 + $0x54] sm:$0xf] }
 0x117   : > { %6912 = vmatprep.mubr.msk.bf16.mxu1 %vm461_vm0, %v7518_v4  ;;  %v4534_v0 = vor.u32 %v4533_v23, %v4529_v5  ;;  %v6374_v52 = vcombine.low %v4486_v35, %v4496_v21  ;;  %v4511_v34 = vrot.slane %v4510_v62, 4  ;;  %v8693_v49 = vrot.slane %v4547_v27, 5  ;;  %v7521_v58 = vld [vmem:[%s7851_s15 + $0x58] sm:$0xff]   ;;  %v6113_v1 = vld [vmem:[%s7851_s15 + $0x64] sm:$0xf] }
 0x118   : > { %v4553_v14 = vrot.slane %v4551_v3, 4  ;;  %v4525_v53 = vrot.slane %v4524_v6, 4  ;;  %v4544_v11 = vor.u32 %v4543_v60, %v4539_v45  ;;  %v5005_v16 = vrot.slane %v6396_v37, 5  ;;  %v6114_v7 = vld [vmem:[%s7851_s15 + $0x68] sm:$0xf] }
 0x119   : > { %v4535_v29 = vrot.slane %v4534_v0, 4  ;;  %v4557_v10 = vshll.u32 %v6359_v2, 16  ;;  %v4506_v15 = vsel %vm7872_vm3, %v4501_v56, %v8671_v42  ;;  %v4516_v12 = vsel %vm7872_vm3, %v4511_v34, %v4515_v63  ;;  %v8720_v42 = vld [vmem:[%s7851_s15 + $0x40] sm:$0xf]  ;;  %v6408_v43 = vld [vmem:[%s7851_s15 + $0x5c] sm:$0xf] }
 0x11a   : > { %v4554_v8 = vor.u32 %v4553_v14, %v8693_v49  ;;  %v4530_v18 = vsel %vm7872_vm3, %v4525_v53, %v4529_v5  ;;  %v4545_v17 = vrot.slane %v4544_v11, 4  ;;  %v6435_v19 = vrot.slane %v6395_v59, 9  ;;  %v6404_v23 = vld [vmem:[%s7851_s15 + $0x4c] sm:$0x1] }
 0x11b   : > { %v4540_v13 = vsel %vm7872_vm3, %v4535_v29, %v4539_v45  ;;  %v5007_v20 = vrot.slane %v5005_v16, 4  ;;  %v5008_v22 = vrot.slane %v6397_v44, 5  ;;  %v6375_v24 = vcombine.low %v4506_v15, %v4516_v12  ;;  %v6405_v45 = vld [vmem:[%s7851_s15 + $0x50] sm:$0xe]  ;;  %v6115_v29 = vld [vmem:[%s7851_s15 + $0x6c] sm:$0xf] }
 0x11c   : > { %7061 = vmatmul.mubr.msk.bf16.gmra.mrb[20].mxu0 %vm461_vm0, %v6373_v9  ;;  %v4555_v32 = vrot.slane %v4554_v8, 4  ;;  %v4559_v30 = vrot.slane %v4557_v10, 5  ;;  %v6376_v26 = vcombine.low %v4530_v18, %v4540_v13  ;;  %v5011_v28 = vrot.slane %v8712_v41, 5  ;;  %v7523_v8 = vld [vmem:[%s7851_s15 + $0x6c] sm:$0xff]  }
 0x11d   : > { %7064 = vmatprep.mubr.msk.bf16.mxu0 %vm461_vm0, %v6374_v52  ;;  %v4550_v50 = vsel %vm7872_vm3, %v4545_v17, %v8693_v49  ;;  %v5006_v46 = vsel %vm7943_vm6, %v6435_v19, %v5005_v16  ;;  %v5009_v4 = vsel %vm7943_vm6, %v5007_v20, %v5008_v22  ;;  %v5010_v40 = vrot.slane %v5008_v22, 4  ;;  %v6409_v52 = vld [vmem:[%s7851_s15 + $0x60] sm:$0x1]  ;;  %v6116_v17 = vld [vmem:[%s7851_s15 + $0x70] sm:$0xf]  ;;  %v7524_v19 = vld [vmem:[%s7851_s15 + $0x78] sm:$0xff]  }
 0x11e   : > { %6913 = vmatmul.mubr.msk.bf16.gmra.mrb[8].mxu1 %vm461_vm0, %v7519_v54  ;;  %v4560_v61 = vsel %vm7872_vm3, %v4555_v32, %v4559_v30  ;;  %v5018_v35 = vrot.slane %v8720_v42, 5  ;;  %v5021_v62 = vrot.slane %v6402_v31, 5  ;;  %v5024_v5 = vrot.slane %v6403_v36, 5  ;;  %v6411_v30 = vld [vmem:[%s7851_s15 + $0x68] sm:$0xf] }
 0x11f   : > { %6916 = vmatprep.mubr.msk.bf16.mxu1 %vm461_vm0, %v7520_v33  ;;  %v5013_v21 = vrot.slane %v5011_v28, 4  ;;  %v5014_v6 = vrot.slane %v8717_v57, 5  ;;  %v5031_v25 = vrot.slane %v8727_v39, 5  ;;  %v5034_v9 = vrot.slane %v8730_v55, 5 }
 0x120   : > { %v2656_v27 = vshrl.u32 %v6113_v1, 16  ;;  %v2659_v3 = vshll.u32 %v6113_v1, 16  ;;  %v2665_v56 = vshll.u32 %v6114_v7, 16  ;;  %v2669_v63 = vshrl.u32 %v6114_v7, 16  ;;  %v6410_v7 = vld [vmem:[%s7851_s15 + $0x64] sm:$0xe] }
 0x121   : > { %v6377_v0 = vcombine.low %v4550_v50, %v4560_v61  ;;  %v6445_v60 = vcombine.low %v5006_v46, %v5009_v4  ;;  %v6436_v37 = vrot.slane %v6400_v38, 9  ;;  %v5037_v34 = vrot.slane %v6408_v43, 5  ;;  %v6117_v38 = vld [vmem:[%s7851_s15 + $0x74] sm:$0x1]  ;;  %v6118_v43 = vld [vmem:[%s7851_s15 + $0x78] sm:$0xf] }
 0x122   : > { %v5020_v2 = vrot.slane %v5018_v35, 4  ;;  %v5023_v49 = vrot.slane %v5021_v62, 4  ;;  %v5026_v14 = vrot.slane %v5024_v5, 4  ;;  %v5027_v53 = vrot.slane %v6404_v23, 5 }
 0x123   : > { %v6437_v54 = vrot.slane %v6405_v45, 9  ;;  %v5033_v11 = vrot.slane %v5031_v25, 4  ;;  %v2658_v16 = vrot.slane %v2656_v27, 4  ;;  %v2661_v33 = vrot.slane %v2659_v3, 5  ;;  %v6120_v27 = vld [vmem:[%s7851_s15 + $0x80] sm:$0xf] }
 0x124   : > { %7065 = vmatmul.mubr.msk.bf16.gmra.mrb[24].mxu0 %vm461_vm0, %v6375_v24  ;;  %v5012_v10 = vsel %vm7943_vm6, %v5010_v40, %v5011_v28  ;;  %v5036_v59 = vrot.slane %v5034_v9, 4  ;;  %v8761_v44 = vrot.slane %v2665_v56, 5  ;;  %v2671_v15 = vrot.slane %v2669_v63, 4  ;;  %v7526_v3 = vld [vmem:[%s7851_s15 + $0x8c] sm:$0xff]  }
 0x125   : > { %7068 = vmatprep.mubr.msk.bf16.mxu0 %vm461_vm0, %v6376_v26  ;;  %v5039_v12 = vrot.slane %v5037_v34, 4  ;;  %v5040_v18 = vrot.slane %v6409_v52, 5  ;;  %v2675_v13 = vshll.u32 %v6115_v29, 16  ;;  %v2679_v41 = vshrl.u32 %v6115_v29, 16  ;;  %v8820_v52 = vld [vmem:[%s7851_s15 + $0x70] sm:$0xf] }
 0x126   : > { %6917 = vmatmul.mubr.msk.bf16.gmra.mrb[12].mxu1 %vm461_vm0, %v7521_v58  ;;  %v5015_v20 = vsel %vm7943_vm6, %v5013_v21, %v5014_v6  ;;  %v5019_v22 = vsel %vm7943_vm6, %v6436_v37, %v5018_v35  ;;  %v5022_v24 = vsel %vm7943_vm6, %v5020_v2, %v5021_v62  ;;  %v8774_v32 = vsel %vm7943_vm6, %v5023_v49, %v5024_v5  ;;  %v6119_v21 = vld [vmem:[%s7851_s15 + $0x7c] sm:$0xf]  ;;  %v7525_v6 = vld [vmem:[%s7851_s15 + $0x80] sm:$0xff]  }
 0x127   : > { %6920 = vmatprep.mubr.msk.bf16.mxu1 %vm461_vm0, %v7522_v47  ;;  %v8780_v57 = vsel %vm7943_vm6, %v5026_v14, %v5027_v53  ;;  %v8784_v42 = vsel %vm7943_vm6, %v6437_v54, %v5031_v25  ;;  %v8788_v26 = vsel %vm7943_vm6, %v5033_v11, %v5034_v9  ;;  %v2662_v28 = vor.u32 %v2661_v33, %v2658_v16  ;;  %v6412_v47 = vld [vmem:[%s7851_s15 + $0x6c] sm:$0xf]  ;;  %v6121_v37 = vld [vmem:[%s7851_s15 + $0x84] sm:$0xf] }
 0x128   : > { %v8792_v31 = vsel %vm7943_vm6, %v5036_v59, %v5037_v34  ;;  %v2672_v36 = vor.u32 %v2671_v15, %v8761_v44  ;;  %v2685_v39 = vshll.u32 %v6116_v17, 16  ;;  %v2689_v55 = vshrl.u32 %v6116_v17, 16 }
 0x129   : > { %v8799_v58 = vsel %vm7943_vm6, %v5039_v12, %v5040_v18  ;;  %v2677_v50 = vrot.slane %v2675_v13, 5  ;;  %v2681_v46 = vrot.slane %v2679_v41, 4  ;;  %v5044_v4 = vrot.slane %v6411_v30, 5  ;;  %v6122_v13 = vld [vmem:[%s7851_s15 + $0x88] sm:$0x1] }
 0x12a   : > { %v6446_v40 = vcombine.low %v5012_v10, %v5015_v20  ;;  %v6447_v1 = vcombine.low %v5019_v22, %v5022_v24  ;;  %v6448_v61 = vcombine.low %v8774_v32, %v8780_v57  ;;  %v6449_v35 = vcombine.low %v8784_v42, %v8788_v26  ;;  %v6416_v41 = vld [vmem:[%s7851_s15 + $0x7c] sm:$0xf]  ;;  %v6415_v24 = vld [vmem:[%s7851_s15 + $0x78] sm:$0xe] }
 0x12b   : > { %v2663_v62 = vrot.slane %v2662_v28, 4  ;;  %v2695_v5 = vshll.u32 %v6117_v38, 16  ;;  %v6450_v23 = vcombine.low %v8792_v31, %v8799_v58  ;;  %v2673_v25 = vrot.slane %v2672_v36, 4 }
 0x12c   : > { %7069 = vmatmul.mubr.msk.bf16.gmra.mrb[28].mxu0 %vm461_vm0, %v6377_v0  ;;  %v8813_v9 = vrot.slane %v2685_v39, 5  ;;  %v2691_v45 = vrot.slane %v2689_v55, 4  ;;  %v2682_v56 = vor.u32 %v2681_v46, %v2677_v50  ;;  %v6438_v63 = vrot.slane %v6410_v7, 9  ;;  %v6417_v39 = vld [vmem:[%s7851_s15 + $0x80] sm:$0xf] }
 0x12d   : > { %7074 = vmatprep.mubr.msk.bf16.mxu0 %vm461_vm0, %v6445_v60  ;;  %v5046_v0 = vrot.slane %v5044_v4, 4  ;;  %v5047_v60 = vrot.slane %v6412_v47, 5  ;;  %v2700_v34 = vshrl.u32 %v6118_v43, 16  ;;  %v2703_v2 = vshll.u32 %v6118_v43, 16  ;;  %v6124_v43 = vld [vmem:[%s7851_s15 + $0x90] sm:$0xf] }
 0x12e   : > { %6921 = vmatmul.mubr.msk.bf16.gmra.mrb[16].mxu1 %vm461_vm0, %v7523_v8  ;;  %v2709_v49 = vshll.u32 %v6119_v21, 16  ;;  %v2713_v14 = vshrl.u32 %v6119_v21, 16  ;;  %v2668_v53 = vsel %vm7872_vm3, %v2663_v62, %v8761_v44  ;;  %v8826_v29 = vrot.slane %v2695_v5, 5  ;;  %v6414_v8 = vld [vmem:[%s7851_s15 + $0x74] sm:$0x1]  ;;  %v7528_v21 = vld [vmem:[%s7851_s15 + $0xa0] sm:$0xff]  }
 0x12f   : > { %6924 = vmatprep.mubr.msk.bf16.mxu1 %vm461_vm0, %v7524_v19  ;;  %v2719_v54 = vshll.u32 %v6120_v27, 16  ;;  %v2723_v11 = vshrl.u32 %v6120_v27, 16  ;;  %v2678_v16 = vsel %vm7872_vm3, %v2673_v25, %v2677_v50  ;;  %v2692_v33 = vor.u32 %v2691_v45, %v8813_v9 }
 0x130   : > { %v2729_v10 = vshll.u32 %v6121_v37, 16  ;;  %v2733_v59 = vshrl.u32 %v6121_v37, 16  ;;  %v8833_v15 = vrot.slane %v2682_v56, 4  ;;  %v8837_v44 = vsel %vm7943_vm6, %v6438_v63, %v5044_v4  ;;  %v6419_v37 = vld [vmem:[%s7851_s15 + $0x88] sm:$0x1] }
 0x131   : > { %v8841_v12 = vsel %vm7943_vm6, %v5046_v0, %v5047_v60  ;;  %v5050_v18 = vrot.slane %v8820_v52, 5  ;;  %v2702_v17 = vrot.slane %v2700_v34, 4  ;;  %v2705_v19 = vrot.slane %v2703_v2, 5 }
 0x132   : > { %v8847_v20 = vrot.slane %v2709_v49, 5  ;;  %v2715_v22 = vrot.slane %v2713_v14, 4  ;;  %v8850_v30 = vcombine.low %v2668_v53, %v2678_v16  ;;  %v5053_v28 = vrot.slane %v6414_v8, 5  ;;  %v6125_v49 = vld [vmem:[%s7851_s15 + $0x94] sm:$0xf]  ;;  %v7529_v8 = vld [vmem:[%s7851_s15 + $0xa8] sm:$0xff]  }
 0x133   : > { %v8852_v36 = vrot.slane %v2719_v54, 5  ;;  %v2725_v38 = vrot.slane %v2723_v11, 4  ;;  %v2693_v55 = vrot.slane %v2692_v33, 4  ;;  %v8855_v50 = vrot.slane %v2729_v10, 5  ;;  %v6126_v33 = vld [vmem:[%s7851_s15 + $0x98] sm:$0xf] }
 0x134   : > { %7075 = vmatmul.mubr.msk.bf16.vlgmr.msra.gmra.mrb[0].mxu0 %vm461_vm0, %v6446_v40  ;;  %v2735_v46 = vrot.slane %v2733_v59, 4  ;;  %v5057_v4 = vrot.slane %v6416_v41, 5  ;;  %v6123_v40 = vld [vmem:[%s7851_s15 + $0x8c] sm:$0xf]  ;;  %v2688_v7 = vsel %vm7872_vm3, %v8833_v15, %v8813_v9  ;;  %v6451_v47 = vcombine.low %v8837_v44, %v8841_v12 }
 0x135   : > { %7078 = vmatprep.mubr.msk.bf16.mxu0 %vm461_vm0, %v6447_v1  ;;  %v7527_v1 = vld [vmem:[%s7851_s15 + $0x94] sm:$0xff]   ;;  %v5049_v62 = vrot.slane %v5047_v60, 4  ;;  %v5052_v5 = vrot.slane %v5050_v18, 4  ;;  %v2716_v25 = vor.u32 %v2715_v22, %v8847_v20  ;;  %v2739_v45 = vshll.u32 %v6122_v13, 16 }
 0x136   : > { %6925 = vmatmul.mubr.msk.bf16.gmra.mrb[20].mxu1 %vm461_vm0, %v7525_v6  ;;  %v2706_v6 = vor.u32 %v2705_v19, %v2702_v17  ;;  %v6439_v27 = vrot.slane %v6415_v24, 9  ;;  %v2726_v9 = vor.u32 %v2725_v38, %v8852_v36  ;;  %v5060_v56 = vrot.slane %v6417_v39, 5  ;;  %v6421_v17 = vld [vmem:[%s7851_s15 + $0x90] sm:$0xf]  ;;  %v6420_v39 = vld [vmem:[%s7851_s15 + $0x8c] sm:$0xe] }
 0x137   : > { %6928 = vmatprep.mubr.msk.bf16.mxu1 %vm461_vm0, %v7526_v3  ;;  %v6418_v3 = vld [vmem:[%s7851_s15 + $0x84] sm:$0xf]  ;;  %v2744_v32 = vshrl.u32 %v6123_v40, 16  ;;  %v2747_v57 = vshll.u32 %v6123_v40, 16  ;;  %v5059_v63 = vrot.slane %v5057_v4, 4  ;;  %v2753_v0 = vshll.u32 %v6124_v43, 16 }
 0x138   : > { %v2757_v60 = vshrl.u32 %v6124_v43, 16  ;;  %v2698_v42 = vsel %vm7872_vm3, %v2693_v55, %v8826_v29  ;;  %v8885_v26 = vsel %vm7943_vm6, %v5049_v62, %v5050_v18  ;;  %v5063_v52 = vrot.slane %v6418_v3, 5  ;;  %v6128_v55 = vld [vmem:[%s7851_s15 + $0xa0] sm:$0xf] }
 0x139   : > { %v2707_v34 = vrot.slane %v2706_v6, 4  ;;  %v2741_v2 = vrot.slane %v2739_v45, 5  ;;  %v2746_v14 = vrot.slane %v2744_v32, 4  ;;  %v2749_v53 = vrot.slane %v2747_v57, 5 }
 0x13a   : > { %v2717_v29 = vrot.slane %v2716_v25, 4  ;;  %v2727_v54 = vrot.slane %v2726_v9, 4  ;;  %v8896_v11 = vsel %vm7943_vm6, %v6439_v27, %v5057_v4  ;;  %v5062_v16 = vrot.slane %v5060_v56, 4  ;;  %v6423_v25 = vld [vmem:[%s7851_s15 + $0x98] sm:$0xf] }
 0x13b   : > { %v5061_v59 = vsel %vm7943_vm6, %v5059_v63, %v5060_v56  ;;  %v8902_v15 = vrot.slane %v2753_v0, 5  ;;  %v2759_v44 = vrot.slane %v2757_v60, 4  ;;  %v5065_v12 = vrot.slane %v5063_v52, 4 }
 0x13c   : > { %7079 = vmatmul.mubr.msk.bf16.gmra.mrb[4].mxu0 %vm461_vm0, %v6448_v61  ;;  %v2736_v61 = vor.u32 %v2735_v46, %v8855_v50  ;;  %v5066_v18 = vrot.slane %v6419_v37, 5  ;;  %v2763_v13 = vshll.u32 %v6125_v49, 16  ;;  %v2767_v41 = vshrl.u32 %v6125_v49, 16  ;;  %v6130_v37 = vld [vmem:[%s7851_s15 + $0xa8] sm:$0xf] }
 0x13d   : > { %7082 = vmatprep.mubr.msk.bf16.mxu0 %vm461_vm0, %v6449_v35  ;;  %v8889_v35 = vsel %vm7943_vm6, %v5052_v5, %v5053_v28  ;;  %v6144_v19 = vcombine.low %v2688_v7, %v2698_v42  ;;  %v2750_v24 = vor.u32 %v2749_v53, %v2746_v14  ;;  %v2773_v28 = vshll.u32 %v6126_v33, 16  ;;  %v6422_v5 = vld [vmem:[%s7851_s15 + $0x94] sm:$0xf]  ;;  %v6424_v42 = vld [vmem:[%s7851_s15 + $0x9c] sm:$0x1] }
 0x13e   : > { %6929 = vmatmul.mubr.msk.bf16.gmra.mrb[24].mxu1 %vm461_vm0, %v7527_v1  ;;  %v2737_v10 = vrot.slane %v2736_v61, 4  ;;  %v6452_v22 = vcombine.low %v8885_v26, %v8889_v35  ;;  %v2712_v38 = vsel %vm7872_vm3, %v2707_v34, %v8847_v20  ;;  %v2722_v31 = vsel %vm7872_vm3, %v2717_v29, %v8852_v36  ;;  %v6129_v1 = vld [vmem:[%s7851_s15 + $0xa4] sm:$0xf] }
 0x13f   : > { %6932 = vmatprep.mubr.msk.bf16.mxu1 %vm461_vm0, %v7528_v21  ;;  %v2732_v58 = vsel %vm7872_vm3, %v2727_v54, %v8855_v50  ;;  %v6453_v46 = vcombine.low %v8896_v11, %v5061_v59  ;;  %v8926_v4 = vsel %vm7943_vm6, %v5062_v16, %v5063_v52  ;;  %v2760_v20 = vor.u32 %v2759_v44, %v8902_v15  ;;  %v6426_v35 = vld [vmem:[%s7851_s15 + $0xa4] sm:$0xf]  ;;  %v6131_v11 = vld [vmem:[%s7851_s15 + $0xac] sm:$0xf] }
 0x140   : > { %v5070_v40 = vrot.slane %v6421_v17, 5  ;;  %v2742_v36 = vsel %vm7872_vm3, %v2737_v10, %v2741_v2  ;;  %v8935_v50 = vsel %vm7943_vm6, %v5065_v12, %v5066_v18  ;;  %v2765_v7 = vrot.slane %v2763_v13, 5  ;;  %v6425_v10 = vld [vmem:[%s7851_s15 + $0xa0] sm:$0xe]  ;;  %v6427_v13 = vld [vmem:[%s7851_s15 + $0xa8] sm:$0xf] }
 0x141   : > { %v2769_v62 = vrot.slane %v2767_v41, 4  ;;  %v2751_v43 = vrot.slane %v2750_v24, 4  ;;  %v8941_v21 = vrot.slane %v2773_v28, 5  ;;  %v6440_v6 = vrot.slane %v6420_v39, 9 }
 0x142   : > { %v2788_v45 = vshrl.u32 %v6128_v55, 16  ;;  %v2791_v3 = vshll.u32 %v6128_v55, 16  ;;  %v2797_v9 = vshll.u32 %v6129_v1, 16  ;;  %v2801_v56 = vshrl.u32 %v6129_v1, 16 }
 0x143   : > { %v6145_v32 = vcombine.low %v2712_v38, %v2722_v31  ;;  %v2761_v57 = vrot.slane %v2760_v20, 4  ;;  %v5072_v61 = vrot.slane %v5070_v40, 4  ;;  %v5073_v63 = vrot.slane %v6422_v5, 5 }
 0x144   : > { %7083 = vmatmul.mubr.msk.bf16.gmra.mrb[8].mxu0 %vm461_vm0, %v6450_v23  ;;  %v2777_v23 = vshrl.u32 %v6126_v33, 16  ;;  %v6146_v0 = vcombine.low %v2732_v58, %v2742_v36  ;;  %v5076_v26 = vrot.slane %v6423_v25, 5  ;;  %v2790_v52 = vrot.slane %v2788_v45, 4  ;;  %v6431_v36 = vld [vmem:[%s7851_s15 + $0xb8] sm:$0xf] }
 0x145   : > { %7086 = vmatprep.mubr.msk.bf16.mxu0 %vm461_vm0, %v6451_v47  ;;  %v6127_v47 = vld [vmem:[%s7851_s15 + $0x9c] sm:$0x1]  ;;  %v2793_v34 = vrot.slane %v2791_v3, 5  ;;  %v8950_v2 = vrot.slane %v2797_v9, 5  ;;  %v2803_v49 = vrot.slane %v2801_v56, 4  ;;  %v2756_v14 = vsel %vm7872_vm3, %v2751_v43, %v8902_v15 }
 0x146   : > { %6933 = vmatmul.mubr.msk.bf16.gmra.mrb[28].mxu1 %vm461_vm0, %v7529_v8  ;;  %v2779_v27 = vrot.slane %v2777_v23, 4  ;;  %v2783_v60 = vshll.u32 %v6127_v47, 16  ;;  %v2770_v53 = vor.u32 %v2769_v62, %v2765_v7  ;;  %v5071_v54 = vsel %vm7943_vm6, %v6440_v6, %v5070_v40  ;;  %v6132_v47 = vld [vmem:[%s7851_s15 + $0xb0] sm:$0x1] }
 0x147   : > { %6954 = vmatprep.mubr.msk.bf16.mxu1 %vm461_vm0, %v8850_v30  ;;  %v6454_v30 = vcombine.low %v8926_v4, %v8935_v50  ;;  %v2766_v16 = vsel %vm7872_vm3, %v2761_v57, %v2765_v7  ;;  %v5074_v33 = vsel %vm7943_vm6, %v5072_v61, %v5073_v63  ;;  %v5079_v8 = vrot.slane %v6424_v42, 5  ;;  %v6429_v45 = vld [vmem:[%s7851_s15 + $0xb0] sm:$0x1]  ;;  %v6430_v57 = vld [vmem:[%s7851_s15 + $0xb4] sm:$0xe] }
 0x148   : > { %v2780_v29 = vor.u32 %v2779_v27, %v8941_v21  ;;  %v5083_v59 = vrot.slane %v6426_v35, 5  ;;  %v5075_v44 = vrot.slane %v5073_v63, 4  ;;  %v5078_v15 = vrot.slane %v5076_v26, 4  ;;  %v6432_v61 = vld [vmem:[%s7851_s15 + $0xbc] sm:$0xf] }
 0x149   : > { %v2807_v12 = vshll.u32 %v6130_v37, 16  ;;  %v2811_v18 = vshrl.u32 %v6130_v37, 16  ;;  %v2794_v41 = vor.u32 %v2793_v34, %v2790_v52  ;;  %v2804_v17 = vor.u32 %v2803_v49, %v8950_v2  ;;  %v6433_v49 = vld [vmem:[%s7851_s15 + $0xc0] sm:$0xf] }
 0x14a   : > { %v2821_v24 = vshrl.u32 %v6131_v11, 16  ;;  %v6147_v28 = vcombine.low %v2756_v14, %v2766_v16  ;;  %v2771_v38 = vrot.slane %v2770_v53, 4  ;;  %v2785_v31 = vrot.slane %v2783_v60, 5 }
 0x14b   : > { %v6455_v58 = vcombine.low %v5071_v54, %v5074_v33  ;;  %v6441_v23 = vrot.slane %v6425_v10, 9  ;;  %v5085_v39 = vrot.slane %v5083_v59, 4  ;;  %v5086_v55 = vrot.slane %v6427_v13, 5 }
 0x14c   : > { %7087 = vmatmul.mubr.msk.bf16.gmra.mrb[12].mxu0 %vm461_vm0, %v6452_v22  ;;  %v2817_v22 = vshll.u32 %v6131_v11, 16  ;;  %v5077_v4 = vsel %vm7943_vm6, %v5075_v44, %v5076_v26  ;;  %v5080_v20 = vsel %vm7943_vm6, %v5078_v15, %v5079_v8  ;;  %v2809_v40 = vrot.slane %v2807_v12, 5 }
 0x14d   : > { %7090 = vmatprep.mubr.msk.bf16.mxu0 %vm461_vm0, %v6453_v46  ;;  %v6428_v46 = vld [vmem:[%s7851_s15 + $0xac] sm:$0xf]  ;;  %v2813_v1 = vrot.slane %v2811_v18, 4  ;;  %v2795_v50 = vrot.slane %v2794_v41, 4  ;;  %v2805_v7 = vrot.slane %v2804_v17, 4  ;;  %v2823_v5 = vrot.slane %v2821_v24, 4 }
 0x14e   : > { %6955 = vmatmul.mubr.msk.bf16.vlgmr.msra.gmra.mrb[16].mxu1 %vm461_vm0, %v6144_v19  ;;  %v2781_v19 = vrot.slane %v2780_v29, 4  ;;  %v2819_v62 = vrot.slane %v2817_v22, 5  ;;  %v5089_v43 = vrot.slane %v6428_v46, 5  ;;  %v5084_v6 = vsel %vm7943_vm6, %v6441_v23, %v5083_v59  ;;  %v6434_v59 = vld [vmem:[%s7851_s15 + $0xc4] sm:$0x1]  ;;  %s6514_s15 = sshll.u32 %s7641_s19, 8 }
 0x14f   : > { %6958 = vmatprep.mubr.msk.bf16.mxu1 %vm461_vm0, %v6145_v32  ;;  %v5087_v25 = vsel %vm7943_vm6, %v5085_v39, %v5086_v55  ;;  %v5096_v27 = vrot.slane %v6431_v36, 5  ;;  %v2776_v3 = vsel %vm7872_vm3, %v2771_v38, %v8941_v21  ;;  %v6456_v56 = vcombine.low %v5077_v4, %v5080_v20  ;;  %s5779_s18 = sadd.s32 %s6514_s15, %s5777_s4  ;;  %s7535_s4 = sshll.u32 %s7659_s9, 4  ;;  %s7536_s4 = int_to_ptr.vmem [resolvable:$false] %s7535_s4 }
 0x150   : > { %v2786_v9 = vsel %vm7872_vm3, %v2781_v19, %v2785_v31  ;;  %v2827_v32 = vshll.u32 %v6132_v47, 16  ;;  %v2800_v63 = vsel %vm7872_vm3, %v2795_v50, %v8950_v2  ;;  %v2824_v60 = vor.u32 %v2823_v5, %v2819_v62  ;;  %s6515_s19 = sshll.u32 %s5779_s18, 6  ;;  %s7537_s15 = scalar_lea.vmem %s7536_s4, 4096 }
 0x151   : > { %v6457_v21 = vcombine.low %v5084_v6, %v5087_v25  ;;  %v5088_v42 = vrot.slane %v5086_v55, 4  ;;  %v5091_v26 = vrot.slane %v5089_v43, 4  ;;  %v5092_v35 = vrot.slane %v6429_v45, 5  ;;  %s9108_s24 = scalar_lea.hbm %s9181_s3, %s6515_s19  ;;  %p7538_p10 = scmp.lt.s32.totalorder %s9103_s17, %s7536_s4 }
 0x152   : > { %v6442_v37 = vrot.slane %v6430_v57, 9  ;;  %v5098_v52 = vrot.slane %v5096_v27, 4  ;;  %v5099_v34 = vrot.slane %v6432_v61, 5  ;;  %v6148_v14 = vcombine.low %v2776_v3, %v2786_v9  ;;  %p7539_p11 = scmp.lt.s32.totalorder %s7537_s15, %s7531_s8 }
 0x153   : > { %v2825_v2 = vrot.slane %v2824_v60, 4  ;;  %v2829_v54 = vrot.slane %v2827_v32, 5  ;;  %v5090_v11 = vsel %vm7943_vm6, %v5088_v42, %v5089_v43  ;;  %v5093_v16 = vsel %vm7943_vm6, %v5091_v26, %v5092_v35 }
 0x154   : > { %7091 = vmatmul.mubr.msk.bf16.gmra.mrb[16].mxu0 %vm461_vm0, %v6454_v30  ;;  %v2814_v30 = vor.u32 %v2813_v1, %v2809_v40  ;;  %v5102_v33 = vrot.slane %v6433_v49, 5  ;;  %v5097_v8 = vsel %vm7943_vm6, %v6442_v37, %v5096_v27  ;;  %v5100_v10 = vsel %vm7943_vm6, %v5098_v52, %v5099_v34  ;;  %p7540_p13 = por %p7539_p11, %p7538_p10 }
 0x155   : > { %7094 = vmatprep.mubr.msk.bf16.mxu0 %vm461_vm0, %v6455_v58  ;;  %v2830_v15 = vsel %vm7872_vm3, %v2825_v2, %v2829_v54  ;;  %v6458_v12 = vcombine.low %v5090_v11, %v5093_v16  ;;  %v6459_v18 = vcombine.low %v5097_v8, %v5100_v10  ;;  %v5101_v13 = vrot.slane %v5099_v34, 4 }
 0x156   : > { %6959 = vmatmul.mubr.msk.bf16.gmra.mrb[20].mxu1 %vm461_vm0, %v6146_v0  ;;  %v2810_v0 = vsel %vm7872_vm3, %v2805_v7, %v2809_v40  ;;  %v2815_v29 = vrot.slane %v2814_v30, 4  ;;  %v5104_v41 = vrot.slane %v5102_v33, 4  ;;  %v5105_v17 = vrot.slane %v6434_v59, 5  ;;  %p7541_p0 = pnand %p7540_p13, %p7534_p8 }
 0x157   : > { %6962 = vmatprep.mubr.msk.bf16.mxu1 %vm461_vm0, %v6147_v28  ;;  %v6149_v53 = vcombine.low %v2800_v63, %v2810_v0  ;;  %v5103_v24 = vsel %vm7943_vm6, %v5101_v13, %v5102_v33 }
 0x158   : > { %v2820_v44 = vsel %vm7872_vm3, %v2815_v29, %v2819_v62  ;;  %v5106_v28 = vsel %vm7943_vm6, %v5104_v41, %v5105_v17  ;;  %v9040_v62 = vld [vmem:[%s334_s25] ss:$0 sm:$0xff]  ;;  %s9114_s25 = scalar_lea.sflag [#allocation5], %s324_s6 }
 0x159   : > { %v6150_v22 = vcombine.low %v2820_v44, %v2830_v15  ;;  %v6460_v51 = vcombine.low %v5103_v24, %v5106_v28 }
 0x15c   : > { %7095 = vmatmul.mubr.msk.bf16.gmra.mrb[20].mxu0 %vm461_vm0, %v6456_v56 }
 0x15d   : > { %7098 = vmatprep.mubr.msk.bf16.mxu0 %vm461_vm0, %v6457_v21 }
 0x15e   : > { %6963 = vmatmul.mubr.msk.bf16.gmra.mrb[24].mxu1 %vm461_vm0, %v6148_v14 }
 0x15f   : > { %6966 = vmatprep.mubr.msk.bf16.mxu1 %vm461_vm0, %v6149_v53 }
 0x164   : > { %7099 = vmatmul.mubr.msk.bf16.gmra.mrb[24].mxu0 %vm461_vm0, %v6458_v12 }
 0x165   : > { %7102 = vmatprep.mubr.msk.bf16.mxu0 %vm461_vm0, %v6459_v18 }
 0x166   : > { %6967 = vmatmul.mubr.msk.bf16.gmra.mrb[28].mxu1 %vm461_vm0, %v6150_v22 }
 0x16c   : > { %7103 = vmatmul.mubr.msk.bf16.gmra.mrb[28].mxu0 %vm461_vm0, %v6460_v51 }
 0x1e1   : > { %v6906_v38 = vpop.f32.mrb[0].mxu1 }
 0x1e2   : > { %v2216_v31 = vpop.f32.mrb[1].mxu1 }
 0x1e3   : > { %v6907_v58 = vpop.f32.mrb[2].mxu1 }
 0x1e4   : > { %v2219_v19 = vpop.f32.mrb[3].mxu1 }
 0x1e9   : > { %v6910_v23 = vpop.f32.mrb[4].mxu1 }
 0x1ea   : > { %v2232_v39 = vpop.f32.mrb[5].mxu1 }
 0x1eb   : > { %v6911_v55 = vpop.f32.mrb[6].mxu1 }
 0x1ec   : > { %v2235_v46 = vpop.f32.mrb[7].mxu1 }
 0x1f1   : > { %v6914_v4 = vpop.f32.mrb[8].mxu1 }
 0x1f2   : > { %v2248_v20 = vpop.f32.mrb[9].mxu1 }
 0x1f3   : > { %v9023_v40 = vpop.f32.mrb[10].mxu1 }
 0x1f4   : > { %v9025_v48 = vpop.f32.mrb[11].mxu1 }
 0x1f9   : > { %v9027_v1 = vpop.f32.mrb[12].mxu1 }
 0x1fa   : > { %v9029_v36 = vpop.f32.mrb[13].mxu1 }
 0x1fb   : > { %v9031_v50 = vpop.f32.mrb[14].mxu1 }
 0x1fc   : > { %v9034_v7 = vpop.f32.mrb[15].mxu1 }
 0x207   : > { %v7076_v47 = vpop.f32.mrb[0].mxu0 }
 0x208   : > { %v7108_v5 = vadd.f32 %v7076_v47, %v6906_v38  ;;  %v5246_v43 = vpop.f32.mrb[1].mxu0 }
 0x209   : > { %v7109_v6 = vadd.f32 %v5246_v43, %v2216_v31  ;;  %v7077_v25 = vpop.f32.mrb[2].mxu0 }
 0x20a   : > { %v5510_v45 = vadd.f32 %v7108_v5, %v9040_v62  ;;  %v7110_v27 = vadd.f32 %v7077_v25, %v6907_v58  ;;  %v5249_v3 = vpop.f32.mrb[3].mxu0 }
 0x20b   : > { %v5508_v9 = vadd.f32 %v7109_v6, %v9040_v62  ;;  %v7111_v56 = vadd.f32 %v5249_v3, %v2219_v19 }
 0x20c   : > { %v5542_v32 = vmul.f32 0.1, %v5510_v45  ;;  %v5511_v57 = vadd.f32 %v7110_v27, %v9040_v62 }
 0x20d   : > { %v5540_v61 = vmul.f32 0.1, %v5508_v9  ;;  %v5509_v63 = vadd.f32 %v7111_v56, %v9040_v62 }
 0x20e   : > { %v5543_v0 = vmul.f32 0.1, %v5511_v57  ;;  %v5574_v21 = vmax.f32 %v5510_v45, %v5542_v32 }
 0x20f   : > { %v5541_v30 = vmul.f32 0.1, %v5509_v63  ;;  %v7080_v60 = vpop.f32.mrb[4].mxu0  ;;  %v5572_v37 = vmax.f32 %v5508_v9, %v5540_v61 }
 0x210   : > { %v5575_v42 = vmax.f32 %v5511_v57, %v5543_v0  ;;  %v7112_v26 = vadd.f32 %v7080_v60, %v6910_v23  ;;  %v5262_v35 = vpop.f32.mrb[5].mxu0 }
 0x211   : > { %v5573_v52 = vmax.f32 %v5509_v63, %v5541_v30  ;;  %v7113_v34 = vadd.f32 %v5262_v35, %v2232_v39  ;;  %v7081_v49 = vpop.f32.mrb[6].mxu0 }
 0x212   : > { %v6560_v14 = vpack.c.bf16 %v5575_v42, %v5574_v21  ;;  %v5514_v53 = vadd.f32 %v7112_v26, %v9040_v62  ;;  %v7114_v29 = vadd.f32 %v7081_v49, %v6911_v55  ;;  %v5265_v2 = vpop.f32.mrb[7].mxu0 }
 0x213   : > { %v6555_v54 = vpack.c.bf16 %v5573_v52, %v5572_v37  ;;  %v5512_v11 = vadd.f32 %v7113_v34, %v9040_v62  ;;  %v7115_v16 = vadd.f32 %v5265_v2, %v2235_v46 }
 0x214   : > { %6632 = vst [vmem:[%s9051_s29 + $0x8] sm:$0xff] %v6560_v14   ;;  %v5546_v33 = vmul.f32 0.1, %v5514_v53  ;;  %v5515_v8 = vadd.f32 %v7114_v29, %v9040_v62 }
 0x215   : > { %6556 = vst [vmem:[%s9051_s29] sm:$0xff] %v6555_v54   ;;  %v5544_v10 = vmul.f32 0.1, %v5512_v11  ;;  %v5513_v59 = vadd.f32 %v7115_v16, %v9040_v62 }
 0x216   : > { %v5547_v44 = vmul.f32 0.1, %v5515_v8  ;;  %v5578_v18 = vmax.f32 %v5514_v53, %v5546_v33 }
 0x217   : > { %v5545_v15 = vmul.f32 0.1, %v5513_v59  ;;  %v7084_v12 = vpop.f32.mrb[8].mxu0  ;;  %v5576_v22 = vmax.f32 %v5512_v11, %v5544_v10 }
 0x218   : > { %v5579_v13 = vmax.f32 %v5515_v8, %v5547_v44  ;;  %v7116_v41 = vadd.f32 %v7084_v12, %v6914_v4  ;;  %v5278_v17 = vpop.f32.mrb[9].mxu0 }
 0x219   : > { %v5577_v24 = vmax.f32 %v5513_v59, %v5545_v15  ;;  %v7117_v28 = vadd.f32 %v5278_v17, %v2248_v20  ;;  %v7085_v51 = vpop.f32.mrb[10].mxu0 }
 0x21a   : > { %v6570_v38 = vpack.c.bf16 %v5579_v13, %v5578_v18  ;;  %v5518_v31 = vadd.f32 %v7116_v41, %v9040_v62  ;;  %v7118_v58 = vadd.f32 %v7085_v51, %v9023_v40  ;;  %v5281_v19 = vpop.f32.mrb[11].mxu0 }
 0x21b   : > { %v6565_v23 = vpack.c.bf16 %v5577_v24, %v5576_v22  ;;  %v5516_v39 = vadd.f32 %v7117_v28, %v9040_v62  ;;  %v7119_v55 = vadd.f32 %v5281_v19, %v9025_v48 }
 0x21c   : > { %6634 = vst [vmem:[%s9051_s29 + $0x18] sm:$0xff] %v6570_v38   ;;  %v5550_v46 = vmul.f32 0.1, %v5518_v31  ;;  %v5519_v4 = vadd.f32 %v7118_v58, %v9040_v62 }
 0x21d   : > { %6633 = vst [vmem:[%s9051_s29 + $0x10] sm:$0xff] %v6565_v23   ;;  %v5548_v47 = vmul.f32 0.1, %v5516_v39  ;;  %v5517_v20 = vadd.f32 %v7119_v55, %v9040_v62 }
 0x21e   : > { %v5551_v5 = vmul.f32 0.1, %v5519_v4  ;;  %v5582_v25 = vmax.f32 %v5518_v31, %v5550_v46 }
 0x21f   : > { %v5549_v43 = vmul.f32 0.1, %v5517_v20  ;;  %v7088_v6 = vpop.f32.mrb[12].mxu0  ;;  %v5580_v3 = vmax.f32 %v5516_v39, %v5548_v47 }
 0x220   : > { %v5583_v45 = vmax.f32 %v5519_v4, %v5551_v5  ;;  %v7120_v40 = vadd.f32 %v7088_v6, %v9027_v1  ;;  %v5294_v27 = vpop.f32.mrb[13].mxu0 }
 0x221   : > { %v5581_v9 = vmax.f32 %v5517_v20, %v5549_v43  ;;  %v7121_v48 = vadd.f32 %v5294_v27, %v9029_v36  ;;  %v7089_v56 = vpop.f32.mrb[14].mxu0  ;;  %v6956_v57 = vpop.f32.mrb[16].mxu1 }
 0x222   : > { %v6580_v32 = vpack.c.bf16 %v5583_v45, %v5582_v25  ;;  %v5522_v61 = vadd.f32 %v7120_v40, %v9040_v62  ;;  %v7122_v63 = vadd.f32 %v7089_v56, %v9031_v50  ;;  %v5297_v0 = vpop.f32.mrb[15].mxu0  ;;  %v3034_v60 = vpop.f32.mrb[17].mxu1 }
 0x223   : > { %v6575_v30 = vpack.c.bf16 %v5581_v9, %v5580_v3  ;;  %v5520_v21 = vadd.f32 %v7121_v48, %v9040_v62  ;;  %v7123_v1 = vadd.f32 %v5297_v0, %v9034_v7  ;;  %v6957_v26 = vpop.f32.mrb[18].mxu1 }
 0x224   : > { %6636 = vst [vmem:[%s9051_s29 + $0x28] sm:$0xff] %v6580_v32   ;;  %v5554_v42 = vmul.f32 0.1, %v5522_v61  ;;  %v5523_v35 = vadd.f32 %v7122_v63, %v9040_v62  ;;  %v3037_v37 = vpop.f32.mrb[19].mxu1 }
 0x225   : > { %6635 = vst [vmem:[%s9051_s29 + $0x20] sm:$0xff] %v6575_v30   ;;  %v5552_v36 = vmul.f32 0.1, %v5520_v21  ;;  %v5521_v52 = vadd.f32 %v7123_v1, %v9040_v62 }
 0x226   : > { %v5555_v34 = vmul.f32 0.1, %v5523_v35  ;;  %v5586_v14 = vmax.f32 %v5522_v61, %v5554_v42 }
 0x227   : > { %v5553_v49 = vmul.f32 0.1, %v5521_v52  ;;  %v7092_v50 = vpop.f32.mrb[16].mxu0  ;;  %v5584_v54 = vmax.f32 %v5520_v21, %v5552_v36 }
 0x228   : > { %v5587_v53 = vmax.f32 %v5523_v35, %v5555_v34  ;;  %v7124_v29 = vadd.f32 %v7092_v50, %v6956_v57  ;;  %v5310_v2 = vpop.f32.mrb[17].mxu0 }
 0x229   : > { %v5585_v7 = vmax.f32 %v5521_v52, %v5553_v49  ;;  %v7125_v11 = vadd.f32 %v5310_v2, %v3034_v60  ;;  %v7093_v16 = vpop.f32.mrb[18].mxu0  ;;  %v6960_v8 = vpop.f32.mrb[20].mxu1 }
 0x22a   : > { %v6590_v33 = vpack.c.bf16 %v5587_v53, %v5586_v14  ;;  %v5526_v10 = vadd.f32 %v7124_v29, %v9040_v62  ;;  %v7126_v59 = vadd.f32 %v7093_v16, %v6957_v26  ;;  %v5313_v44 = vpop.f32.mrb[19].mxu0  ;;  %v3050_v12 = vpop.f32.mrb[21].mxu1 }
 0x22b   : > { %v6585_v15 = vpack.c.bf16 %v5585_v7, %v5584_v54  ;;  %v5524_v18 = vadd.f32 %v7125_v11, %v9040_v62  ;;  %v7127_v13 = vadd.f32 %v5313_v44, %v3037_v37  ;;  %v6961_v17 = vpop.f32.mrb[22].mxu1 }
 0x22c   : > { %6638 = vst [vmem:[%s9051_s29 + $0x38] sm:$0xff] %v6590_v33   ;;  %v5558_v41 = vmul.f32 0.1, %v5526_v10  ;;  %v5527_v22 = vadd.f32 %v7126_v59, %v9040_v62  ;;  %v3053_v28 = vpop.f32.mrb[23].mxu1 }
 0x22d   : > { %6637 = vst [vmem:[%s9051_s29 + $0x30] sm:$0xff] %v6585_v15   ;;  %v5556_v24 = vmul.f32 0.1, %v5524_v18  ;;  %v5525_v51 = vadd.f32 %v7127_v13, %v9040_v62 }
 0x22e   : > { %v5559_v38 = vmul.f32 0.1, %v5527_v22  ;;  %v5590_v19 = vmax.f32 %v5526_v10, %v5558_v41 }
 0x22f   : > { %v5557_v31 = vmul.f32 0.1, %v5525_v51  ;;  %v7096_v58 = vpop.f32.mrb[20].mxu0  ;;  %v5588_v46 = vmax.f32 %v5524_v18, %v5556_v24 }
 0x230   : > { %v5591_v23 = vmax.f32 %v5527_v22, %v5559_v38  ;;  %v7128_v39 = vadd.f32 %v7096_v58, %v6960_v8  ;;  %v5326_v55 = vpop.f32.mrb[21].mxu0 }
 0x231   : > { %v5589_v4 = vmax.f32 %v5525_v51, %v5557_v31  ;;  %v7129_v47 = vadd.f32 %v5326_v55, %v3050_v12  ;;  %v7097_v20 = vpop.f32.mrb[22].mxu0  ;;  %v6964_v43 = vpop.f32.mrb[24].mxu1 }
 0x232   : > { %v6600_v5 = vpack.c.bf16 %v5591_v23, %v5590_v19  ;;  %v5530_v6 = vadd.f32 %v7128_v39, %v9040_v62  ;;  %v7130_v25 = vadd.f32 %v7097_v20, %v6961_v17  ;;  %v5329_v45 = vpop.f32.mrb[23].mxu0  ;;  %v3066_v27 = vpop.f32.mrb[25].mxu1 }
 0x233   : > { %v6595_v40 = vpack.c.bf16 %v5589_v4, %v5588_v46  ;;  %v5528_v3 = vadd.f32 %v7129_v47, %v9040_v62  ;;  %v7131_v9 = vadd.f32 %v5329_v45, %v3053_v28  ;;  %v6965_v56 = vpop.f32.mrb[26].mxu1 }
 0x234   : > { %6640 = vst [vmem:[%s9051_s29 + $0x48] sm:$0xff] %v6600_v5   ;;  %v5562_v48 = vmul.f32 0.1, %v5530_v6  ;;  %v5531_v32 = vadd.f32 %v7130_v25, %v9040_v62  ;;  %v3069_v61 = vpop.f32.mrb[27].mxu1 }
 0x235   : > { %6639 = vst [vmem:[%s9051_s29 + $0x40] sm:$0xff] %v6595_v40   ;;  %v5560_v57 = vmul.f32 0.1, %v5528_v3  ;;  %v5529_v63 = vadd.f32 %v7131_v9, %v9040_v62 }
 0x236   : > { %v5563_v0 = vmul.f32 0.1, %v5531_v32  ;;  %v5594_v21 = vmax.f32 %v5530_v6, %v5562_v48 }
 0x237   : > { %v5561_v30 = vmul.f32 0.1, %v5529_v63  ;;  %v7100_v60 = vpop.f32.mrb[24].mxu0  ;;  %v5592_v35 = vmax.f32 %v5528_v3, %v5560_v57 }
 0x238   : > { %v5595_v1 = vmax.f32 %v5531_v32, %v5563_v0  ;;  %v7132_v42 = vadd.f32 %v7100_v60, %v6964_v43  ;;  %v5342_v26 = vpop.f32.mrb[25].mxu0 }
 0x239   : > { %v5593_v36 = vmax.f32 %v5529_v63, %v5561_v30  ;;  %v7133_v37 = vadd.f32 %v5342_v26, %v3066_v27  ;;  %v7101_v52 = vpop.f32.mrb[26].mxu0  ;;  %v6968_v49 = vpop.f32.mrb[28].mxu1 }
 0x23a   : > { %v6610_v34 = vpack.c.bf16 %v5595_v1, %v5594_v21  ;;  %v5534_v50 = vadd.f32 %v7132_v42, %v9040_v62  ;;  %v7134_v14 = vadd.f32 %v7101_v52, %v6965_v56  ;;  %v5345_v53 = vpop.f32.mrb[27].mxu0  ;;  %v3082_v2 = vpop.f32.mrb[29].mxu1 }
 0x23b   : > { %v6605_v29 = vpack.c.bf16 %v5593_v36, %v5592_v35  ;;  %v5532_v54 = vadd.f32 %v7133_v37, %v9040_v62  ;;  %v7135_v7 = vadd.f32 %v5345_v53, %v3069_v61  ;;  %v6969_v16 = vpop.f32.mrb[30].mxu1 }
 0x23c   : > { %6642 = vst [vmem:[%s9051_s29 + $0x58] sm:$0xff] %v6610_v34   ;;  %v5566_v11 = vmul.f32 0.1, %v5534_v50  ;;  %v5535_v33 = vadd.f32 %v7134_v14, %v9040_v62  ;;  %v3085_v10 = vpop.f32.mrb[31].mxu1 }
 0x23d   : > { %6641 = vst [vmem:[%s9051_s29 + $0x50] sm:$0xff] %v6605_v29   ;;  %v5564_v8 = vmul.f32 0.1, %v5532_v54  ;;  %v5533_v59 = vadd.f32 %v7135_v7, %v9040_v62 }
 0x23e   : > { %v5567_v44 = vmul.f32 0.1, %v5535_v33  ;;  %v5598_v18 = vmax.f32 %v5534_v50, %v5566_v11 }
 0x23f   : > { %v5565_v15 = vmul.f32 0.1, %v5533_v59  ;;  %v7104_v12 = vpop.f32.mrb[28].mxu0  ;;  %v5596_v22 = vmax.f32 %v5532_v54, %v5564_v8 }
 0x240   : > { %v5599_v13 = vmax.f32 %v5535_v33, %v5567_v44  ;;  %v7136_v41 = vadd.f32 %v7104_v12, %v6968_v49  ;;  %v5358_v17 = vpop.f32.mrb[29].mxu0 }
 0x241   : > { %v5597_v24 = vmax.f32 %v5533_v59, %v5565_v15  ;;  %v7137_v28 = vadd.f32 %v5358_v17, %v3082_v2  ;;  %v7105_v51 = vpop.f32.mrb[30].mxu0 }
 0x242   : > { %v6620_v38 = vpack.c.bf16 %v5599_v13, %v5598_v18  ;;  %v5538_v31 = vadd.f32 %v7136_v41, %v9040_v62  ;;  %v7138_v58 = vadd.f32 %v7105_v51, %v6969_v16  ;;  %v5361_v19 = vpop.f32.mrb[31].mxu0 }
 0x243   : > { %v6615_v23 = vpack.c.bf16 %v5597_v24, %v5596_v22  ;;  %v5536_v39 = vadd.f32 %v7137_v28, %v9040_v62  ;;  %v7139_v55 = vadd.f32 %v5361_v19, %v3085_v10 }
 0x244   : > { %6644 = vst [vmem:[%s9051_s29 + $0x68] sm:$0xff] %v6620_v38   ;;  %v5570_v46 = vmul.f32 0.1, %v5538_v31  ;;  %v5539_v4 = vadd.f32 %v7138_v58, %v9040_v62 }
 0x245   : > { %6643 = vst [vmem:[%s9051_s29 + $0x60] sm:$0xff] %v6615_v23   ;;  %v5568_v47 = vmul.f32 0.1, %v5536_v39  ;;  %v5537_v20 = vadd.f32 %v7139_v55, %v9040_v62 }
 0x246   : > { %v5571_v5 = vmul.f32 0.1, %v5539_v4  ;;  %v5602_v6 = vmax.f32 %v5538_v31, %v5570_v46 }
 0x247   : > { %v5569_v43 = vmul.f32 0.1, %v5537_v20  ;;  %v5600_v45 = vmax.f32 %v5536_v39, %v5568_v47 }
 0x248   : > { %v5603_v25 = vmax.f32 %v5539_v4, %v5571_v5 }
 0x249   : > { %v5601_v40 = vmax.f32 %v5537_v20, %v5569_v43 }
 0x24a   : > { %v6630_v27 = vpack.c.bf16 %v5603_v25, %v5602_v6 }
 0x24b   : > { %v6625_v62 = vpack.c.bf16 %v5601_v40, %v5600_v45 }
 0x24c   : > { %6646 = vst [vmem:[%s9051_s29 + $0x78] sm:$0xff] %v6630_v27  }
 0x24d   : > { %6645 = vst [vmem:[%s9051_s29 + $0x70] sm:$0xff] %v6625_v62  }
 0x24e   : > { %7544 = shalt.err (!%p7541_p0)
}
 0x24f   : > { %s7545_s6 = scalar_lea.hbm %s9108_s24, 2048  ;;  %s7549_s19 = scalar_lea.hbm %s9181_s3, 32768 }
 0x250   : > { %p7546_p1 = scmp.ne.s32.totalorder %s9108_s24, %s7545_s6  ;;  %p7550_p4 = scmp.lt.u32.totalorder %s9108_s24, %s9181_s3 }
 0x251   : > { %p7551_p5 = scmp.lt.u32.totalorder %s7549_s19, %s7545_s6  ;;  %p7553_p7 = scmp.lt.u32.totalorder %s7545_s6, %s9108_s24 }
 0x252   : > { %p7547_p2 = pnand %p7546_p1, %p7773_p9 }
 0x253   : > { %p7552_p6 = por %p7551_p5, %p7550_p4 }
 0x254   : > { %p7548_p3 = pneg %p7547_p2 }
 0x255   : > { %p7554_p8 = por %p7553_p7, %p7552_p6 }
 0x257   : > { %p7555_p10 = pnand %p7554_p8, %p7548_p3 }
 0x259   : > { %7558 = shalt.err (!%p7555_p10)
}
 0x25a   : > { %s7660_s8 = smov 64   ;;  %s7661_s9 = smov 128  }
 0x25b   : > { %s7662_s4 = smov 4  }
 0x25c   : > { %7367 = dma.vmem_to_hbm [thread:$0]  (%p7773_p9), %s9103_s17, 2048, %s9108_s24, %s9114_s25, %s7660_s8, %s7661_s9, %s7662_s4  }
 0x25d PF: > { %p7373_p11 = scmp.ge.s32.totalorder %s7657_s23, 2  ;;  %s5797_s15 = sand.u32 1, %s7613_s12  }
 0x25e   : > { %s5798_s6 = scalar_lea.sflag [#allocation5], %s5797_s15 }
 0x25f   : > { %p7370_p13 = pnand %p7373_p11, %p7782_p12 }
 0x261   : > { %7608 = dma.done.wait (!%p7370_p13), %s5798_s6, 2048  }
 0x262   : > { %7610 = vsyncadd (!%p7370_p13), %s5798_s6, 4294965248  ;;  %s16_s23 = sadd.s32 1, %s7657_s23   ;;  %s9191_s7 = sld [smem:[#allocation7_spill]] }
 0x263   : > { %p13_p0 = scmp.ge.s32.totalorder %s16_s23, 18   ;;  %s9192_s12 = smov %s7617_s13 }
 0x264   : > { %s9193_s13 = smov %s7621_s14  ;;  %s9194_s14 = smov %s7787_s27 }
 0x265   : > { %s9195_s15 = smov %s7629_s16  ;;  %s9196_s16 = smov %s7765_s5 }
 0x266   : > { %s9197_s17 = smov %s7645_s20  ;;  %s9198_s18 = smov %s7649_s21 }
 0x267   : > { %s9199_s19 = smov %s7653_s22  ;;  %s9200_s20 = smov %s9204_s26 }
 0x268   : > { %s9201_s21 = smov %s9191_s7  ;;  %s9202_s22 = smov %s9212_s28 }
 0x269   :  { %15 = sbr.rel (!%p13_p0) target bundleno = 7 (0x7), region = 130 }
 0x270   :  { %5803 = vsyncpa [#allocation5], 1 }
 0x271   :  { %5805 = vsyncpa [#allocation5 + $0x1], 1 }

</bundles_post_ra>
